<compile_context>
chip_gen: v5e
topology: v5e:2x2
jax: 0.10.0
libtpu: 0.0.40
codegen_flags: <defaults>
</compile_context>

<pallas_src>
import functools

import jax
import jax.numpy as jnp
import numpy as np
from jax.experimental import pallas as pl
from jax.experimental.pallas import tpu as pltpu


# ----------------------------- module config -------------------------------

def calculate_group(in_channels):
    if in_channels < 8:
        return 1
    elif in_channels < 16:
        return 2
    elif in_channels < 32:
        return 3
    else:
        return 4


def split_layer(in_channels, n_chunks):
    split = []
    rest = in_channels
    for _ in range(n_chunks - 1):
        add = rest // 2
        rest -= add
        split.append(add)
    split.append(rest)
    split[n_chunks - 1] += in_channels - sum(split)
    return split


# --------------------------- fused weight packing ---------------------------

def _pack_fused_weights(dw_weights, dw_biases, pw_weight, pw_bias, splits):
    """Fold depthwise (per-chunk k=3/5/7, centered into Kmax) and pointwise
    weights into per-tap MXU weights WkT (K*K, Cout, Cin) and one fused bias.

    Uses jnp ops only, so it is safe under jit/grad (weights may be tracers)."""
    n_chunks = len(splits)
    Kmax = 2 * (n_chunks - 1) + 3
    Cout, Cin = pw_weight.shape[0], pw_weight.shape[1]

    pwwT = pw_weight[:, :, 0, 0]                       # (Cout, Cin)

    chunks = []
    for i, c in enumerate(splits):
        k = 2 * i + 3
        off = (Kmax - k) // 2
        w = jnp.transpose(dw_weights[i][:, 0], (1, 2, 0))        # (k, k, c)
        w = jnp.pad(w, ((off, Kmax - k - off), (off, Kmax - k - off), (0, 0)))
        chunks.append(w)
    dww = jnp.concatenate(chunks, axis=2)              # (Kmax, Kmax, Cin)
    dwb = jnp.concatenate(list(dw_biases), axis=0)     # (Cin,)

    # Fused per-tap weights, pre-transposed for a (Cout, M) lane-dense output.
    wkt = dww[:, :, None, :] * pwwT[None, None, :, :]  # (Kmax, Kmax, Cout, Cin)
    wkt = wkt.reshape(Kmax * Kmax, Cout, Cin).astype(jnp.float32)

    fb = (pwwT @ dwb + pw_bias).reshape(Cout, 1).astype(jnp.float32)
    return wkt, fb, Kmax


# ------------------------------ Pallas kernel ------------------------------

def mixed_conv_kernel(xf_ref, wkt_ref, fb_ref, o_ref, *, H, Wp, Cout, K):
    # xf_ref:  (1, Cin, Hp*Wp + K-1)  zero-padded, flattened input (one batch elem)
    # wkt_ref: (K*K, Cout, Cin)       fused per-tap weights (depthwise x pointwise)
    # fb_ref:  (Cout, 1)              fused bias
    # o_ref:   (1, Cout, H*Wp)        lane-dense output (width still padded; wrapper crops)
    M = H * Wp
    x = xf_ref[0]                                      # (Cin, Lflat), stays in vregs

    y = jnp.zeros((Cout, M), jnp.float32)
    # Statically unrolled tap loop: each tap = one MXU matmul-accumulate.
    # xs is a static lane-offset slice (XLU rotate) of the register-resident x;
    # columns that would wrap across padded rows only feed width positions that
    # the wrapper crops, and the trailing K-1 zeros keep every slice in bounds.
    for kh in range(K):
        for kw in range(K):
            off = kh * Wp + kw
            xs = x[:, off:off + M]                     # (Cin, M)
            y = y + jnp.dot(wkt_ref[kh * K + kw], xs,
                            preferred_element_type=jnp.float32)

    o_ref[0] = (y + fb_ref[...]).astype(o_ref.dtype)


def mixed_conv2d_pallas(x_nchw, dw_weights, dw_biases, pw_weight, pw_bias, splits):
    """x_nchw: (N, Cin, H, W) float32. Returns (N, Cout, H, W). NCHW-native."""
    N, Cin, H, W = x_nchw.shape
    Cout = pw_weight.shape[0]

    wkt, fb, Kmax = _pack_fused_weights(dw_weights, dw_biases, pw_weight,
                                        pw_bias, splits)
    pad = (Kmax - 1) // 2
    Hp, Wp = H + 2 * pad, W + 2 * pad
    M = H * Wp                                   # per-batch matmul width (lanes)
    Lf = Hp * Wp + (Kmax - 1)                    # flat length incl. OOB guard zeros

    # Zero-pad spatially, merge (Hp, Wp) -> Hp*Wp (free metadata reshape for a
    # contiguous NCHW array), and append Kmax-1 zeros so the largest tap offset
    # never reads out of bounds.
    xp = jnp.pad(x_nchw, ((0, 0), (0, 0), (pad, pad), (pad, pad)))
    x_flat = jnp.pad(xp.reshape(N, Cin, Hp * Wp), ((0, 0), (0, 0), (0, Kmax - 1)))

    kernel = functools.partial(mixed_conv_kernel, H=H, Wp=Wp, Cout=Cout, K=Kmax)

    out_flat = pl.pallas_call(
        kernel,
        out_shape=jax.ShapeDtypeStruct((N, Cout, M), jnp.float32),
        grid_spec=pltpu.PrefetchScalarGridSpec(
            num_scalar_prefetch=0,
            grid=(N,),
            in_specs=[
                pl.BlockSpec((1, Cin, Lf), lambda n: (n, 0, 0)),
                pl.BlockSpec((Kmax * Kmax, Cout, Cin), lambda n: (0, 0, 0)),
                pl.BlockSpec((Cout, 1), lambda n: (0, 0)),
            ],
            out_specs=pl.BlockSpec((1, Cout, M), lambda n: (n, 0, 0)),
        ),
        compiler_params=pltpu.CompilerParams(dimension_semantics=("parallel",)),
    )(x_flat, wkt, fb)

    # (N, Cout, H*Wp) -> (N, Cout, H, Wp) is free; crop the padded width columns.
    return out_flat.reshape(N, Cout, H, Wp)[:, :, :, :W]


# --------------------------- pure-JAX reference -----------------------------

def mixed_conv2d_ref(x_nchw, dw_weights, dw_biases, pw_weight, pw_bias, splits):
    outs = []
    start = 0
    for i, c in enumerate(splits):
        k = 2 * i + 3
        pad = (k - 1) // 2
        xs = x_nchw[:, start:start + c]
        y = jax.lax.conv_general_dilated(
            xs, dw_weights[i], window_strides=(1, 1),
            padding=[(pad, pad), (pad, pad)],
            dimension_numbers=("NCHW", "OIHW", "NCHW"),
            feature_group_count=c)
        y = y + dw_biases[i][None, :, None, None]
        outs.append(y)
        start += c
    out = jnp.concatenate(outs, axis=1)
    out = jax.lax.conv_general_dilated(
        out, pw_weight, window_strides=(1, 1), padding=[(0, 0), (0, 0)],
        dimension_numbers=("NCHW", "OIHW", "NCHW"))
    return out + pw_bias[None, :, None, None]


# ---------------------------------- main ------------------------------------

if __name__ == "__main__":
    N, Cin, H, W = 2, 16, 16, 16
    Cout = 32

    n_chunks = calculate_group(Cin)               # 3 for Cin=16
    splits = split_layer(Cin, n_chunks)           # [8, 4, 4] -> kernels 3, 5, 7

    key = jax.random.PRNGKey(0)
    keys = jax.random.split(key, 2 * n_chunks + 3)

    x = jax.random.normal(keys[0], (N, Cin, H, W), jnp.float32)

    dw_weights, dw_biases = [], []
    for i, c in enumerate(splits):
        k = 2 * i + 3
        dw_weights.append(0.1 * jax.random.normal(keys[1 + 2 * i], (c, 1, k, k), jnp.float32))
        dw_biases.append(0.1 * jax.random.normal(keys[2 + 2 * i], (c,), jnp.float32))
    pw_weight = 0.1 * jax.random.normal(keys[-2], (Cout, Cin, 1, 1), jnp.float32)
    pw_bias = 0.1 * jax.random.normal(keys[-1], (Cout,), jnp.float32)

    out = mixed_conv2d_pallas(x, dw_weights, dw_biases, pw_weight, pw_bias, splits)
    out = jax.block_until_ready(out)
    assert out.shape == (N, Cout, H, W)

    ref = mixed_conv2d_ref(x, dw_weights, dw_biases, pw_weight, pw_bias, splits)
    np.testing.assert_allclose(np.asarray(out), np.asarray(ref), rtol=2e-4, atol=2e-4)

    print("KERNEL_OK")
</pallas_src>

<mosaic_0001>
module attributes {stable_mosaic.version = 11 : i64} {
  func.func @mixed_conv_kernel(%arg0: i32, %arg1: memref<1x16x490xf32, #tpu.memory_space<vmem>>, %arg2: memref<49x32x16xf32, #tpu.memory_space<vmem>>, %arg3: memref<32x1xf32, #tpu.memory_space<vmem>>, %arg4: memref<1x32x352xf32, #tpu.memory_space<vmem>>) attributes {dimension_semantics = [#tpu.dimension_semantics<parallel>], iteration_bounds = array<i64: 2>, scalar_prefetch = 0 : i64, scratch_operands = 0 : i64, tpu.core_type = #tpu.core_type<tc>, window_params = [{transform_indices = @transform_0, window_bounds = array<i64: 1, 16, 490>}, {pipeline_mode = #tpu.pipeline_mode<synchronous>, transform_indices = @transform_1, window_bounds = array<i64: 49, 32, 16>}, {pipeline_mode = #tpu.pipeline_mode<synchronous>, transform_indices = @transform_2, window_bounds = array<i64: 32, 1>}, {transform_indices = @transform_3, window_bounds = array<i64: 1, 32, 352>}]} {
    %c0 = arith.constant 0 : index
    %c0_0 = arith.constant 0 : index
    %c0_1 = arith.constant 0 : index
    %0 = vector.load %arg1[%c0, %c0_0, %c0_1] : memref<1x16x490xf32, #tpu.memory_space<vmem>>, vector<1x16x490xf32>
    %1 = vector.shape_cast %0 : vector<1x16x490xf32> to vector<16x490xf32>
    %cst = arith.constant 0.000000e+00 : f32
    %2 = vector.broadcast %cst : f32 to vector<32x352xf32>
    %3 = vector.extract_strided_slice %1 {offsets = [0, 0], sizes = [16, 352], strides = [1, 1]} : vector<16x490xf32> to vector<16x352xf32>
    %c0_2 = arith.constant 0 : index
    %c0_3 = arith.constant 0 : index
    %c0_4 = arith.constant 0 : index
    %4 = vector.load %arg2[%c0_2, %c0_3, %c0_4] : memref<49x32x16xf32, #tpu.memory_space<vmem>>, vector<1x32x16xf32>
    %5 = vector.shape_cast %4 : vector<1x32x16xf32> to vector<32x16xf32>
    %cst_5 = arith.constant dense<0.000000e+00> : vector<32x352xf32>
    %6 = tpu.matmul %5, %3, %cst_5 {dimension_numbers = #tpu.dot_dimension_numbers<[1], [0], [0], [1], [0, 0, 1, 1], [], []>} : vector<32x16xf32>, vector<16x352xf32>, vector<32x352xf32> -> vector<32x352xf32>
    %7 = arith.addf %2, %6 : vector<32x352xf32>
    %8 = vector.extract_strided_slice %1 {offsets = [0, 1], sizes = [16, 352], strides = [1, 1]} : vector<16x490xf32> to vector<16x352xf32>
    %c1 = arith.constant 1 : index
    %c0_6 = arith.constant 0 : index
    %c0_7 = arith.constant 0 : index
    %9 = vector.load %arg2[%c1, %c0_6, %c0_7] : memref<49x32x16xf32, #tpu.memory_space<vmem>>, vector<1x32x16xf32>
    %10 = vector.shape_cast %9 : vector<1x32x16xf32> to vector<32x16xf32>
    %cst_8 = arith.constant dense<0.000000e+00> : vector<32x352xf32>
    %11 = tpu.matmul %10, %8, %cst_8 {dimension_numbers = #tpu.dot_dimension_numbers<[1], [0], [0], [1], [0, 0, 1, 1], [], []>} : vector<32x16xf32>, vector<16x352xf32>, vector<32x352xf32> -> vector<32x352xf32>
    %12 = arith.addf %7, %11 : vector<32x352xf32>
    %13 = vector.extract_strided_slice %1 {offsets = [0, 2], sizes = [16, 352], strides = [1, 1]} : vector<16x490xf32> to vector<16x352xf32>
    %c2 = arith.constant 2 : index
    %c0_9 = arith.constant 0 : index
    %c0_10 = arith.constant 0 : index
    %14 = vector.load %arg2[%c2, %c0_9, %c0_10] : memref<49x32x16xf32, #tpu.memory_space<vmem>>, vector<1x32x16xf32>
    %15 = vector.shape_cast %14 : vector<1x32x16xf32> to vector<32x16xf32>
    %cst_11 = arith.constant dense<0.000000e+00> : vector<32x352xf32>
    %16 = tpu.matmul %15, %13, %cst_11 {dimension_numbers = #tpu.dot_dimension_numbers<[1], [0], [0], [1], [0, 0, 1, 1], [], []>} : vector<32x16xf32>, vector<16x352xf32>, vector<32x352xf32> -> vector<32x352xf32>
    %17 = arith.addf %12, %16 : vector<32x352xf32>
    %18 = vector.extract_strided_slice %1 {offsets = [0, 3], sizes = [16, 352], strides = [1, 1]} : vector<16x490xf32> to vector<16x352xf32>
    %c3 = arith.constant 3 : index
    %c0_12 = arith.constant 0 : index
    %c0_13 = arith.constant 0 : index
    %19 = vector.load %arg2[%c3, %c0_12, %c0_13] : memref<49x32x16xf32, #tpu.memory_space<vmem>>, vector<1x32x16xf32>
    %20 = vector.shape_cast %19 : vector<1x32x16xf32> to vector<32x16xf32>
    %cst_14 = arith.constant dense<0.000000e+00> : vector<32x352xf32>
    %21 = tpu.matmul %20, %18, %cst_14 {dimension_numbers = #tpu.dot_dimension_numbers<[1], [0], [0], [1], [0, 0, 1, 1], [], []>} : vector<32x16xf32>, vector<16x352xf32>, vector<32x352xf32> -> vector<32x352xf32>
    %22 = arith.addf %17, %21 : vector<32x352xf32>
    %23 = vector.extract_strided_slice %1 {offsets = [0, 4], sizes = [16, 352], strides = [1, 1]} : vector<16x490xf32> to vector<16x352xf32>
    %c4 = arith.constant 4 : index
    %c0_15 = arith.constant 0 : index
    %c0_16 = arith.constant 0 : index
    %24 = vector.load %arg2[%c4, %c0_15, %c0_16] : memref<49x32x16xf32, #tpu.memory_space<vmem>>, vector<1x32x16xf32>
    %25 = vector.shape_cast %24 : vector<1x32x16xf32> to vector<32x16xf32>
    %cst_17 = arith.constant dense<0.000000e+00> : vector<32x352xf32>
    %26 = tpu.matmul %25, %23, %cst_17 {dimension_numbers = #tpu.dot_dimension_numbers<[1], [0], [0], [1], [0, 0, 1, 1], [], []>} : vector<32x16xf32>, vector<16x352xf32>, vector<32x352xf32> -> vector<32x352xf32>
    %27 = arith.addf %22, %26 : vector<32x352xf32>
    %28 = vector.extract_strided_slice %1 {offsets = [0, 5], sizes = [16, 352], strides = [1, 1]} : vector<16x490xf32> to vector<16x352xf32>
    %c5 = arith.constant 5 : index
    %c0_18 = arith.constant 0 : index
    %c0_19 = arith.constant 0 : index
    %29 = vector.load %arg2[%c5, %c0_18, %c0_19] : memref<49x32x16xf32, #tpu.memory_space<vmem>>, vector<1x32x16xf32>
    %30 = vector.shape_cast %29 : vector<1x32x16xf32> to vector<32x16xf32>
    %cst_20 = arith.constant dense<0.000000e+00> : vector<32x352xf32>
    %31 = tpu.matmul %30, %28, %cst_20 {dimension_numbers = #tpu.dot_dimension_numbers<[1], [0], [0], [1], [0, 0, 1, 1], [], []>} : vector<32x16xf32>, vector<16x352xf32>, vector<32x352xf32> -> vector<32x352xf32>
    %32 = arith.addf %27, %31 : vector<32x352xf32>
    %33 = vector.extract_strided_slice %1 {offsets = [0, 6], sizes = [16, 352], strides = [1, 1]} : vector<16x490xf32> to vector<16x352xf32>
    %c6 = arith.constant 6 : index
    %c0_21 = arith.constant 0 : index
    %c0_22 = arith.constant 0 : index
    %34 = vector.load %arg2[%c6, %c0_21, %c0_22] : memref<49x32x16xf32, #tpu.memory_space<vmem>>, vector<1x32x16xf32>
    %35 = vector.shape_cast %34 : vector<1x32x16xf32> to vector<32x16xf32>
    %cst_23 = arith.constant dense<0.000000e+00> : vector<32x352xf32>
    %36 = tpu.matmul %35, %33, %cst_23 {dimension_numbers = #tpu.dot_dimension_numbers<[1], [0], [0], [1], [0, 0, 1, 1], [], []>} : vector<32x16xf32>, vector<16x352xf32>, vector<32x352xf32> -> vector<32x352xf32>
    %37 = arith.addf %32, %36 : vector<32x352xf32>
    %38 = vector.extract_strided_slice %1 {offsets = [0, 22], sizes = [16, 352], strides = [1, 1]} : vector<16x490xf32> to vector<16x352xf32>
    %c7 = arith.constant 7 : index
    %c0_24 = arith.constant 0 : index
    %c0_25 = arith.constant 0 : index
    %39 = vector.load %arg2[%c7, %c0_24, %c0_25] : memref<49x32x16xf32, #tpu.memory_space<vmem>>, vector<1x32x16xf32>
    %40 = vector.shape_cast %39 : vector<1x32x16xf32> to vector<32x16xf32>
    %cst_26 = arith.constant dense<0.000000e+00> : vector<32x352xf32>
    %41 = tpu.matmul %40, %38, %cst_26 {dimension_numbers = #tpu.dot_dimension_numbers<[1], [0], [0], [1], [0, 0, 1, 1], [], []>} : vector<32x16xf32>, vector<16x352xf32>, vector<32x352xf32> -> vector<32x352xf32>
    %42 = arith.addf %37, %41 : vector<32x352xf32>
    %43 = vector.extract_strided_slice %1 {offsets = [0, 23], sizes = [16, 352], strides = [1, 1]} : vector<16x490xf32> to vector<16x352xf32>
    %c8 = arith.constant 8 : index
    %c0_27 = arith.constant 0 : index
    %c0_28 = arith.constant 0 : index
    %44 = vector.load %arg2[%c8, %c0_27, %c0_28] : memref<49x32x16xf32, #tpu.memory_space<vmem>>, vector<1x32x16xf32>
    %45 = vector.shape_cast %44 : vector<1x32x16xf32> to vector<32x16xf32>
    %cst_29 = arith.constant dense<0.000000e+00> : vector<32x352xf32>
    %46 = tpu.matmul %45, %43, %cst_29 {dimension_numbers = #tpu.dot_dimension_numbers<[1], [0], [0], [1], [0, 0, 1, 1], [], []>} : vector<32x16xf32>, vector<16x352xf32>, vector<32x352xf32> -> vector<32x352xf32>
    %47 = arith.addf %42, %46 : vector<32x352xf32>
    %48 = vector.extract_strided_slice %1 {offsets = [0, 24], sizes = [16, 352], strides = [1, 1]} : vector<16x490xf32> to vector<16x352xf32>
    %c9 = arith.constant 9 : index
    %c0_30 = arith.constant 0 : index
    %c0_31 = arith.constant 0 : index
    %49 = vector.load %arg2[%c9, %c0_30, %c0_31] : memref<49x32x16xf32, #tpu.memory_space<vmem>>, vector<1x32x16xf32>
    %50 = vector.shape_cast %49 : vector<1x32x16xf32> to vector<32x16xf32>
    %cst_32 = arith.constant dense<0.000000e+00> : vector<32x352xf32>
    %51 = tpu.matmul %50, %48, %cst_32 {dimension_numbers = #tpu.dot_dimension_numbers<[1], [0], [0], [1], [0, 0, 1, 1], [], []>} : vector<32x16xf32>, vector<16x352xf32>, vector<32x352xf32> -> vector<32x352xf32>
    %52 = arith.addf %47, %51 : vector<32x352xf32>
    %53 = vector.extract_strided_slice %1 {offsets = [0, 25], sizes = [16, 352], strides = [1, 1]} : vector<16x490xf32> to vector<16x352xf32>
    %c10 = arith.constant 10 : index
    %c0_33 = arith.constant 0 : index
    %c0_34 = arith.constant 0 : index
    %54 = vector.load %arg2[%c10, %c0_33, %c0_34] : memref<49x32x16xf32, #tpu.memory_space<vmem>>, vector<1x32x16xf32>
    %55 = vector.shape_cast %54 : vector<1x32x16xf32> to vector<32x16xf32>
    %cst_35 = arith.constant dense<0.000000e+00> : vector<32x352xf32>
    %56 = tpu.matmul %55, %53, %cst_35 {dimension_numbers = #tpu.dot_dimension_numbers<[1], [0], [0], [1], [0, 0, 1, 1], [], []>} : vector<32x16xf32>, vector<16x352xf32>, vector<32x352xf32> -> vector<32x352xf32>
    %57 = arith.addf %52, %56 : vector<32x352xf32>
    %58 = vector.extract_strided_slice %1 {offsets = [0, 26], sizes = [16, 352], strides = [1, 1]} : vector<16x490xf32> to vector<16x352xf32>
    %c11 = arith.constant 11 : index
    %c0_36 = arith.constant 0 : index
    %c0_37 = arith.constant 0 : index
    %59 = vector.load %arg2[%c11, %c0_36, %c0_37] : memref<49x32x16xf32, #tpu.memory_space<vmem>>, vector<1x32x16xf32>
    %60 = vector.shape_cast %59 : vector<1x32x16xf32> to vector<32x16xf32>
    %cst_38 = arith.constant dense<0.000000e+00> : vector<32x352xf32>
    %61 = tpu.matmul %60, %58, %cst_38 {dimension_numbers = #tpu.dot_dimension_numbers<[1], [0], [0], [1], [0, 0, 1, 1], [], []>} : vector<32x16xf32>, vector<16x352xf32>, vector<32x352xf32> -> vector<32x352xf32>
    %62 = arith.addf %57, %61 : vector<32x352xf32>
    %63 = vector.extract_strided_slice %1 {offsets = [0, 27], sizes = [16, 352], strides = [1, 1]} : vector<16x490xf32> to vector<16x352xf32>
    %c12 = arith.constant 12 : index
    %c0_39 = arith.constant 0 : index
    %c0_40 = arith.constant 0 : index
    %64 = vector.load %arg2[%c12, %c0_39, %c0_40] : memref<49x32x16xf32, #tpu.memory_space<vmem>>, vector<1x32x16xf32>
    %65 = vector.shape_cast %64 : vector<1x32x16xf32> to vector<32x16xf32>
    %cst_41 = arith.constant dense<0.000000e+00> : vector<32x352xf32>
    %66 = tpu.matmul %65, %63, %cst_41 {dimension_numbers = #tpu.dot_dimension_numbers<[1], [0], [0], [1], [0, 0, 1, 1], [], []>} : vector<32x16xf32>, vector<16x352xf32>, vector<32x352xf32> -> vector<32x352xf32>
    %67 = arith.addf %62, %66 : vector<32x352xf32>
    %68 = vector.extract_strided_slice %1 {offsets = [0, 28], sizes = [16, 352], strides = [1, 1]} : vector<16x490xf32> to vector<16x352xf32>
    %c13 = arith.constant 13 : index
    %c0_42 = arith.constant 0 : index
    %c0_43 = arith.constant 0 : index
    %69 = vector.load %arg2[%c13, %c0_42, %c0_43] : memref<49x32x16xf32, #tpu.memory_space<vmem>>, vector<1x32x16xf32>
    %70 = vector.shape_cast %69 : vector<1x32x16xf32> to vector<32x16xf32>
    %cst_44 = arith.constant dense<0.000000e+00> : vector<32x352xf32>
    %71 = tpu.matmul %70, %68, %cst_44 {dimension_numbers = #tpu.dot_dimension_numbers<[1], [0], [0], [1], [0, 0, 1, 1], [], []>} : vector<32x16xf32>, vector<16x352xf32>, vector<32x352xf32> -> vector<32x352xf32>
    %72 = arith.addf %67, %71 : vector<32x352xf32>
    %73 = vector.extract_strided_slice %1 {offsets = [0, 44], sizes = [16, 352], strides = [1, 1]} : vector<16x490xf32> to vector<16x352xf32>
    %c14 = arith.constant 14 : index
    %c0_45 = arith.constant 0 : index
    %c0_46 = arith.constant 0 : index
    %74 = vector.load %arg2[%c14, %c0_45, %c0_46] : memref<49x32x16xf32, #tpu.memory_space<vmem>>, vector<1x32x16xf32>
    %75 = vector.shape_cast %74 : vector<1x32x16xf32> to vector<32x16xf32>
    %cst_47 = arith.constant dense<0.000000e+00> : vector<32x352xf32>
    %76 = tpu.matmul %75, %73, %cst_47 {dimension_numbers = #tpu.dot_dimension_numbers<[1], [0], [0], [1], [0, 0, 1, 1], [], []>} : vector<32x16xf32>, vector<16x352xf32>, vector<32x352xf32> -> vector<32x352xf32>
    %77 = arith.addf %72, %76 : vector<32x352xf32>
    %78 = vector.extract_strided_slice %1 {offsets = [0, 45], sizes = [16, 352], strides = [1, 1]} : vector<16x490xf32> to vector<16x352xf32>
    %c15 = arith.constant 15 : index
    %c0_48 = arith.constant 0 : index
    %c0_49 = arith.constant 0 : index
    %79 = vector.load %arg2[%c15, %c0_48, %c0_49] : memref<49x32x16xf32, #tpu.memory_space<vmem>>, vector<1x32x16xf32>
    %80 = vector.shape_cast %79 : vector<1x32x16xf32> to vector<32x16xf32>
    %cst_50 = arith.constant dense<0.000000e+00> : vector<32x352xf32>
    %81 = tpu.matmul %80, %78, %cst_50 {dimension_numbers = #tpu.dot_dimension_numbers<[1], [0], [0], [1], [0, 0, 1, 1], [], []>} : vector<32x16xf32>, vector<16x352xf32>, vector<32x352xf32> -> vector<32x352xf32>
    %82 = arith.addf %77, %81 : vector<32x352xf32>
    %83 = vector.extract_strided_slice %1 {offsets = [0, 46], sizes = [16, 352], strides = [1, 1]} : vector<16x490xf32> to vector<16x352xf32>
    %c16 = arith.constant 16 : index
    %c0_51 = arith.constant 0 : index
    %c0_52 = arith.constant 0 : index
    %84 = vector.load %arg2[%c16, %c0_51, %c0_52] : memref<49x32x16xf32, #tpu.memory_space<vmem>>, vector<1x32x16xf32>
    %85 = vector.shape_cast %84 : vector<1x32x16xf32> to vector<32x16xf32>
    %cst_53 = arith.constant dense<0.000000e+00> : vector<32x352xf32>
    %86 = tpu.matmul %85, %83, %cst_53 {dimension_numbers = #tpu.dot_dimension_numbers<[1], [0], [0], [1], [0, 0, 1, 1], [], []>} : vector<32x16xf32>, vector<16x352xf32>, vector<32x352xf32> -> vector<32x352xf32>
    %87 = arith.addf %82, %86 : vector<32x352xf32>
    %88 = vector.extract_strided_slice %1 {offsets = [0, 47], sizes = [16, 352], strides = [1, 1]} : vector<16x490xf32> to vector<16x352xf32>
    %c17 = arith.constant 17 : index
    %c0_54 = arith.constant 0 : index
    %c0_55 = arith.constant 0 : index
    %89 = vector.load %arg2[%c17, %c0_54, %c0_55] : memref<49x32x16xf32, #tpu.memory_space<vmem>>, vector<1x32x16xf32>
    %90 = vector.shape_cast %89 : vector<1x32x16xf32> to vector<32x16xf32>
    %cst_56 = arith.constant dense<0.000000e+00> : vector<32x352xf32>
    %91 = tpu.matmul %90, %88, %cst_56 {dimension_numbers = #tpu.dot_dimension_numbers<[1], [0], [0], [1], [0, 0, 1, 1], [], []>} : vector<32x16xf32>, vector<16x352xf32>, vector<32x352xf32> -> vector<32x352xf32>
    %92 = arith.addf %87, %91 : vector<32x352xf32>
    %93 = vector.extract_strided_slice %1 {offsets = [0, 48], sizes = [16, 352], strides = [1, 1]} : vector<16x490xf32> to vector<16x352xf32>
    %c18 = arith.constant 18 : index
    %c0_57 = arith.constant 0 : index
    %c0_58 = arith.constant 0 : index
    %94 = vector.load %arg2[%c18, %c0_57, %c0_58] : memref<49x32x16xf32, #tpu.memory_space<vmem>>, vector<1x32x16xf32>
    %95 = vector.shape_cast %94 : vector<1x32x16xf32> to vector<32x16xf32>
    %cst_59 = arith.constant dense<0.000000e+00> : vector<32x352xf32>
    %96 = tpu.matmul %95, %93, %cst_59 {dimension_numbers = #tpu.dot_dimension_numbers<[1], [0], [0], [1], [0, 0, 1, 1], [], []>} : vector<32x16xf32>, vector<16x352xf32>, vector<32x352xf32> -> vector<32x352xf32>
    %97 = arith.addf %92, %96 : vector<32x352xf32>
    %98 = vector.extract_strided_slice %1 {offsets = [0, 49], sizes = [16, 352], strides = [1, 1]} : vector<16x490xf32> to vector<16x352xf32>
    %c19 = arith.constant 19 : index
    %c0_60 = arith.constant 0 : index
    %c0_61 = arith.constant 0 : index
    %99 = vector.load %arg2[%c19, %c0_60, %c0_61] : memref<49x32x16xf32, #tpu.memory_space<vmem>>, vector<1x32x16xf32>
    %100 = vector.shape_cast %99 : vector<1x32x16xf32> to vector<32x16xf32>
    %cst_62 = arith.constant dense<0.000000e+00> : vector<32x352xf32>
    %101 = tpu.matmul %100, %98, %cst_62 {dimension_numbers = #tpu.dot_dimension_numbers<[1], [0], [0], [1], [0, 0, 1, 1], [], []>} : vector<32x16xf32>, vector<16x352xf32>, vector<32x352xf32> -> vector<32x352xf32>
    %102 = arith.addf %97, %101 : vector<32x352xf32>
    %103 = vector.extract_strided_slice %1 {offsets = [0, 50], sizes = [16, 352], strides = [1, 1]} : vector<16x490xf32> to vector<16x352xf32>
    %c20 = arith.constant 20 : index
    %c0_63 = arith.constant 0 : index
    %c0_64 = arith.constant 0 : index
    %104 = vector.load %arg2[%c20, %c0_63, %c0_64] : memref<49x32x16xf32, #tpu.memory_space<vmem>>, vector<1x32x16xf32>
    %105 = vector.shape_cast %104 : vector<1x32x16xf32> to vector<32x16xf32>
    %cst_65 = arith.constant dense<0.000000e+00> : vector<32x352xf32>
    %106 = tpu.matmul %105, %103, %cst_65 {dimension_numbers = #tpu.dot_dimension_numbers<[1], [0], [0], [1], [0, 0, 1, 1], [], []>} : vector<32x16xf32>, vector<16x352xf32>, vector<32x352xf32> -> vector<32x352xf32>
    %107 = arith.addf %102, %106 : vector<32x352xf32>
    %108 = vector.extract_strided_slice %1 {offsets = [0, 66], sizes = [16, 352], strides = [1, 1]} : vector<16x490xf32> to vector<16x352xf32>
    %c21 = arith.constant 21 : index
    %c0_66 = arith.constant 0 : index
    %c0_67 = arith.constant 0 : index
    %109 = vector.load %arg2[%c21, %c0_66, %c0_67] : memref<49x32x16xf32, #tpu.memory_space<vmem>>, vector<1x32x16xf32>
    %110 = vector.shape_cast %109 : vector<1x32x16xf32> to vector<32x16xf32>
    %cst_68 = arith.constant dense<0.000000e+00> : vector<32x352xf32>
    %111 = tpu.matmul %110, %108, %cst_68 {dimension_numbers = #tpu.dot_dimension_numbers<[1], [0], [0], [1], [0, 0, 1, 1], [], []>} : vector<32x16xf32>, vector<16x352xf32>, vector<32x352xf32> -> vector<32x352xf32>
    %112 = arith.addf %107, %111 : vector<32x352xf32>
    %113 = vector.extract_strided_slice %1 {offsets = [0, 67], sizes = [16, 352], strides = [1, 1]} : vector<16x490xf32> to vector<16x352xf32>
    %c22 = arith.constant 22 : index
    %c0_69 = arith.constant 0 : index
    %c0_70 = arith.constant 0 : index
    %114 = vector.load %arg2[%c22, %c0_69, %c0_70] : memref<49x32x16xf32, #tpu.memory_space<vmem>>, vector<1x32x16xf32>
    %115 = vector.shape_cast %114 : vector<1x32x16xf32> to vector<32x16xf32>
    %cst_71 = arith.constant dense<0.000000e+00> : vector<32x352xf32>
    %116 = tpu.matmul %115, %113, %cst_71 {dimension_numbers = #tpu.dot_dimension_numbers<[1], [0], [0], [1], [0, 0, 1, 1], [], []>} : vector<32x16xf32>, vector<16x352xf32>, vector<32x352xf32> -> vector<32x352xf32>
    %117 = arith.addf %112, %116 : vector<32x352xf32>
    %118 = vector.extract_strided_slice %1 {offsets = [0, 68], sizes = [16, 352], strides = [1, 1]} : vector<16x490xf32> to vector<16x352xf32>
    %c23 = arith.constant 23 : index
    %c0_72 = arith.constant 0 : index
    %c0_73 = arith.constant 0 : index
    %119 = vector.load %arg2[%c23, %c0_72, %c0_73] : memref<49x32x16xf32, #tpu.memory_space<vmem>>, vector<1x32x16xf32>
    %120 = vector.shape_cast %119 : vector<1x32x16xf32> to vector<32x16xf32>
    %cst_74 = arith.constant dense<0.000000e+00> : vector<32x352xf32>
    %121 = tpu.matmul %120, %118, %cst_74 {dimension_numbers = #tpu.dot_dimension_numbers<[1], [0], [0], [1], [0, 0, 1, 1], [], []>} : vector<32x16xf32>, vector<16x352xf32>, vector<32x352xf32> -> vector<32x352xf32>
    %122 = arith.addf %117, %121 : vector<32x352xf32>
    %123 = vector.extract_strided_slice %1 {offsets = [0, 69], sizes = [16, 352], strides = [1, 1]} : vector<16x490xf32> to vector<16x352xf32>
    %c24 = arith.constant 24 : index
    %c0_75 = arith.constant 0 : index
    %c0_76 = arith.constant 0 : index
    %124 = vector.load %arg2[%c24, %c0_75, %c0_76] : memref<49x32x16xf32, #tpu.memory_space<vmem>>, vector<1x32x16xf32>
    %125 = vector.shape_cast %124 : vector<1x32x16xf32> to vector<32x16xf32>
    %cst_77 = arith.constant dense<0.000000e+00> : vector<32x352xf32>
    %126 = tpu.matmul %125, %123, %cst_77 {dimension_numbers = #tpu.dot_dimension_numbers<[1], [0], [0], [1], [0, 0, 1, 1], [], []>} : vector<32x16xf32>, vector<16x352xf32>, vector<32x352xf32> -> vector<32x352xf32>
    %127 = arith.addf %122, %126 : vector<32x352xf32>
    %128 = vector.extract_strided_slice %1 {offsets = [0, 70], sizes = [16, 352], strides = [1, 1]} : vector<16x490xf32> to vector<16x352xf32>
    %c25 = arith.constant 25 : index
    %c0_78 = arith.constant 0 : index
    %c0_79 = arith.constant 0 : index
    %129 = vector.load %arg2[%c25, %c0_78, %c0_79] : memref<49x32x16xf32, #tpu.memory_space<vmem>>, vector<1x32x16xf32>
    %130 = vector.shape_cast %129 : vector<1x32x16xf32> to vector<32x16xf32>
    %cst_80 = arith.constant dense<0.000000e+00> : vector<32x352xf32>
    %131 = tpu.matmul %130, %128, %cst_80 {dimension_numbers = #tpu.dot_dimension_numbers<[1], [0], [0], [1], [0, 0, 1, 1], [], []>} : vector<32x16xf32>, vector<16x352xf32>, vector<32x352xf32> -> vector<32x352xf32>
    %132 = arith.addf %127, %131 : vector<32x352xf32>
    %133 = vector.extract_strided_slice %1 {offsets = [0, 71], sizes = [16, 352], strides = [1, 1]} : vector<16x490xf32> to vector<16x352xf32>
    %c26 = arith.constant 26 : index
    %c0_81 = arith.constant 0 : index
    %c0_82 = arith.constant 0 : index
    %134 = vector.load %arg2[%c26, %c0_81, %c0_82] : memref<49x32x16xf32, #tpu.memory_space<vmem>>, vector<1x32x16xf32>
    %135 = vector.shape_cast %134 : vector<1x32x16xf32> to vector<32x16xf32>
    %cst_83 = arith.constant dense<0.000000e+00> : vector<32x352xf32>
    %136 = tpu.matmul %135, %133, %cst_83 {dimension_numbers = #tpu.dot_dimension_numbers<[1], [0], [0], [1], [0, 0, 1, 1], [], []>} : vector<32x16xf32>, vector<16x352xf32>, vector<32x352xf32> -> vector<32x352xf32>
    %137 = arith.addf %132, %136 : vector<32x352xf32>
    %138 = vector.extract_strided_slice %1 {offsets = [0, 72], sizes = [16, 352], strides = [1, 1]} : vector<16x490xf32> to vector<16x352xf32>
    %c27 = arith.constant 27 : index
    %c0_84 = arith.constant 0 : index
    %c0_85 = arith.constant 0 : index
    %139 = vector.load %arg2[%c27, %c0_84, %c0_85] : memref<49x32x16xf32, #tpu.memory_space<vmem>>, vector<1x32x16xf32>
    %140 = vector.shape_cast %139 : vector<1x32x16xf32> to vector<32x16xf32>
    %cst_86 = arith.constant dense<0.000000e+00> : vector<32x352xf32>
    %141 = tpu.matmul %140, %138, %cst_86 {dimension_numbers = #tpu.dot_dimension_numbers<[1], [0], [0], [1], [0, 0, 1, 1], [], []>} : vector<32x16xf32>, vector<16x352xf32>, vector<32x352xf32> -> vector<32x352xf32>
    %142 = arith.addf %137, %141 : vector<32x352xf32>
    %143 = vector.extract_strided_slice %1 {offsets = [0, 88], sizes = [16, 352], strides = [1, 1]} : vector<16x490xf32> to vector<16x352xf32>
    %c28 = arith.constant 28 : index
    %c0_87 = arith.constant 0 : index
    %c0_88 = arith.constant 0 : index
    %144 = vector.load %arg2[%c28, %c0_87, %c0_88] : memref<49x32x16xf32, #tpu.memory_space<vmem>>, vector<1x32x16xf32>
    %145 = vector.shape_cast %144 : vector<1x32x16xf32> to vector<32x16xf32>
    %cst_89 = arith.constant dense<0.000000e+00> : vector<32x352xf32>
    %146 = tpu.matmul %145, %143, %cst_89 {dimension_numbers = #tpu.dot_dimension_numbers<[1], [0], [0], [1], [0, 0, 1, 1], [], []>} : vector<32x16xf32>, vector<16x352xf32>, vector<32x352xf32> -> vector<32x352xf32>
    %147 = arith.addf %142, %146 : vector<32x352xf32>
    %148 = vector.extract_strided_slice %1 {offsets = [0, 89], sizes = [16, 352], strides = [1, 1]} : vector<16x490xf32> to vector<16x352xf32>
    %c29 = arith.constant 29 : index
    %c0_90 = arith.constant 0 : index
    %c0_91 = arith.constant 0 : index
    %149 = vector.load %arg2[%c29, %c0_90, %c0_91] : memref<49x32x16xf32, #tpu.memory_space<vmem>>, vector<1x32x16xf32>
    %150 = vector.shape_cast %149 : vector<1x32x16xf32> to vector<32x16xf32>
    %cst_92 = arith.constant dense<0.000000e+00> : vector<32x352xf32>
    %151 = tpu.matmul %150, %148, %cst_92 {dimension_numbers = #tpu.dot_dimension_numbers<[1], [0], [0], [1], [0, 0, 1, 1], [], []>} : vector<32x16xf32>, vector<16x352xf32>, vector<32x352xf32> -> vector<32x352xf32>
    %152 = arith.addf %147, %151 : vector<32x352xf32>
    %153 = vector.extract_strided_slice %1 {offsets = [0, 90], sizes = [16, 352], strides = [1, 1]} : vector<16x490xf32> to vector<16x352xf32>
    %c30 = arith.constant 30 : index
    %c0_93 = arith.constant 0 : index
    %c0_94 = arith.constant 0 : index
    %154 = vector.load %arg2[%c30, %c0_93, %c0_94] : memref<49x32x16xf32, #tpu.memory_space<vmem>>, vector<1x32x16xf32>
    %155 = vector.shape_cast %154 : vector<1x32x16xf32> to vector<32x16xf32>
    %cst_95 = arith.constant dense<0.000000e+00> : vector<32x352xf32>
    %156 = tpu.matmul %155, %153, %cst_95 {dimension_numbers = #tpu.dot_dimension_numbers<[1], [0], [0], [1], [0, 0, 1, 1], [], []>} : vector<32x16xf32>, vector<16x352xf32>, vector<32x352xf32> -> vector<32x352xf32>
    %157 = arith.addf %152, %156 : vector<32x352xf32>
    %158 = vector.extract_strided_slice %1 {offsets = [0, 91], sizes = [16, 352], strides = [1, 1]} : vector<16x490xf32> to vector<16x352xf32>
    %c31 = arith.constant 31 : index
    %c0_96 = arith.constant 0 : index
    %c0_97 = arith.constant 0 : index
    %159 = vector.load %arg2[%c31, %c0_96, %c0_97] : memref<49x32x16xf32, #tpu.memory_space<vmem>>, vector<1x32x16xf32>
    %160 = vector.shape_cast %159 : vector<1x32x16xf32> to vector<32x16xf32>
    %cst_98 = arith.constant dense<0.000000e+00> : vector<32x352xf32>
    %161 = tpu.matmul %160, %158, %cst_98 {dimension_numbers = #tpu.dot_dimension_numbers<[1], [0], [0], [1], [0, 0, 1, 1], [], []>} : vector<32x16xf32>, vector<16x352xf32>, vector<32x352xf32> -> vector<32x352xf32>
    %162 = arith.addf %157, %161 : vector<32x352xf32>
    %163 = vector.extract_strided_slice %1 {offsets = [0, 92], sizes = [16, 352], strides = [1, 1]} : vector<16x490xf32> to vector<16x352xf32>
    %c32 = arith.constant 32 : index
    %c0_99 = arith.constant 0 : index
    %c0_100 = arith.constant 0 : index
    %164 = vector.load %arg2[%c32, %c0_99, %c0_100] : memref<49x32x16xf32, #tpu.memory_space<vmem>>, vector<1x32x16xf32>
    %165 = vector.shape_cast %164 : vector<1x32x16xf32> to vector<32x16xf32>
    %cst_101 = arith.constant dense<0.000000e+00> : vector<32x352xf32>
    %166 = tpu.matmul %165, %163, %cst_101 {dimension_numbers = #tpu.dot_dimension_numbers<[1], [0], [0], [1], [0, 0, 1, 1], [], []>} : vector<32x16xf32>, vector<16x352xf32>, vector<32x352xf32> -> vector<32x352xf32>
    %167 = arith.addf %162, %166 : vector<32x352xf32>
    %168 = vector.extract_strided_slice %1 {offsets = [0, 93], sizes = [16, 352], strides = [1, 1]} : vector<16x490xf32> to vector<16x352xf32>
    %c33 = arith.constant 33 : index
    %c0_102 = arith.constant 0 : index
    %c0_103 = arith.constant 0 : index
    %169 = vector.load %arg2[%c33, %c0_102, %c0_103] : memref<49x32x16xf32, #tpu.memory_space<vmem>>, vector<1x32x16xf32>
    %170 = vector.shape_cast %169 : vector<1x32x16xf32> to vector<32x16xf32>
    %cst_104 = arith.constant dense<0.000000e+00> : vector<32x352xf32>
    %171 = tpu.matmul %170, %168, %cst_104 {dimension_numbers = #tpu.dot_dimension_numbers<[1], [0], [0], [1], [0, 0, 1, 1], [], []>} : vector<32x16xf32>, vector<16x352xf32>, vector<32x352xf32> -> vector<32x352xf32>
    %172 = arith.addf %167, %171 : vector<32x352xf32>
    %173 = vector.extract_strided_slice %1 {offsets = [0, 94], sizes = [16, 352], strides = [1, 1]} : vector<16x490xf32> to vector<16x352xf32>
    %c34 = arith.constant 34 : index
    %c0_105 = arith.constant 0 : index
    %c0_106 = arith.constant 0 : index
    %174 = vector.load %arg2[%c34, %c0_105, %c0_106] : memref<49x32x16xf32, #tpu.memory_space<vmem>>, vector<1x32x16xf32>
    %175 = vector.shape_cast %174 : vector<1x32x16xf32> to vector<32x16xf32>
    %cst_107 = arith.constant dense<0.000000e+00> : vector<32x352xf32>
    %176 = tpu.matmul %175, %173, %cst_107 {dimension_numbers = #tpu.dot_dimension_numbers<[1], [0], [0], [1], [0, 0, 1, 1], [], []>} : vector<32x16xf32>, vector<16x352xf32>, vector<32x352xf32> -> vector<32x352xf32>
    %177 = arith.addf %172, %176 : vector<32x352xf32>
    %178 = vector.extract_strided_slice %1 {offsets = [0, 110], sizes = [16, 352], strides = [1, 1]} : vector<16x490xf32> to vector<16x352xf32>
    %c35 = arith.constant 35 : index
    %c0_108 = arith.constant 0 : index
    %c0_109 = arith.constant 0 : index
    %179 = vector.load %arg2[%c35, %c0_108, %c0_109] : memref<49x32x16xf32, #tpu.memory_space<vmem>>, vector<1x32x16xf32>
    %180 = vector.shape_cast %179 : vector<1x32x16xf32> to vector<32x16xf32>
    %cst_110 = arith.constant dense<0.000000e+00> : vector<32x352xf32>
    %181 = tpu.matmul %180, %178, %cst_110 {dimension_numbers = #tpu.dot_dimension_numbers<[1], [0], [0], [1], [0, 0, 1, 1], [], []>} : vector<32x16xf32>, vector<16x352xf32>, vector<32x352xf32> -> vector<32x352xf32>
    %182 = arith.addf %177, %181 : vector<32x352xf32>
    %183 = vector.extract_strided_slice %1 {offsets = [0, 111], sizes = [16, 352], strides = [1, 1]} : vector<16x490xf32> to vector<16x352xf32>
    %c36 = arith.constant 36 : index
    %c0_111 = arith.constant 0 : index
    %c0_112 = arith.constant 0 : index
    %184 = vector.load %arg2[%c36, %c0_111, %c0_112] : memref<49x32x16xf32, #tpu.memory_space<vmem>>, vector<1x32x16xf32>
    %185 = vector.shape_cast %184 : vector<1x32x16xf32> to vector<32x16xf32>
    %cst_113 = arith.constant dense<0.000000e+00> : vector<32x352xf32>
    %186 = tpu.matmul %185, %183, %cst_113 {dimension_numbers = #tpu.dot_dimension_numbers<[1], [0], [0], [1], [0, 0, 1, 1], [], []>} : vector<32x16xf32>, vector<16x352xf32>, vector<32x352xf32> -> vector<32x352xf32>
    %187 = arith.addf %182, %186 : vector<32x352xf32>
    %188 = vector.extract_strided_slice %1 {offsets = [0, 112], sizes = [16, 352], strides = [1, 1]} : vector<16x490xf32> to vector<16x352xf32>
    %c37 = arith.constant 37 : index
    %c0_114 = arith.constant 0 : index
    %c0_115 = arith.constant 0 : index
    %189 = vector.load %arg2[%c37, %c0_114, %c0_115] : memref<49x32x16xf32, #tpu.memory_space<vmem>>, vector<1x32x16xf32>
    %190 = vector.shape_cast %189 : vector<1x32x16xf32> to vector<32x16xf32>
    %cst_116 = arith.constant dense<0.000000e+00> : vector<32x352xf32>
    %191 = tpu.matmul %190, %188, %cst_116 {dimension_numbers = #tpu.dot_dimension_numbers<[1], [0], [0], [1], [0, 0, 1, 1], [], []>} : vector<32x16xf32>, vector<16x352xf32>, vector<32x352xf32> -> vector<32x352xf32>
    %192 = arith.addf %187, %191 : vector<32x352xf32>
    %193 = vector.extract_strided_slice %1 {offsets = [0, 113], sizes = [16, 352], strides = [1, 1]} : vector<16x490xf32> to vector<16x352xf32>
    %c38 = arith.constant 38 : index
    %c0_117 = arith.constant 0 : index
    %c0_118 = arith.constant 0 : index
    %194 = vector.load %arg2[%c38, %c0_117, %c0_118] : memref<49x32x16xf32, #tpu.memory_space<vmem>>, vector<1x32x16xf32>
    %195 = vector.shape_cast %194 : vector<1x32x16xf32> to vector<32x16xf32>
    %cst_119 = arith.constant dense<0.000000e+00> : vector<32x352xf32>
    %196 = tpu.matmul %195, %193, %cst_119 {dimension_numbers = #tpu.dot_dimension_numbers<[1], [0], [0], [1], [0, 0, 1, 1], [], []>} : vector<32x16xf32>, vector<16x352xf32>, vector<32x352xf32> -> vector<32x352xf32>
    %197 = arith.addf %192, %196 : vector<32x352xf32>
    %198 = vector.extract_strided_slice %1 {offsets = [0, 114], sizes = [16, 352], strides = [1, 1]} : vector<16x490xf32> to vector<16x352xf32>
    %c39 = arith.constant 39 : index
    %c0_120 = arith.constant 0 : index
    %c0_121 = arith.constant 0 : index
    %199 = vector.load %arg2[%c39, %c0_120, %c0_121] : memref<49x32x16xf32, #tpu.memory_space<vmem>>, vector<1x32x16xf32>
    %200 = vector.shape_cast %199 : vector<1x32x16xf32> to vector<32x16xf32>
    %cst_122 = arith.constant dense<0.000000e+00> : vector<32x352xf32>
    %201 = tpu.matmul %200, %198, %cst_122 {dimension_numbers = #tpu.dot_dimension_numbers<[1], [0], [0], [1], [0, 0, 1, 1], [], []>} : vector<32x16xf32>, vector<16x352xf32>, vector<32x352xf32> -> vector<32x352xf32>
    %202 = arith.addf %197, %201 : vector<32x352xf32>
    %203 = vector.extract_strided_slice %1 {offsets = [0, 115], sizes = [16, 352], strides = [1, 1]} : vector<16x490xf32> to vector<16x352xf32>
    %c40 = arith.constant 40 : index
    %c0_123 = arith.constant 0 : index
    %c0_124 = arith.constant 0 : index
    %204 = vector.load %arg2[%c40, %c0_123, %c0_124] : memref<49x32x16xf32, #tpu.memory_space<vmem>>, vector<1x32x16xf32>
    %205 = vector.shape_cast %204 : vector<1x32x16xf32> to vector<32x16xf32>
    %cst_125 = arith.constant dense<0.000000e+00> : vector<32x352xf32>
    %206 = tpu.matmul %205, %203, %cst_125 {dimension_numbers = #tpu.dot_dimension_numbers<[1], [0], [0], [1], [0, 0, 1, 1], [], []>} : vector<32x16xf32>, vector<16x352xf32>, vector<32x352xf32> -> vector<32x352xf32>
    %207 = arith.addf %202, %206 : vector<32x352xf32>
    %208 = vector.extract_strided_slice %1 {offsets = [0, 116], sizes = [16, 352], strides = [1, 1]} : vector<16x490xf32> to vector<16x352xf32>
    %c41 = arith.constant 41 : index
    %c0_126 = arith.constant 0 : index
    %c0_127 = arith.constant 0 : index
    %209 = vector.load %arg2[%c41, %c0_126, %c0_127] : memref<49x32x16xf32, #tpu.memory_space<vmem>>, vector<1x32x16xf32>
    %210 = vector.shape_cast %209 : vector<1x32x16xf32> to vector<32x16xf32>
    %cst_128 = arith.constant dense<0.000000e+00> : vector<32x352xf32>
    %211 = tpu.matmul %210, %208, %cst_128 {dimension_numbers = #tpu.dot_dimension_numbers<[1], [0], [0], [1], [0, 0, 1, 1], [], []>} : vector<32x16xf32>, vector<16x352xf32>, vector<32x352xf32> -> vector<32x352xf32>
    %212 = arith.addf %207, %211 : vector<32x352xf32>
    %213 = vector.extract_strided_slice %1 {offsets = [0, 132], sizes = [16, 352], strides = [1, 1]} : vector<16x490xf32> to vector<16x352xf32>
    %c42 = arith.constant 42 : index
    %c0_129 = arith.constant 0 : index
    %c0_130 = arith.constant 0 : index
    %214 = vector.load %arg2[%c42, %c0_129, %c0_130] : memref<49x32x16xf32, #tpu.memory_space<vmem>>, vector<1x32x16xf32>
    %215 = vector.shape_cast %214 : vector<1x32x16xf32> to vector<32x16xf32>
    %cst_131 = arith.constant dense<0.000000e+00> : vector<32x352xf32>
    %216 = tpu.matmul %215, %213, %cst_131 {dimension_numbers = #tpu.dot_dimension_numbers<[1], [0], [0], [1], [0, 0, 1, 1], [], []>} : vector<32x16xf32>, vector<16x352xf32>, vector<32x352xf32> -> vector<32x352xf32>
    %217 = arith.addf %212, %216 : vector<32x352xf32>
    %218 = vector.extract_strided_slice %1 {offsets = [0, 133], sizes = [16, 352], strides = [1, 1]} : vector<16x490xf32> to vector<16x352xf32>
    %c43 = arith.constant 43 : index
    %c0_132 = arith.constant 0 : index
    %c0_133 = arith.constant 0 : index
    %219 = vector.load %arg2[%c43, %c0_132, %c0_133] : memref<49x32x16xf32, #tpu.memory_space<vmem>>, vector<1x32x16xf32>
    %220 = vector.shape_cast %219 : vector<1x32x16xf32> to vector<32x16xf32>
    %cst_134 = arith.constant dense<0.000000e+00> : vector<32x352xf32>
    %221 = tpu.matmul %220, %218, %cst_134 {dimension_numbers = #tpu.dot_dimension_numbers<[1], [0], [0], [1], [0, 0, 1, 1], [], []>} : vector<32x16xf32>, vector<16x352xf32>, vector<32x352xf32> -> vector<32x352xf32>
    %222 = arith.addf %217, %221 : vector<32x352xf32>
    %223 = vector.extract_strided_slice %1 {offsets = [0, 134], sizes = [16, 352], strides = [1, 1]} : vector<16x490xf32> to vector<16x352xf32>
    %c44 = arith.constant 44 : index
    %c0_135 = arith.constant 0 : index
    %c0_136 = arith.constant 0 : index
    %224 = vector.load %arg2[%c44, %c0_135, %c0_136] : memref<49x32x16xf32, #tpu.memory_space<vmem>>, vector<1x32x16xf32>
    %225 = vector.shape_cast %224 : vector<1x32x16xf32> to vector<32x16xf32>
    %cst_137 = arith.constant dense<0.000000e+00> : vector<32x352xf32>
    %226 = tpu.matmul %225, %223, %cst_137 {dimension_numbers = #tpu.dot_dimension_numbers<[1], [0], [0], [1], [0, 0, 1, 1], [], []>} : vector<32x16xf32>, vector<16x352xf32>, vector<32x352xf32> -> vector<32x352xf32>
    %227 = arith.addf %222, %226 : vector<32x352xf32>
    %228 = vector.extract_strided_slice %1 {offsets = [0, 135], sizes = [16, 352], strides = [1, 1]} : vector<16x490xf32> to vector<16x352xf32>
    %c45 = arith.constant 45 : index
    %c0_138 = arith.constant 0 : index
    %c0_139 = arith.constant 0 : index
    %229 = vector.load %arg2[%c45, %c0_138, %c0_139] : memref<49x32x16xf32, #tpu.memory_space<vmem>>, vector<1x32x16xf32>
    %230 = vector.shape_cast %229 : vector<1x32x16xf32> to vector<32x16xf32>
    %cst_140 = arith.constant dense<0.000000e+00> : vector<32x352xf32>
    %231 = tpu.matmul %230, %228, %cst_140 {dimension_numbers = #tpu.dot_dimension_numbers<[1], [0], [0], [1], [0, 0, 1, 1], [], []>} : vector<32x16xf32>, vector<16x352xf32>, vector<32x352xf32> -> vector<32x352xf32>
    %232 = arith.addf %227, %231 : vector<32x352xf32>
    %233 = vector.extract_strided_slice %1 {offsets = [0, 136], sizes = [16, 352], strides = [1, 1]} : vector<16x490xf32> to vector<16x352xf32>
    %c46 = arith.constant 46 : index
    %c0_141 = arith.constant 0 : index
    %c0_142 = arith.constant 0 : index
    %234 = vector.load %arg2[%c46, %c0_141, %c0_142] : memref<49x32x16xf32, #tpu.memory_space<vmem>>, vector<1x32x16xf32>
    %235 = vector.shape_cast %234 : vector<1x32x16xf32> to vector<32x16xf32>
    %cst_143 = arith.constant dense<0.000000e+00> : vector<32x352xf32>
    %236 = tpu.matmul %235, %233, %cst_143 {dimension_numbers = #tpu.dot_dimension_numbers<[1], [0], [0], [1], [0, 0, 1, 1], [], []>} : vector<32x16xf32>, vector<16x352xf32>, vector<32x352xf32> -> vector<32x352xf32>
    %237 = arith.addf %232, %236 : vector<32x352xf32>
    %238 = vector.extract_strided_slice %1 {offsets = [0, 137], sizes = [16, 352], strides = [1, 1]} : vector<16x490xf32> to vector<16x352xf32>
    %c47 = arith.constant 47 : index
    %c0_144 = arith.constant 0 : index
    %c0_145 = arith.constant 0 : index
    %239 = vector.load %arg2[%c47, %c0_144, %c0_145] : memref<49x32x16xf32, #tpu.memory_space<vmem>>, vector<1x32x16xf32>
    %240 = vector.shape_cast %239 : vector<1x32x16xf32> to vector<32x16xf32>
    %cst_146 = arith.constant dense<0.000000e+00> : vector<32x352xf32>
    %241 = tpu.matmul %240, %238, %cst_146 {dimension_numbers = #tpu.dot_dimension_numbers<[1], [0], [0], [1], [0, 0, 1, 1], [], []>} : vector<32x16xf32>, vector<16x352xf32>, vector<32x352xf32> -> vector<32x352xf32>
    %242 = arith.addf %237, %241 : vector<32x352xf32>
    %243 = vector.extract_strided_slice %1 {offsets = [0, 138], sizes = [16, 352], strides = [1, 1]} : vector<16x490xf32> to vector<16x352xf32>
    %c48 = arith.constant 48 : index
    %c0_147 = arith.constant 0 : index
    %c0_148 = arith.constant 0 : index
    %244 = vector.load %arg2[%c48, %c0_147, %c0_148] : memref<49x32x16xf32, #tpu.memory_space<vmem>>, vector<1x32x16xf32>
    %245 = vector.shape_cast %244 : vector<1x32x16xf32> to vector<32x16xf32>
    %cst_149 = arith.constant dense<0.000000e+00> : vector<32x352xf32>
    %246 = tpu.matmul %245, %243, %cst_149 {dimension_numbers = #tpu.dot_dimension_numbers<[1], [0], [0], [1], [0, 0, 1, 1], [], []>} : vector<32x16xf32>, vector<16x352xf32>, vector<32x352xf32> -> vector<32x352xf32>
    %247 = arith.addf %242, %246 : vector<32x352xf32>
    %c0_150 = arith.constant 0 : index
    %c0_151 = arith.constant 0 : index
    %248 = vector.load %arg3[%c0_150, %c0_151] : memref<32x1xf32, #tpu.memory_space<vmem>>, vector<32x1xf32>
    %249 = vector.broadcast %248 : vector<32x1xf32> to vector<32x352xf32>
    %250 = arith.addf %247, %249 : vector<32x352xf32>
    %c0_152 = arith.constant 0 : index
    %c0_153 = arith.constant 0 : index
    %c0_154 = arith.constant 0 : index
    %251 = vector.load %arg4[%c0_152, %c0_153, %c0_154] : memref<1x32x352xf32, #tpu.memory_space<vmem>>, vector<1x32x352xf32>
    %252 = vector.shape_cast %251 : vector<1x32x352xf32> to vector<32x352xf32>
    %253 = vector.shape_cast %250 : vector<32x352xf32> to vector<1x32x352xf32>
    tpu.vector_store %arg4[%c0_152, %c0_153, %c0_154], %253 {strides = array<i32>} : memref<1x32x352xf32, #tpu.memory_space<vmem>>, vector<1x32x352xf32>,
    return
  }
  func.func @transform_0(%arg0: i32) -> (i32, i32, i32) {
    %c0_i32 = arith.constant 0 : i32
    %c0_i32_0 = arith.constant 0 : i32
    %c0_i32_1 = arith.constant 0 : i32
    return %arg0, %c0_i32, %c0_i32_0 : i32, i32, i32
  }
  func.func @transform_1(%arg0: i32) -> (i32, i32, i32) {
    %c0_i32 = arith.constant 0 : i32
    %c0_i32_0 = arith.constant 0 : i32
    %c0_i32_1 = arith.constant 0 : i32
    %c0_i32_2 = arith.constant 0 : i32
    return %c0_i32, %c0_i32_0, %c0_i32_1 : i32, i32, i32
  }
  func.func @transform_2(%arg0: i32) -> (i32, i32) {
    %c0_i32 = arith.constant 0 : i32
    %c0_i32_0 = arith.constant 0 : i32
    %c0_i32_1 = arith.constant 0 : i32
    return %c0_i32, %c0_i32_0 : i32, i32
  }
  func.func @transform_3(%arg0: i32) -> (i32, i32, i32) {
    %c0_i32 = arith.constant 0 : i32
    %c0_i32_0 = arith.constant 0 : i32
    %c0_i32_1 = arith.constant 0 : i32
    return %arg0, %c0_i32, %c0_i32_0 : i32, i32, i32
  }
}

</mosaic_0001>

<bundles_post_ra>
// kernel: tpu_custom_call.1
= control target key start
LH: loop header
LB: loop body
LE: loop exit
PB: predicated region body
PF: predicated region fallthrough
CT: control target
= control target key end

     0   :  { %8 = vsyncpa [#allocation3], 0  ;;  %s13001_s0 = inlined_call_operand.vmem [shape: f32[2,16,490], index: 0, kind: input, shape index: {}]   ;;  %s13002_s1 = inlined_call_operand.vmem [shape: f32[49,32,16], index: 1, kind: input, shape index: {}]   ;;  %s13003_s2 = inlined_call_operand.vmem [shape: f32[32,1], index: 2, kind: input, shape index: {}]   ;;  %s13004_s3 = inlined_call_operand.hbm [shape: f32[2,32,352], index: 3, kind: output, shape index: {}]  }
   0x1   :  { %10 = vsyncpa [#allocation3 + $0x1], 0  ;;  %s9068_s12 = smov 0   ;;  %s9070_s13 = smov 0  }
   0x2   :  { %s9072_s14 = smov 0   ;;  %s9074_s15 = smov 0  }
   0x3 LB: > { %s9089_s16 = sadd.s32 4294967295, %s8998_s15   ;;  %s7204_s17 = sadd.s32 4294967294, %s8998_s15   ;;  %s8998_s15 = sphi %s9074_s15, %s13017_s15   ;;  %s8994_s14 = sphi %s9072_s14, %s13016_s14   ;;  %s8990_s13 = sphi %s9070_s13, %s13015_s13   ;;  %s8986_s12 = sphi %s9068_s12, %s13014_s12  }
   0x4   : > { %s9093_s18 = sadd.s32 1, %s8998_s15   ;;  %s91_s19 = sadd.s32 1, %s8994_s14 }
   0x5   : > { %s88_s20 = ssub.s32 %s8998_s15, %s9093_s18  ;;  %p101_p0 = scmp.ne.s32.totalorder %s8994_s14, %s8990_s13 }
   0x6   : > { %p89_p1 = scmp.eq.s32.totalorder %s88_s20, 0  ;;  %p102_p2 = scmp.eq.s32.totalorder %s9089_s16, 1 }
   0x7   : > { %p107_p3 = scmp.ne.s32.totalorder %s8990_s13, %s8986_s12  ;;  %p108_p4 = scmp.eq.s32.totalorder %s7204_s17, 1 }
   0x8   : > { %s9104_s21 = scalar_select %p89_p1, %s8994_s14, %s91_s19  }
   0x9   : > { %p9106_p5 = por %p102_p2, %p101_p0  ;;  %p9110_p6 = por %p108_p4, %p107_p3 }
   0xa   : > { %p7207_p7 = scmp.ge.s32.totalorder %s8998_s15, 1  ;;  %p140_p8 = scmp.lt.s32.totalorder %s8998_s15, 3 }
   0xc   : > { %p141_p9 = pnand %p7207_p7, %p140_p8 }
   0xe   : > { %144 = sbr.rel (%p141_p9) target bundleno = 1466 (0x5ba), region = 32 }
  0x13   : > { %p164_p10 = scmp.lt.s32.totalorder %s9089_s16, 1  ;;  %s9000_s29 = smov 127   ;;  %vm204_vm0 = vcmask 1039360   ;;  %v7211_v24 = vld [vmem:[%s13002_s1 + $0x28] sm:$0xff]  ;;  %vm215_vm1 = vcmask 130048   ;;  %v9250_v30 = vld [vmem:[%s13002_s1 + $0x20] sm:$0xff] }
  0x14   : > { %s9001_s30 = smov 126   ;;  %s9002_s4 = smov 125   ;;  %v7212_v37 = vld [vmem:[%s13002_s1 + $0x30] sm:$0xff]  ;;  %vm431_vm2 = vcmask 1031168   ;;  %v7213_v52 = vld [vmem:[%s13002_s1 + $0x38] sm:$0xff]  ;;  %vm570_vm3 = vcmask 1022976  }
  0x15   : > { %s165_s24 = scalar_select %p164_p10, %s9089_s16, 1  ;;  %v9307_v61 = vld [vmem:[%s13002_s1 + $0x40] sm:$0xff]  ;;  %vm709_vm4 = vcmask 1014784   ;;  %vm848_vm5 = vcmask 1006592   ;;  %vm987_vm6 = vcmask 998400   ;;  %vm1126_vm7 = vcmask 867328  }
  0x16   : > { %s9003_s5 = smov 124   ;;  %s9004_s6 = smov 123   ;;  %vm1265_vm8 = vcmask 859136   ;;  %vm1404_vm9 = vcmask 850944   ;;  %vm1543_vm10 = vcmask 842752   ;;  %vm1682_vm11 = vcmask 834560  }
  0x17   : > { %s7993_s25 = sshll.u32 %s165_s24, 6  ;;  %s9005_s7 = smov 122   ;;  %vm1821_vm12 = vcmask 826368   ;;  %vm1960_vm13 = vcmask 818176   ;;  %vm2105_vm14 = vcmask 687104   ;;  %vm2250_vm15 = vcmask 678912  }
  0x18   : > { %s9121_s28 = scalar_lea.vmem %s13001_s0, %s7993_s25  ;;  %s9006_s8 = smov 106  }
  0x19   : > { %v9124_v0 = vld [vmem:[%s9121_s28 + $0x20] sm:$0xff]  ;;  %v9127_v1 = vld [vmem:[%s9121_s28 + $0x28] sm:$0xff]  ;;  %v9130_v2 = vld [vmem:[%s9121_s28 + $0x30] sm:$0xff]  ;;  %s9007_s9 = smov 105   ;;  %s9008_s10 = smov 104  }
  0x1a   : > { %v9134_v3 = vpack.i.bf16 %v9127_v1, %v9124_v0  ;;  %v9137_v4 = vld [vmem:[%s9121_s28 + $0x8] sm:$0xff]  ;;  %v9140_v5 = vld [vmem:[%s9121_s28 + $0x10] sm:$0xff]  ;;  %v9143_v6 = vld [vmem:[%s9121_s28] sm:$0xff]  ;;  %v9161_v9 = vpack.i.bf16 %v9130_v2, %v9127_v1  ;;  %s9009_s11 = smov 103   ;;  %s9010_s17 = smov 102  }
  0x1b   : > { %v9147_v7 = vpack.i.bf16 %v9140_v5, %v9130_v2  ;;  %v9151_v8 = vpack.i.bf16 %v9137_v4, %v9143_v6  ;;  %v9165_v10 = vpack.i.bf16 %v9140_v5, %v9137_v4  ;;  %v9169_v11 = vpack.i.bf16 %v9143_v6, %v9124_v0  ;;  %s9011_s19 = smov 101   ;;  %s9012_s20 = smov 100   ;;  %v9217_v12 = vld [vmem:[%s9121_s28 + $0x18] sm:$0xff] }
  0x1c   : > { %8090 = vrot.lane.b32.xlu0 %v9134_v3, %s9000_s29  ;;  %s9013_s24 = smov 84   ;;  %v9220_v13 = vld [vmem:[%s9121_s28 + $0x38] sm:$0xff]  ;;  %s9014_s25 = smov 83   ;;  %v9262_v38 = vpack.i.bf16 %v9217_v12, %v9140_v5 }
  0x1d   : > { %8100 = vrot.lane.b32.xlu1 %v9147_v7, %s9000_s29  ;;  %8110 = vrot.lane.b32.xlu2 %v9151_v8, %s9001_s30  ;;  %v9224_v14 = vpack.i.bf16 %v9217_v12, %v9220_v13  ;;  %v9238_v25 = vpack.i.bf16 %v9220_v13, %v9130_v2  ;;  %s9023_s26 = smov 59   ;;  %s9036_s27 = smov 16  }
  0x24   : > { %8095 = vrot.lane.b32.xlu0 %v9151_v8, %s9000_s29  ;;  %s9015_s29 = smov 82  }
  0x25   : > { %8105 = vrot.lane.b32.xlu1 %v9134_v3, %s9001_s30  ;;  %8115 = vrot.lane.b32.xlu2 %v9147_v7, %s9001_s30  ;;  %s9018_s30 = smov 79  }
  0x2c   : > { %8120 = vrot.lane.b32.xlu0 %v9161_v9, %s9002_s4 }
  0x2d   : > { %8125 = vrot.lane.b32.xlu1 %v9165_v10, %s9002_s4  ;;  %8130 = vrot.lane.b32.xlu2 %v9169_v11, %s9002_s4  ;;  %s9039_s4 = smov 13  }
  0x34   : > { %8135 = vrot.lane.b32.xlu0 %v9147_v7, %s9003_s5 }
  0x35   : > { %8140 = vrot.lane.b32.xlu1 %v9134_v3, %s9003_s5  ;;  %8145 = vrot.lane.b32.xlu2 %v9151_v8, %s9003_s5 }
  0x3c   : > { %8150 = vrot.lane.b32.xlu0 %v9134_v3, %s9004_s6 }
  0x3d   : > { %8155 = vrot.lane.b32.xlu1 %v9151_v8, %s9004_s6  ;;  %8160 = vrot.lane.b32.xlu2 %v9134_v3, %s9005_s7 }
  0x44   : > { %8165 = vrot.lane.b32.xlu0 %v9151_v8, %s9005_s7 }
  0x45   : > { %8170 = vrot.lane.b32.xlu1 %v9147_v7, %s9004_s6  ;;  %8175 = vrot.lane.b32.xlu2 %v9147_v7, %s9005_s7 }
  0x4c   : > { %8180 = vrot.lane.b32.xlu0 %v9161_v9, %s9006_s8 }
  0x4d   : > { %8185 = vrot.lane.b32.xlu1 %v9165_v10, %s9006_s8  ;;  %8190 = vrot.lane.b32.xlu2 %v9169_v11, %s9006_s8  ;;  %s9030_s8 = smov 37  }
  0x54   : > { %8195 = vrot.lane.b32.xlu0 %v9147_v7, %s9007_s9 }
  0x55   : > { %8200 = vrot.lane.b32.xlu1 %v9134_v3, %s9007_s9  ;;  %8205 = vrot.lane.b32.xlu2 %v9151_v8, %s9007_s9  ;;  %s9021_s9 = smov 61  }
  0x5c   : > { %8210 = vrot.lane.b32.xlu0 %v9134_v3, %s9008_s10 }
  0x5d   : > { %8215 = vrot.lane.b32.xlu1 %v9151_v8, %s9008_s10  ;;  %8220 = vrot.lane.b32.xlu2 %v9134_v3, %s9009_s11 }
  0x64   : > { %8225 = vrot.lane.b32.xlu0 %v9151_v8, %s9009_s11 }
  0x65   : > { %8230 = vrot.lane.b32.xlu1 %v9147_v7, %s9008_s10  ;;  %8235 = vrot.lane.b32.xlu2 %v9147_v7, %s9009_s11  ;;  %s161_s10 = sand.u32 1, %s8990_s13  }
  0x66   : > { %s8000_s11 = smul.u32 96, %s161_s10 }
  0x6c   : > { %8240 = vrot.lane.b32.xlu0 %v9161_v9, %s9010_s17 }
  0x6d   : > { %8245 = vrot.lane.b32.xlu1 %v9165_v10, %s9010_s17  ;;  %8250 = vrot.lane.b32.xlu2 %v9169_v11, %s9010_s17  ;;  %s9016_s17 = smov 81  }
  0x74   : > { %8255 = vrot.lane.b32.xlu0 %v9147_v7, %s9011_s19 }
  0x75   : > { %8260 = vrot.lane.b32.xlu1 %v9134_v3, %s9011_s19  ;;  %8265 = vrot.lane.b32.xlu2 %v9151_v8, %s9011_s19  ;;  %s9017_s19 = smov 80  }
  0x77   : > { %v9227_v15 = vpop.permute.xlu2 %8110 }
  0x78   : > { %v8113_v39 = vunpack.i.h.bf16 %v9227_v15  ;;  %v8112_v40 = vunpack.i.l.bf16 %v9227_v15 }
  0x7a   : > { %v432_v44 = vsel %vm431_vm2, %v8112_v40, %v8113_v39 }
  0x7c   : > { %8270 = vrot.lane.b32.xlu0 %v9134_v3, %s9012_s20 }
  0x7d   : > { %8275 = vrot.lane.b32.xlu1 %v9151_v8, %s9012_s20  ;;  %8280 = vrot.lane.b32.xlu2 %v9134_v3, %s9013_s24 }
  0x7f   : > { %v9245_v27 = vpop.permute.xlu2 %8115 }
  0x80   : > { %v8117_v36 = vunpack.i.l.bf16 %v9245_v27  ;;  %v8118_v41 = vunpack.i.h.bf16 %v9245_v27  ;;  %v9394_v27 = vld [vmem:[%s13002_s1 + $0x60] sm:$0xff] }
  0x82   : > { %v433_v50 = vsel %vm431_vm2, %v8113_v39, %v8118_v41  ;;  %v9415_v39 = vld [vmem:[%s13002_s1 + $0x68] sm:$0xff] }
  0x84   : > { %8285 = vrot.lane.b32.xlu0 %v9151_v8, %s9013_s24 }
  0x85   : > { %8290 = vrot.lane.b32.xlu1 %v9147_v7, %s9012_s20  ;;  %8295 = vrot.lane.b32.xlu2 %v9147_v7, %s9013_s24  ;;  %s9031_s20 = smov 36  }
  0x87   : > { %v8131_v45 = vpop.permute.xlu2 %8130 }
  0x88   : > { %v8132_v47 = vunpack.i.l.bf16 %v8131_v45  ;;  %v8133_v53 = vunpack.i.h.bf16 %v8131_v45 }
  0x8c   : > { %8300 = vrot.lane.b32.xlu0 %v9161_v9, %s9014_s25 }
  0x8d   : > { %8305 = vrot.lane.b32.xlu1 %v9165_v10, %s9014_s25  ;;  %8310 = vrot.lane.b32.xlu2 %v9224_v14, %s9013_s24  ;;  %s9026_s24 = smov 56  }
  0x8e   : > { %v8091_v16 = vpop.permute.xlu0 %8090 }
  0x8f   : > { %v8093_v17 = vunpack.i.h.bf16 %v8091_v16  ;;  %v8092_v18 = vunpack.i.l.bf16 %v8091_v16  ;;  %v8101_v19 = vpop.permute.xlu1 %8100  ;;  %v178_v16 = vld [vmem:[%s13002_s1 + $0x8] sm:$0xff] }
  0x90   : > { %v8103_v20 = vunpack.i.h.bf16 %v8101_v19  ;;  %v8102_v21 = vunpack.i.l.bf16 %v8101_v19 }
  0x91   : > { %v207_v22 = vsel %vm204_vm0, %v8092_v18, %v8093_v17  ;;  %v9355_v18 = vld [vmem:[%s13002_s1 + $0x50] sm:$0xff] }
  0x92   : > { %7998 = vmatpush.msra.mxu2 %v8102_v21  ;;  %242 = vmatpush.msra.mxu0 %v207_v22  ;;  %v208_v23 = vsel %vm204_vm0, %v8093_v17, %v8102_v21 }
  0x93   : > { %7994 = vmatpush.msra.mxu3 %v207_v22  ;;  %7996 = vmatpush.msra.mxu1 %v208_v23  ;;  %v9378_v22 = vld [vmem:[%s13002_s1 + $0x58] sm:$0xff] }
  0x94   : > { %7999 = vmatpush.msra.mxu2 %v8103_v20  ;;  %8315 = vrot.lane.b32.xlu0 %v9169_v11, %s9014_s25 }
  0x95   : > { %7223 = vmatmul.msk.f32.vlgmr.msra.gmra.mxu2 %vm215_vm1, %v7211_v24  ;;  %8320 = vrot.lane.b32.xlu1 %v9224_v14, %s9014_s25  ;;  %s9032_s25 = smov 35  }
  0x96   : > { %8325 = vrot.lane.b32.xlu2 %v9238_v25, %s9015_s29  ;;  %v8096_v26 = vpop.permute.xlu0 %8095 }
  0x97   : > { %v8098_v28 = vunpack.i.h.bf16 %v8096_v26  ;;  %v8097_v29 = vunpack.i.l.bf16 %v8096_v26  ;;  %v8106_v31 = vpop.permute.xlu1 %8105  ;;  %v180_v26 = vld [vmem:[%s13002_s1 + $0x18] sm:$0xff] }
  0x98   : > { %v8108_v34 = vunpack.i.h.bf16 %v8106_v31  ;;  %v8107_v35 = vunpack.i.l.bf16 %v8106_v31 }
  0x99   : > { %v205_v32 = vsel %vm204_vm0, %v8097_v29, %v8098_v28  ;;  %v206_v33 = vsel %vm204_vm0, %v8098_v28, %v8103_v20  ;;  %vm2395_vm0 = vcmask 670720  }
  0x9a   : > { %243 = vmatpush.msra.mxu0 %v205_v32  ;;  %7995 = vmatpush.msra.mxu3 %v205_v32  ;;  %v434_v42 = vsel %vm431_vm2, %v8107_v35, %v8108_v34  ;;  %v435_v43 = vsel %vm431_vm2, %v8108_v34, %v8117_v36  ;;  %vm2540_vm2 = vcmask 662528  }
  0x9b   : > { %7997 = vmatpush.msra.mxu1 %v206_v33  ;;  %7214 = vmatmul.msk.f32.vlgmr.msra.gmra.mxu0 %vm215_vm1, %v9250_v30 }
  0x9c   : > { %7215 = vmatmul.msk.f32.vlgmr.msra.gmra.mxu3 %vm215_vm1, %v7211_v24  ;;  %271 = vmatpush.msrb.mxu0 %v208_v23 }
  0x9d   : > { %7219 = vmatmul.msk.f32.vlgmr.msra.gmra.mxu1 %vm215_vm1, %v7211_v24  ;;  %341 = vmatpush.msrb.mxu3 %v9124_v0  ;;  %v177_v0 = vld [vmem:[%s13002_s1] sm:$0xff] }
  0x9e   : > { %7224 = vmatmul.msk.f32.gmra.mxu2 %vm215_vm1, %v7212_v37  ;;  %8335 = vrot.lane.b32.xlu1 %v9134_v3, %s9015_s29  ;;  %v8121_v46 = vpop.permute.xlu0 %8120 }
  0x9f   : > { %8340 = vrot.lane.b32.xlu2 %v9151_v8, %s9015_s29  ;;  %8330 = vrot.lane.b32.xlu0 %v9262_v38, %s9015_s29  ;;  %v8123_v48 = vunpack.i.h.bf16 %v8121_v46  ;;  %v8122_v49 = vunpack.i.l.bf16 %v8121_v46  ;;  %v8126_v51 = vpop.permute.xlu1 %8125  ;;  %s9027_s29 = smov 40  }
  0xa0   : > { %272 = vmatpush.msrb.mxu0 %v206_v33  ;;  %342 = vmatpush.msrb.mxu3 %v9143_v6  ;;  %v8128_v54 = vunpack.i.h.bf16 %v8126_v51  ;;  %v8127_v55 = vunpack.i.l.bf16 %v8126_v51  ;;  %v9463_v51 = vld [vmem:[%s13002_s1 + $0x78] sm:$0xff] }
  0xa1   : > { %468 = vmatpush.msrb.mxu2 %v434_v42  ;;  %399 = vmatpush.msrb.mxu1 %v9130_v2  ;;  %v573_v56 = vsel %vm570_vm3, %v8132_v47, %v8122_v49  ;;  %v574_v57 = vsel %vm570_vm3, %v8122_v49, %v8123_v48  ;;  %v9445_v47 = vld [vmem:[%s13002_s1 + $0x70] sm:$0xff] }
  0xa2   : > { %300 = vmatpush.msra.mxu0 %v8102_v21  ;;  %497 = vmatpush.msra.mxu3 %v435_v43  ;;  %v571_v58 = vsel %vm570_vm3, %v8133_v53, %v8127_v55  ;;  %v572_v59 = vsel %vm570_vm3, %v8127_v55, %v8128_v54  ;;  %v179_v21 = vld [vmem:[%s13002_s1 + $0x10] sm:$0xff]  ;;  %vm2685_vm3 = vcmask 654336  }
  0xa3   : > { %469 = vmatpush.msrb.mxu2 %v432_v44  ;;  %7218 = vmatmul.msk.f32.vlgmr.msrb.gmra.mxu0 %vm215_vm1, %v9250_v30 }
  0xa4   : > { %301 = vmatpush.msra.mxu0 %v8103_v20  ;;  %7216 = vmatmul.msk.f32.gmra.mxu3 %vm215_vm1, %v7212_v37 }
  0xa5   : > { %7220 = vmatmul.msk.f32.gmra.mxu1 %vm215_vm1, %v7212_v37  ;;  %498 = vmatpush.msra.mxu3 %v433_v50 }
  0xa6   : > { %7225 = vmatmul.msk.f32.gmra.mxu2 %vm215_vm1, %v7213_v52  ;;  %8350 = vrot.lane.b32.xlu1 %v9151_v8, %s9016_s17  ;;  %v8136_v60 = vpop.permute.xlu0 %8135 }
  0xa7   : > { %8355 = vrot.lane.b32.xlu2 %v9134_v3, %s9017_s19  ;;  %8345 = vrot.lane.b32.xlu0 %v9134_v3, %s9016_s17  ;;  %v9309_v62 = vunpack.i.l.bf16 %v8136_v60  ;;  %v9317_v63 = vunpack.i.h.bf16 %v8136_v60  ;;  %v8141_v2 = vpop.permute.xlu1 %8140  ;;  %v7271_v60 = vld [vmem:[%s13002_s1 + $0x88] sm:$0xff] }
  0xa8   : > { %370 = vmatpush.msrb.mxu0 %v9127_v1  ;;  %400 = vmatpush.msrb.mxu1 %v9140_v5  ;;  %v9333_v1 = vld [vmem:[%s13002_s1 + $0x48] sm:$0xff]  ;;  %v8146_v5 = vpop.permute.xlu2 %8145  ;;  %v8142_v15 = vunpack.i.l.bf16 %v8141_v2 }
  0xa9   : > { %636 = vmatpush.msra.mxu2 %v574_v57  ;;  %v8148_v6 = vunpack.i.h.bf16 %v8146_v5  ;;  %v8147_v24 = vunpack.i.l.bf16 %v8146_v5 }
  0xaa   : > { %607 = vmatpush.msra.mxu1 %v573_v56  ;;  %371 = vmatpush.msrb.mxu0 %v9137_v4  ;;  %v8143_v4 = vunpack.i.h.bf16 %v8141_v2 }
  0xab   : > { %637 = vmatpush.msra.mxu2 %v572_v59  ;;  %7222 = vmatmul.msk.f32.vlgmr.msra.gmra.mxu0 %vm215_vm1, %v9250_v30  ;;  %v9362_v19 = vsel %vm709_vm4, %v8148_v6, %v9317_v63  ;;  %v710_v29 = vsel %vm709_vm4, %v8147_v24, %v8148_v6 }
  0xac   : > { %608 = vmatpush.msra.mxu1 %v571_v58  ;;  %7217 = vmatmul.msk.f32.gmra.mxu3 %vm215_vm1, %v7213_v52  ;;  %v9349_v17 = vsel %vm709_vm4, %v8143_v4, %v9309_v62  ;;  %v712_v20 = vsel %vm709_vm4, %v8142_v15, %v8143_v4 }
  0xad   : > { %7221 = vmatmul.msk.f32.gmra.mxu1 %vm215_vm1, %v7213_v52  ;;  %526 = vmatpush.msra.mxu0 %v8117_v36 }
  0xae   : > { %8365 = vrot.lane.b32.xlu1 %v9238_v25, %s9016_s17  ;;  %7242 = vmatmul.msk.f32.vlgmr.msrb.gmra.mxu2 %vm215_vm1, %v9307_v61  ;;  %v8151_v28 = vpop.permute.xlu0 %8150 }
  0xaf   : > { %8370 = vrot.lane.b32.xlu2 %v9262_v38, %s9016_s17  ;;  %8360 = vrot.lane.b32.xlu0 %v9151_v8, %s9017_s19  ;;  %v8156_v23 = vpop.permute.xlu1 %8155  ;;  %v8153_v30 = vunpack.i.h.bf16 %v8151_v28  ;;  %v8152_v31 = vunpack.i.l.bf16 %v8151_v28  ;;  %s9022_s17 = smov 60   ;;  %v7286_v28 = vld [vmem:[%s13002_s1 + $0xa0] sm:$0xff] }
  0xb0   : > { %527 = vmatpush.msra.mxu0 %v8118_v41  ;;  %804 = vmatpush.msrb.mxu2 %v9309_v62  ;;  %v8158_v33 = vunpack.i.h.bf16 %v8156_v23  ;;  %v8157_v34 = vunpack.i.l.bf16 %v8156_v23  ;;  %v8161_v40 = vpop.permute.xlu2 %8160 }
  0xb1   : > { %v851_v36 = vsel %vm848_vm5, %v8152_v31, %v8153_v30  ;;  %v8163_v41 = vunpack.i.h.bf16 %v8161_v40  ;;  %v8162_v42 = vunpack.i.l.bf16 %v8161_v40 }
  0xb2   : > { %805 = vmatpush.msrb.mxu2 %v9317_v63  ;;  %v849_v44 = vsel %vm848_vm5, %v8157_v34, %v8158_v33 }
  0xb3   : > { %7230 = vmatmul.msk.f32.vlgmr.msrb.gmra.mxu0 %vm215_vm1, %v177_v0  ;;  %v990_v46 = vsel %vm987_vm6, %v8162_v42, %v8163_v41 }
  0xb4   : > { %7226 = vmatmul.msk.f32.vlgmr.msrb.gmra.mxu3 %vm215_vm1, %v177_v0  ;;  %746 = vmatpush.msrb.mxu0 %v712_v20 }
  0xb5   : > { %7234 = vmatmul.msk.f32.vlgmr.msrb.gmra.mxu1 %vm215_vm1, %v177_v0  ;;  %665 = vmatpush.msrb.mxu3 %v8123_v48 }
  0xb6   : > { %8380 = vrot.lane.b32.xlu1 %v9161_v9, %s9018_s30  ;;  %7243 = vmatmul.msk.f32.gmra.mxu2 %vm215_vm1, %v9333_v1  ;;  %v8166_v48 = vpop.permute.xlu0 %8165 }
  0xb7   : > { %8385 = vrot.lane.b32.xlu2 %v9165_v10, %s9018_s30  ;;  %8375 = vrot.lane.b32.xlu0 %v9147_v7, %s9017_s19  ;;  %v8171_v32 = vpop.permute.xlu1 %8170  ;;  %v8168_v49 = vunpack.i.h.bf16 %v8166_v48  ;;  %v8167_v50 = vunpack.i.l.bf16 %v8166_v48  ;;  %v9622_v48 = vld [vmem:[%s13002_s1 + $0xd8] sm:$0xff] }
  0xb8   : > { %666 = vmatpush.msrb.mxu3 %v8128_v54  ;;  %775 = vmatpush.msrb.mxu1 %v9349_v17  ;;  %v9407_v35 = vunpack.i.l.bf16 %v8171_v32  ;;  %v9410_v37 = vunpack.i.h.bf16 %v8171_v32  ;;  %v8176_v53 = vpop.permute.xlu2 %8175  ;;  %v7270_v54 = vld [vmem:[%s13002_s1 + $0x80] sm:$0xff] }
  0xb9   : > { %747 = vmatpush.msrb.mxu0 %v710_v29  ;;  %v988_v52 = vsel %vm987_vm6, %v8167_v50, %v8168_v49  ;;  %v9486_v55 = vunpack.i.l.bf16 %v8176_v53  ;;  %v9492_v56 = vunpack.i.h.bf16 %v8176_v53 }
  0xba   : > { %776 = vmatpush.msrb.mxu1 %v9362_v19  ;;  %v9425_v43 = vsel %vm848_vm5, %v8153_v30, %v9407_v35  ;;  %v9436_v45 = vsel %vm848_vm5, %v8158_v33, %v9410_v37  ;;  %v9573_v30 = vld [vmem:[%s13002_s1 + $0xc8] sm:$0xff] }
  0xbb   : > { %7231 = vmatmul.msk.f32.gmra.mxu0 %vm215_vm1, %v178_v16  ;;  %v9496_v57 = vsel %vm987_vm6, %v8163_v41, %v9486_v55  ;;  %v9512_v2 = vsel %vm987_vm6, %v8168_v49, %v9492_v56 }
  0xbc   : > { %7227 = vmatmul.msk.f32.gmra.mxu3 %vm215_vm1, %v178_v16  ;;  %13008 = vst [vmem:[#allocation5_spill] sm:$0xff] %v9512_v2 }
  0xbd   : > { %7235 = vmatmul.msk.f32.gmra.mxu1 %vm215_vm1, %v178_v16 }
  0xbe   : > { %8395 = vrot.lane.b32.xlu1 %v9169_v11, %s9018_s30  ;;  %7244 = vmatmul.msk.f32.gmra.mxu2 %vm215_vm1, %v9355_v18  ;;  %v9498_v59 = vpop.permute.xlu0 %8180 }
  0xbf   : > { %8400 = vrot.lane.b32.xlu2 %v9224_v14, %s9018_s30  ;;  %8390 = vrot.lane.b32.xlu0 %v9224_v14, %s9017_s19  ;;  %s9019_s19 = smov 78   ;;  %s9020_s30 = smov 62   ;;  %v8183_v0 = vunpack.i.h.bf16 %v9498_v59  ;;  %v8186_v15 = vpop.permute.xlu1 %8185 }
  0xc0   : > { %v8191_v58 = vpop.permute.xlu2 %8190  ;;  %v8187_v16 = vunpack.i.l.bf16 %v8186_v15 }
  0xc1   : > { %v8193_v6 = vunpack.i.h.bf16 %v8191_v58 }
  0xc3   : > { %7232 = vmatmul.msk.f32.gmra.mxu0 %vm215_vm1, %v179_v21  ;;  %v1127_v20 = vsel %vm1126_vm7, %v8193_v6, %v8187_v16 }
  0xc4   : > { %7228 = vmatmul.msk.f32.gmra.mxu3 %vm215_vm1, %v179_v21 }
  0xc5   : > { %7236 = vmatmul.msk.f32.gmra.mxu1 %vm215_vm1, %v179_v21  ;;  %v8188_v21 = vunpack.i.h.bf16 %v8186_v15 }
  0xc6   : > { %8410 = vrot.lane.b32.xlu1 %v9262_v38, %s9019_s19  ;;  %7245 = vmatmul.msk.f32.gmra.mxu2 %vm215_vm1, %v9378_v22  ;;  %v8196_v24 = vpop.permute.xlu0 %8195 }
  0xc7   : > { %8415 = vrot.lane.b32.xlu2 %v9134_v3, %s9019_s19  ;;  %8405 = vrot.lane.b32.xlu0 %v9238_v25, %s9019_s19  ;;  %v1128_v23 = vsel %vm1126_vm7, %v8187_v16, %v8188_v21  ;;  %v8201_v29 = vpop.permute.xlu1 %8200 }
  0xc8   : > { %v8202_v34 = vunpack.i.l.bf16 %v8201_v29 }
  0xcb   : > { %7233 = vmatmul.msk.f32.gmra.mxu0 %vm215_vm1, %v180_v26 }
  0xcc   : > { %7229 = vmatmul.msk.f32.gmra.mxu3 %vm215_vm1, %v180_v26 }
  0xcd   : > { %7237 = vmatmul.msk.f32.gmra.mxu1 %vm215_vm1, %v180_v26  ;;  %v9556_v26 = vld [vmem:[%s13002_s1 + $0xc0] sm:$0xff] }
  0xce   : > { %8425 = vrot.lane.b32.xlu1 %v9134_v3, %s9020_s30  ;;  %7262 = vmatmul.msk.f32.vlgmr.msra.gmra.mxu2 %vm215_vm1, %v9394_v27 }
  0xcf   : > { %8430 = vrot.lane.b32.xlu2 %v9151_v8, %s9020_s30  ;;  %8420 = vrot.lane.b32.xlu0 %v9151_v8, %s9019_s19  ;;  %s9029_s19 = smov 38  }
  0xd0   : > { %1024 = vmatpush.msra.mxu2 %v990_v46 }
  0xd2   : > { %1025 = vmatpush.msra.mxu2 %v988_v52  ;;  %v7289_v52 = vld [vmem:[%s13002_s1 + $0xb8] sm:$0xff] }
  0xd3   : > { %7250 = vmatmul.msk.f32.vlgmr.msra.gmra.mxu0 %vm215_vm1, %v9307_v61 }
  0xd4   : > { %7246 = vmatmul.msk.f32.vlgmr.msra.gmra.mxu3 %vm215_vm1, %v9307_v61  ;;  %914 = vmatpush.msra.mxu0 %v9425_v43  ;;  %v8192_v61 = vunpack.i.l.bf16 %v8191_v58 }
  0xd5   : > { %7258 = vmatmul.msk.f32.vlgmr.msra.gmra.mxu1 %vm215_vm1, %v9394_v27  ;;  %885 = vmatpush.msra.mxu3 %v851_v36  ;;  %v7287_v36 = vld [vmem:[%s13002_s1 + $0xa8] sm:$0xff] }
  0xd6   : > { %8440 = vrot.lane.b32.xlu1 %v9151_v8, %s9021_s9  ;;  %7263 = vmatmul.msk.f32.gmra.mxu2 %vm215_vm1, %v9415_v39 }
  0xd7   : > { %8445 = vrot.lane.b32.xlu2 %v9238_v25, %s9020_s30  ;;  %8435 = vrot.lane.b32.xlu0 %v9134_v3, %s9021_s9 }
  0xd8   : > { %886 = vmatpush.msra.mxu3 %v849_v44  ;;  %943 = vmatpush.msra.mxu1 %v9407_v35  ;;  %v7288_v44 = vld [vmem:[%s13002_s1 + $0xb0] sm:$0xff] }
  0xd9   : > { %915 = vmatpush.msra.mxu0 %v9436_v45 }
  0xda   : > { %944 = vmatpush.msra.mxu1 %v9410_v37 }
  0xdb   : > { %7251 = vmatmul.msk.f32.gmra.mxu0 %vm215_vm1, %v9333_v1 }
  0xdc   : > { %7247 = vmatmul.msk.f32.gmra.mxu3 %vm215_vm1, %v9333_v1  ;;  %v8182_v1 = vunpack.i.l.bf16 %v9498_v59  ;;  %v9654_v59 = vld [vmem:[%s9121_s28 + $0x10] sm:$0xff] }
  0xdd   : > { %7259 = vmatmul.msk.f32.gmra.mxu1 %vm215_vm1, %v9415_v39 }
  0xde   : > { %8455 = vrot.lane.b32.xlu1 %v9147_v7, %s9021_s9  ;;  %7264 = vmatmul.msk.f32.gmra.mxu2 %vm215_vm1, %v9445_v47  ;;  %v1129_v4 = vsel %vm1126_vm7, %v8192_v61, %v8182_v1  ;;  %v1130_v5 = vsel %vm1126_vm7, %v8182_v1, %v8183_v0  ;;  %v8925_v61 = vld [vmem:[%s9121_s28] sm:$0xff]  ;;  %vm2830_vm7 = vcmask 646144  }
  0xdf   : > { %8460 = vrot.lane.b32.xlu2 %v9161_v9, %s9022_s17  ;;  %8450 = vrot.lane.b32.xlu0 %v9262_v38, %s9020_s30  ;;  %s9024_s30 = smov 58   ;;  %v9667_v1 = vld [vmem:[%s13002_s1 + $0xe0] sm:$0xff] }
  0xe3   : > { %7252 = vmatmul.msk.f32.gmra.mxu0 %vm215_vm1, %v9355_v18 }
  0xe4   : > { %7248 = vmatmul.msk.f32.gmra.mxu3 %vm215_vm1, %v9355_v18  ;;  %v7272_v18 = vld [vmem:[%s13002_s1 + $0x90] sm:$0xff] }
  0xe5   : > { %7260 = vmatmul.msk.f32.gmra.mxu1 %vm215_vm1, %v9445_v47 }
  0xe6   : > { %8470 = vrot.lane.b32.xlu1 %v9224_v14, %s9021_s9  ;;  %7265 = vmatmul.msk.f32.gmra.mxu2 %vm215_vm1, %v9463_v51  ;;  %s9025_s9 = smov 57  }
  0xe7   : > { %8475 = vrot.lane.b32.xlu2 %v9169_v11, %s9022_s17  ;;  %8465 = vrot.lane.b32.xlu0 %v9165_v10, %s9022_s17 }
  0xeb   : > { %7253 = vmatmul.msk.f32.gmra.mxu0 %vm215_vm1, %v9378_v22 }
  0xec   : > { %7249 = vmatmul.msk.f32.gmra.mxu3 %vm215_vm1, %v9378_v22  ;;  %v7273_v22 = vld [vmem:[%s13002_s1 + $0x98] sm:$0xff] }
  0xed   : > { %7261 = vmatmul.msk.f32.gmra.mxu1 %vm215_vm1, %v9463_v51 }
  0xee   : > { %8485 = vrot.lane.b32.xlu1 %v9238_v25, %s9023_s26  ;;  %7282 = vmatmul.msk.f32.vlgmr.msrb.gmra.mxu2 %vm215_vm1, %v7270_v54 }
  0xef   : > { %8490 = vrot.lane.b32.xlu2 %v9262_v38, %s9023_s26  ;;  %8480 = vrot.lane.b32.xlu0 %v9224_v14, %s9022_s17  ;;  %s9040_s17 = smov 12  }
  0xf0   : > { %1192 = vmatpush.msrb.mxu2 %v1130_v5 }
  0xf2   : > { %1193 = vmatpush.msrb.mxu2 %v1128_v23 }
  0xf3   : > { %7274 = vmatmul.msk.f32.vlgmr.msrb.gmra.mxu0 %vm215_vm1, %v7270_v54 }
  0xf4   : > { %7266 = vmatmul.msk.f32.vlgmr.msrb.gmra.mxu3 %vm215_vm1, %v9394_v27  ;;  %1082 = vmatpush.msrb.mxu0 %v9486_v55  ;;  %v8197_v27 = vunpack.i.l.bf16 %v8196_v24 }
  0xf5   : > { %7278 = vmatmul.msk.f32.vlgmr.msrb.gmra.mxu1 %vm215_vm1, %v7270_v54  ;;  %1053 = vmatpush.msrb.mxu3 %v9496_v57 }
  0xf6   : > { %8500 = vrot.lane.b32.xlu1 %v9151_v8, %s9023_s26  ;;  %7283 = vmatmul.msk.f32.gmra.mxu2 %vm215_vm1, %v7271_v60 }
  0xf7   : > { %8505 = vrot.lane.b32.xlu2 %v9134_v3, %s9024_s30  ;;  %8495 = vrot.lane.b32.xlu0 %v9134_v3, %s9023_s26  ;;  %s9042_s26 = smov 121  }
  0xf8   : > { %1054 = vmatpush.msrb.mxu3 %v9512_v2  ;;  %1163 = vmatpush.msrb.mxu1 %v1129_v4 }
  0xf9   : > { %1083 = vmatpush.msrb.mxu0 %v9492_v56 }
  0xfa   : > { %1164 = vmatpush.msrb.mxu1 %v1127_v20 }
  0xfb   : > { %7275 = vmatmul.msk.f32.gmra.mxu0 %vm215_vm1, %v7271_v60 }
  0xfc   : > { %7267 = vmatmul.msk.f32.gmra.mxu3 %vm215_vm1, %v9415_v39 }
  0xfd   : > { %7279 = vmatmul.msk.f32.gmra.mxu1 %vm215_vm1, %v7271_v60  ;;  %v8924_v60 = vld [vmem:[%s9121_s28 + $0x8] sm:$0xff] }
  0xfe   : > { %8515 = vrot.lane.b32.xlu1 %v9134_v3, %s9025_s9  ;;  %7284 = vmatmul.msk.f32.gmra.mxu2 %vm215_vm1, %v7272_v18 }
  0xff   : > { %8520 = vrot.lane.b32.xlu2 %v9151_v8, %s9025_s9  ;;  %8510 = vrot.lane.b32.xlu0 %v9151_v8, %s9024_s30 }
 0x103   : > { %7276 = vmatmul.msk.f32.gmra.mxu0 %vm215_vm1, %v7272_v18 }
 0x104   : > { %7268 = vmatmul.msk.f32.gmra.mxu3 %vm215_vm1, %v9445_v47 }
 0x105   : > { %7280 = vmatmul.msk.f32.gmra.mxu1 %vm215_vm1, %v7272_v18 }
 0x106   : > { %8530 = vrot.lane.b32.xlu1 %v9262_v38, %s9024_s30  ;;  %7285 = vmatmul.msk.f32.gmra.mxu2 %vm215_vm1, %v7273_v22 }
 0x107   : > { %8535 = vrot.lane.b32.xlu2 %v9147_v7, %s9025_s9  ;;  %8525 = vrot.lane.b32.xlu0 %v9238_v25, %s9024_s30  ;;  %v8198_v7 = vunpack.i.h.bf16 %v8196_v24  ;;  %v8926_v24 = vld [vmem:[%s9121_s28 + $0x28] sm:$0xff] }
 0x10b   : > { %7277 = vmatmul.msk.f32.gmra.mxu0 %vm215_vm1, %v7273_v22 }
 0x10c   : > { %7269 = vmatmul.msk.f32.gmra.mxu3 %vm215_vm1, %v9463_v51 }
 0x10d   : > { %7281 = vmatmul.msk.f32.gmra.mxu1 %vm215_vm1, %v7273_v22 }
 0x10e   : > { %8545 = vrot.lane.b32.xlu1 %v9165_v10, %s9026_s24  ;;  %7306 = vmatmul.msk.f32.vlgmr.msra.gmra.mxu2 %vm215_vm1, %v9556_v26  ;;  %v8203_v10 = vunpack.i.h.bf16 %v8201_v29  ;;  %v9696_v29 = vpack.i.bf16 %v9654_v59, %v8924_v60 }
 0x10f   : > { %8550 = vrot.lane.b32.xlu2 %v9224_v14, %s9025_s9  ;;  %8540 = vrot.lane.b32.xlu0 %v9161_v9, %s9026_s24  ;;  %v8206_v9 = vpop.permute.xlu2 %8205  ;;  %s9037_s9 = smov 15  }
 0x110   : > { %1360 = vmatpush.msra.mxu2 %v8197_v27  ;;  %v1269_v32 = vsel %vm1265_vm8, %v8203_v10, %v8197_v27  ;;  %v8208_v33 = vunpack.i.h.bf16 %v8206_v9  ;;  %v1268_v41 = vsel %vm1265_vm8, %v8202_v34, %v8203_v10  ;;  %v8207_v51 = vunpack.i.l.bf16 %v8206_v9  ;;  %v9705_v9 = vld [vmem:[%s13002_s1 + $0xe8] sm:$0xff] }
 0x112   : > { %1361 = vmatpush.msra.mxu2 %v8198_v7 }
 0x113   : > { %7294 = vmatmul.msk.f32.vlgmr.msra.gmra.mxu0 %vm215_vm1, %v7286_v28 }
 0x114   : > { %7290 = vmatmul.msk.f32.vlgmr.msra.gmra.mxu3 %vm215_vm1, %v7286_v28  ;;  %1302 = vmatpush.msra.mxu0 %v1268_v41 }
 0x115   : > { %7298 = vmatmul.msk.f32.vlgmr.msra.gmra.mxu1 %vm215_vm1, %v7286_v28  ;;  %1221 = vmatpush.msra.mxu3 %v8183_v0  ;;  %v9662_v0 = vpack.i.bf16 %v8924_v60, %v8925_v61 }
 0x116   : > { %8560 = vrot.lane.b32.xlu1 %v9224_v14, %s9026_s24  ;;  %7307 = vmatmul.msk.f32.gmra.mxu2 %vm215_vm1, %v9573_v30 }
 0x117   : > { %8565 = vrot.lane.b32.xlu2 %v9238_v25, %s9027_s29  ;;  %8555 = vrot.lane.b32.xlu0 %v9169_v11, %s9026_s24  ;;  %v9598_v11 = vld [vmem:[%s13002_s1 + $0xd0] sm:$0xff]  ;;  %v1267_v25 = vsel %vm1265_vm8, %v8208_v33, %v8198_v7  ;;  %s9028_s24 = smov 39   ;;  %v9693_v7 = vpop.permute.xlu2 %8220 }
 0x118   : > { %v9585_v31 = vpop.f32.mrf.mxu0  ;;  %1222 = vmatpush.msra.mxu3 %v8188_v21  ;;  %1331 = vmatpush.msra.mxu1 %v1269_v32  ;;  %v9593_v40 = vpop.f32.mrf.mxu2  ;;  %v8222_v34 = vunpack.i.l.bf16 %v9693_v7 }
 0x11a   : > { %v9591_v39 = vpop.f32.mrf.mxu1  ;;  %1332 = vmatpush.msra.mxu1 %v1267_v25 }
 0x11b   : > { %7295 = vmatmul.msk.f32.gmra.mxu0 %vm215_vm1, %v7287_v36 }
 0x11c   : > { %7291 = vmatmul.msk.f32.gmra.mxu3 %vm215_vm1, %v7287_v36 }
 0x11d   : > { %7299 = vmatmul.msk.f32.gmra.mxu1 %vm215_vm1, %v7287_v36 }
 0x11e   : > { %8575 = vrot.lane.b32.xlu1 %v9134_v3, %s9027_s29  ;;  %7308 = vmatmul.msk.f32.gmra.mxu2 %vm215_vm1, %v9598_v11 }
 0x11f   : > { %8580 = vrot.lane.b32.xlu2 %v9151_v8, %s9027_s29  ;;  %8570 = vrot.lane.b32.xlu0 %v9262_v38, %s9027_s29  ;;  %v9610_v42 = vpop.f32.mrf.mxu3  ;;  %v9629_v38 = vpop.permute.xlu1 %8215  ;;  %s9033_s29 = smov 34  }
 0x120   : > { %v9615_v46 = vpop.f32.mrf.mxu0  ;;  %v8218_v18 = vunpack.i.h.bf16 %v9629_v38  ;;  %v8217_v20 = vunpack.i.l.bf16 %v9629_v38 }
 0x121   : > { %v9624_v49 = vpop.f32.mrf.mxu2 }
 0x122   : > { %v9617_v47 = vpop.f32.mrf.mxu1  ;;  %v1405_v41 = vsel %vm1404_vm9, %v8217_v20, %v8218_v18 }
 0x123   : > { %7296 = vmatmul.msk.f32.gmra.mxu0 %vm215_vm1, %v7288_v44 }
 0x124   : > { %7292 = vmatmul.msk.f32.gmra.mxu3 %vm215_vm1, %v7288_v44 }
 0x125   : > { %7300 = vmatmul.msk.f32.gmra.mxu1 %vm215_vm1, %v7288_v44 }
 0x126   : > { %8590 = vrot.lane.b32.xlu1 %v9151_v8, %s9028_s24  ;;  %7309 = vmatmul.msk.f32.gmra.mxu2 %vm215_vm1, %v9622_v48  ;;  %v9647_v8 = vld [vmem:[%s9121_s28 + $0x30] sm:$0xff] }
 0x127   : > { %8595 = vrot.lane.b32.xlu2 %v9134_v3, %s9029_s19  ;;  %8585 = vrot.lane.b32.xlu0 %v9134_v3, %s9028_s24  ;;  %v9637_v50 = vpop.f32.mrf.mxu3  ;;  %v9651_v58 = vpack.i.bf16 %v9220_v13, %v9647_v8  ;;  %v9658_v3 = vpack.i.bf16 %v9217_v12, %v9654_v59  ;;  %v1266_v12 = vsel %vm1265_vm8, %v8207_v51, %v8208_v33  ;;  %v8211_v13 = vpop.permute.xlu0 %8210  ;;  %v8223_v33 = vunpack.i.h.bf16 %v9693_v7 }
 0x128   : > { %v9644_v54 = vpop.f32.mrf.mxu0  ;;  %v8213_v6 = vunpack.i.h.bf16 %v8211_v13  ;;  %v8212_v15 = vunpack.i.l.bf16 %v8211_v13  ;;  %v8231_v16 = vpop.permute.xlu1 %8230  ;;  %1303 = vmatpush.msra.mxu0 %v1266_v12  ;;  %v9691_v27 = vpack.i.bf16 %v9647_v8, %v8926_v24  ;;  %v9700_v10 = vpack.i.bf16 %v9654_v59, %v9647_v8  ;;  %v8927_v12 = vld [vmem:[%s9121_s28 + $0x20] sm:$0xff] }
 0x129   : > { %v9669_v4 = vpop.f32.mrf.mxu2  ;;  %v8232_v21 = vunpack.i.l.bf16 %v8231_v16  ;;  %v8233_v28 = vunpack.i.h.bf16 %v8231_v16  ;;  %v1546_v51 = vsel %vm1543_vm10, %v8222_v34, %v8223_v33  ;;  %v9734_v13 = vpack.i.bf16 %v8925_v61, %v8927_v12 }
 0x12a   : > { %v9642_v53 = vpop.f32.mrf.mxu1  ;;  %v1407_v36 = vsel %vm1404_vm9, %v8212_v15, %v8213_v6  ;;  %v9762_v34 = vpack.i.bf16 %v8926_v24, %v8927_v12  ;;  %vm2975_vm8 = vcmask 637952  }
 0x12b   : > { %7297 = vmatmul.msk.f32.gmra.mxu0 %vm215_vm1, %v7289_v52  ;;  %v1408_v25 = vsel %vm1404_vm9, %v8213_v6, %v8232_v21  ;;  %v1406_v44 = vsel %vm1404_vm9, %v8218_v18, %v8233_v28  ;;  %vm3120_vm9 = vcmask 506880  }
 0x12c   : > { %7293 = vmatmul.msk.f32.gmra.mxu3 %vm215_vm1, %v7289_v52 }
 0x12d   : > { %7301 = vmatmul.msk.f32.gmra.mxu1 %vm215_vm1, %v7289_v52 }
 0x12e   : > { %8605 = vrot.lane.b32.xlu1 %v9651_v58, %s9028_s24  ;;  %7326 = vmatmul.msk.f32.vlgmr.msrb.gmra.mxu2 %vm215_vm1, %v9667_v1 }
 0x12f   : > { %8610 = vrot.lane.b32.xlu2 %v9658_v3, %s9028_s24  ;;  %8600 = vrot.lane.b32.xlu0 %v9662_v0, %s9029_s19  ;;  %v9681_v5 = vpop.f32.mrf.mxu3  ;;  %v8226_v18 = vpop.permute.xlu0 %8225 }
 0x130   : > { %v9685_v22 = vpop.f32.mrf.mxu0  ;;  %1580 = vmatpush.msrb.mxu2 %v1546_v51  ;;  %v8228_v20 = vunpack.i.h.bf16 %v8226_v18 }
 0x131   : > { %v471_v32 = vpop.f32.mrf.mxu2 }
 0x132   : > { %v9687_v23 = vpop.f32.mrf.mxu1 }
 0x133   : > { %7314 = vmatmul.msk.f32.vlgmr.msrb.gmra.mxu0 %vm215_vm1, %v9556_v26 }
 0x134   : > { %7310 = vmatmul.msk.f32.vlgmr.msrb.gmra.mxu3 %vm215_vm1, %v9556_v26  ;;  %1470 = vmatpush.msrb.mxu0 %v1408_v25 }
 0x135   : > { %7322 = vmatmul.msk.f32.vlgmr.msrb.gmra.mxu1 %vm215_vm1, %v9667_v1  ;;  %1441 = vmatpush.msrb.mxu3 %v1407_v36  ;;  %v9767_v36 = vld [vmem:[%s13002_s1 + $0xf8] sm:$0xff] }
 0x136   : > { %8620 = vrot.lane.b32.xlu1 %v9691_v27, %s9030_s8  ;;  %7327 = vmatmul.msk.f32.gmra.mxu2 %vm215_vm1, %v9705_v9 }
 0x137   : > { %8625 = vrot.lane.b32.xlu2 %v9696_v29, %s9030_s8  ;;  %8615 = vrot.lane.b32.xlu0 %v9700_v10, %s9029_s19  ;;  %v344_v26 = vpop.f32.mrf.mxu3 }
 0x138   : > { %v345_v38 = vadd.f32 %v344_v26, %v9585_v31  ;;  %1442 = vmatpush.msrb.mxu3 %v1405_v41  ;;  %1499 = vmatpush.msrb.mxu1 %v8232_v21  ;;  %v9729_v52 = vpop.f32.mrf.mxu0  ;;  %v9741_v31 = vld [vmem:[%s13002_s1 + $0xf0] sm:$0xff] }
 0x139   : > { %1471 = vmatpush.msrb.mxu0 %v1406_v44  ;;  %v474_v15 = vpop.f32.mrf.mxu2 }
 0x13a   : > { %v9731_v60 = vpop.f32.mrf.mxu1  ;;  %v9736_v6 = vadd.f32 %v471_v32, %v345_v38  ;;  %1500 = vmatpush.msrb.mxu1 %v8233_v28  ;;  %v8227_v28 = vunpack.i.l.bf16 %v8226_v18  ;;  %v9811_v18 = vpop.permute.xlu0 %8240 }
 0x13b   : > { %7315 = vmatmul.msk.f32.gmra.mxu0 %vm215_vm1, %v9573_v30  ;;  %v8242_v7 = vunpack.i.l.bf16 %v9811_v18 }
 0x13c   : > { %7311 = vmatmul.msk.f32.gmra.mxu3 %vm215_vm1, %v9573_v30  ;;  %v1544_v25 = vsel %vm1543_vm10, %v8227_v28, %v8228_v20 }
 0x13d   : > { %7323 = vmatmul.msk.f32.gmra.mxu1 %vm215_vm1, %v9705_v9  ;;  %1581 = vmatpush.msrb.mxu2 %v1544_v25 }
 0x13e   : > { %8635 = vrot.lane.b32.xlu1 %v9734_v13, %s9030_s8  ;;  %7328 = vmatmul.msk.f32.gmra.mxu2 %vm215_vm1, %v9741_v31 }
 0x13f   : > { %8640 = vrot.lane.b32.xlu2 %v9224_v14, %s9030_s8  ;;  %8630 = vrot.lane.b32.xlu0 %v9224_v14, %s9029_s19  ;;  %v347_v61 = vpop.f32.mrf.mxu3  ;;  %s9034_s8 = smov 18   ;;  %s9041_s19 = smov 120  }
 0x140   : > { %v348_v16 = vadd.f32 %v347_v61, %v9610_v42  ;;  %v9756_v21 = vpop.f32.mrf.mxu0  ;;  %v8236_v42 = vpop.permute.xlu2 %8235 }
 0x141   : > { %v477_v14 = vpop.f32.mrf.mxu2 }
 0x142   : > { %v9758_v30 = vpop.f32.mrf.mxu1  ;;  %v9760_v32 = vadd.f32 %v474_v15, %v348_v16 }
 0x143   : > { %7316 = vmatmul.msk.f32.gmra.mxu0 %vm215_vm1, %v9598_v11 }
 0x144   : > { %7312 = vmatmul.msk.f32.gmra.mxu3 %vm215_vm1, %v9598_v11 }
 0x145   : > { %7324 = vmatmul.msk.f32.gmra.mxu1 %vm215_vm1, %v9741_v31 }
 0x146   : > { %8650 = vrot.lane.b32.xlu1 %v9658_v3, %s9031_s20  ;;  %7329 = vmatmul.msk.f32.gmra.mxu2 %vm215_vm1, %v9767_v36  ;;  %v7334_v3 = vld [vmem:[%s13002_s1 + $0x100] sm:$0xff] }
 0x147   : > { %8655 = vrot.lane.b32.xlu2 %v9762_v34, %s9031_s20  ;;  %8645 = vrot.lane.b32.xlu0 %v9651_v58, %s9031_s20  ;;  %v350_v24 = vpop.f32.mrf.mxu3 }
 0x148   : > { %v351_v41 = vadd.f32 %v350_v24, %v9637_v50  ;;  %v9782_v11 = vpop.f32.mrf.mxu0  ;;  %v8237_v50 = vunpack.i.l.bf16 %v8236_v42  ;;  %v8251_v12 = vpop.permute.xlu2 %8250 }
 0x149   : > { %v480_v38 = vpop.f32.mrf.mxu2  ;;  %v8252_v25 = vunpack.i.l.bf16 %v8251_v12 }
 0x14a   : > { %v9784_v26 = vpop.f32.mrf.mxu1  ;;  %v9786_v44 = vadd.f32 %v477_v14, %v351_v41  ;;  %v1547_v16 = vsel %vm1543_vm10, %v8223_v33, %v8237_v50  ;;  %v8928_v14 = vld [vmem:[%s9121_s28 + $0x38] sm:$0xff]  ;;  %v8243_v41 = vunpack.i.h.bf16 %v9811_v18  ;;  %v374_v33 = vadd.f32 %v9685_v22, %v9615_v46 }
 0x14b   : > { %7317 = vmatmul.msk.f32.gmra.mxu0 %vm215_vm1, %v9622_v48  ;;  %v9817_v24 = vpack.i.bf16 %v8928_v14, %v9647_v8  ;;  %v1685_v46 = vsel %vm1682_vm11, %v8252_v25, %v8242_v7 }
 0x14c   : > { %7313 = vmatmul.msk.f32.gmra.mxu3 %vm215_vm1, %v9622_v48  ;;  %v8238_v48 = vunpack.i.h.bf16 %v8236_v42  ;;  %v1686_v22 = vsel %vm1682_vm11, %v8242_v7, %v8243_v41 }
 0x14d   : > { %7325 = vmatmul.msk.f32.gmra.mxu1 %vm215_vm1, %v9767_v36 }
 0x14e   : > { %8665 = vrot.lane.b32.xlu1 %v9762_v34, %s9032_s25  ;;  %7346 = vmatmul.msk.f32.vlgmr.msra.gmra.mxu2 %vm215_vm1, %v7334_v3  ;;  %v1545_v8 = vsel %vm1543_vm10, %v8228_v20, %v8238_v48  ;;  %v8253_v20 = vunpack.i.h.bf16 %v8251_v12  ;;  %v7336_v12 = vld [vmem:[%s13002_s1 + $0x110] sm:$0xff]  ;;  %vm3265_vm10 = vcmask 498688  }
 0x14f   : > { %8670 = vrot.lane.b32.xlu2 %v9662_v0, %s9032_s25  ;;  %8660 = vrot.lane.b32.xlu0 %v9662_v0, %s9031_s20  ;;  %v353_v58 = vpop.f32.mrf.mxu3  ;;  %s9035_s20 = smov 17  }
 0x150   : > { %v354_v51 = vadd.f32 %v353_v58, %v9681_v5  ;;  %v9804_v15 = vpop.f32.mrf.mxu0  ;;  %v7335_v5 = vld [vmem:[%s13002_s1 + $0x108] sm:$0xff]  ;;  %1748 = vmatpush.msra.mxu2 %v1686_v22 }
 0x151   : > { %v639_v42 = vpop.f32.mrf.mxu2 }
 0x152   : > { %v9806_v61 = vpop.f32.mrf.mxu1  ;;  %v9813_v28 = vadd.f32 %v480_v38, %v354_v51  ;;  %v9842_v38 = vpop.permute.xlu1 %8245 }
 0x153   : > { %7338 = vmatmul.msk.f32.vlgmr.msra.gmra.mxu0 %vm215_vm1, %v7334_v3 }
 0x154   : > { %7330 = vmatmul.msk.f32.vlgmr.msra.gmra.mxu3 %vm215_vm1, %v9667_v1  ;;  %1638 = vmatpush.msra.mxu0 %v8237_v50  ;;  %v8929_v50 = vld [vmem:[%s9121_s28 + $0x18] sm:$0xff] }
 0x155   : > { %7342 = vmatmul.msk.f32.vlgmr.msra.gmra.mxu1 %vm215_vm1, %v7334_v3  ;;  %1609 = vmatpush.msra.mxu3 %v1547_v16  ;;  %v8247_v16 = vunpack.i.l.bf16 %v9842_v38  ;;  %v9853_v25 = vpack.i.bf16 %v8929_v50, %v9654_v59 }
 0x156   : > { %8680 = vrot.lane.b32.xlu1 %v9662_v0, %s9033_s29  ;;  %7347 = vmatmul.msk.f32.gmra.mxu2 %vm215_vm1, %v7335_v5 }
 0x157   : > { %8685 = vrot.lane.b32.xlu2 %v9817_v24, %s9032_s25  ;;  %8675 = vrot.lane.b32.xlu0 %v9762_v34, %s9033_s29  ;;  %v500_v1 = vpop.f32.mrf.mxu3 }
 0x158   : > { %v542_v3 = vadd.f32 %v500_v1, %v374_v33  ;;  %1610 = vmatpush.msra.mxu3 %v1545_v8  ;;  %1719 = vmatpush.msra.mxu1 %v1685_v46  ;;  %v9844_v58 = vpop.f32.mrf.mxu0 }
 0x159   : > { %1639 = vmatpush.msra.mxu0 %v8238_v48  ;;  %v642_v7 = vpop.f32.mrf.mxu2  ;;  %v1683_v48 = vsel %vm1682_vm11, %v8253_v20, %v8247_v16 }
 0x15a   : > { %v9846_v51 = vpop.f32.mrf.mxu1  ;;  %v9849_v8 = vadd.f32 %v639_v42, %v542_v3  ;;  %v377_v42 = vadd.f32 %v9729_v52, %v9591_v39  ;;  %1720 = vmatpush.msra.mxu1 %v1683_v48  ;;  %v9876_v39 = vpack.i.bf16 %v8929_v50, %v8928_v14  ;;  %v8248_v52 = vunpack.i.h.bf16 %v9842_v38  ;;  %v7337_v3 = vld [vmem:[%s13002_s1 + $0x118] sm:$0xff] }
 0x15b   : > { %7339 = vmatmul.msk.f32.gmra.mxu0 %vm215_vm1, %v7335_v5  ;;  %v380_v14 = vadd.f32 %v9756_v21, %v9617_v47  ;;  %v8256_v47 = vpop.permute.xlu0 %8255 }
 0x15c   : > { %7331 = vmatmul.msk.f32.gmra.mxu3 %vm215_vm1, %v9705_v9  ;;  %v8257_v48 = vunpack.i.l.bf16 %v8256_v47 }
 0x15d   : > { %7343 = vmatmul.msk.f32.gmra.mxu1 %vm215_vm1, %v7335_v5 }
 0x15e   : > { %8695 = vrot.lane.b32.xlu1 %v9700_v10, %s9033_s29  ;;  %7348 = vmatmul.msk.f32.gmra.mxu2 %vm215_vm1, %v7336_v12 }
 0x15f   : > { %8700 = vrot.lane.b32.xlu2 %v9691_v27, %s9034_s8  ;;  %8690 = vrot.lane.b32.xlu0 %v9853_v25, %s9032_s25  ;;  %v503_v59 = vpop.f32.mrf.mxu3 }
 0x160   : > { %v545_v9 = vadd.f32 %v503_v59, %v377_v42  ;;  %v9872_v5 = vpop.f32.mrf.mxu0  ;;  %v383_v42 = vadd.f32 %v9782_v11, %v9642_v53  ;;  %v8261_v11 = vpop.permute.xlu1 %8260 }
 0x161   : > { %v645_v46 = vpop.f32.mrf.mxu2 }
 0x162   : > { %v9874_v33 = vpop.f32.mrf.mxu1  ;;  %v9879_v1 = vadd.f32 %v642_v7, %v545_v9  ;;  %v7350_v9 = vld [vmem:[%s13002_s1 + $0x120] sm:$0xff] }
 0x163   : > { %7340 = vmatmul.msk.f32.gmra.mxu0 %vm215_vm1, %v7336_v12 }
 0x164   : > { %7332 = vmatmul.msk.f32.gmra.mxu3 %vm215_vm1, %v9741_v31  ;;  %v1684_v31 = vsel %vm1682_vm11, %v8247_v16, %v8248_v52  ;;  %v8258_v16 = vunpack.i.h.bf16 %v8256_v47  ;;  %vm3410_vm11 = vcmask 490496  }
 0x165   : > { %7344 = vmatmul.msk.f32.gmra.mxu1 %vm215_vm1, %v7336_v12  ;;  %1749 = vmatpush.msra.mxu2 %v1684_v31  ;;  %v9907_v12 = vld [vmem:[%s13002_s1 + $0x140] sm:$0xff]  ;;  %v8263_v31 = vunpack.i.h.bf16 %v8261_v11 }
 0x166   : > { %8710 = vrot.lane.b32.xlu1 %v9876_v39, %s9033_s29  ;;  %7349 = vmatmul.msk.f32.gmra.mxu2 %vm215_vm1, %v7337_v3  ;;  %s8956_s29 = scalar_lea.hbm %s13004_s3, 192 }
 0x167   : > { %8715 = vrot.lane.b32.xlu2 %v9734_v13, %s9034_s8  ;;  %8705 = vrot.lane.b32.xlu0 %v9696_v29, %s9034_s8  ;;  %v506_v22 = vpop.f32.mrf.mxu3  ;;  %v1825_v18 = vsel %vm1821_vm12, %v8263_v31, %v8257_v48 }
 0x168   : > { %v548_v20 = vadd.f32 %v506_v22, %v380_v14  ;;  %v9898_v38 = vpop.f32.mrf.mxu0  ;;  %v9933_v14 = vld [vmem:[%s13002_s1 + $0x148] sm:$0xff] }
 0x169   : > { %v648_v7 = vpop.f32.mrf.mxu2 }
 0x16a   : > { %v9900_v50 = vpop.f32.mrf.mxu1  ;;  %v9902_v21 = vadd.f32 %v645_v46, %v548_v20  ;;  %v403_v20 = vadd.f32 %v9687_v23, %v9644_v54  ;;  %v8266_v23 = vpop.permute.xlu2 %8265 }
 0x16b   : > { %7341 = vmatmul.msk.f32.gmra.mxu0 %vm215_vm1, %v7337_v3 }
 0x16c   : > { %7333 = vmatmul.msk.f32.gmra.mxu3 %vm215_vm1, %v9767_v36  ;;  %v543_v47 = vadd.f32 %v9804_v15, %v403_v20  ;;  %v8262_v15 = vunpack.i.l.bf16 %v8261_v11  ;;  %v9962_v20 = vld [vmem:[%s13002_s1 + $0x150] sm:$0xff] }
 0x16d   : > { %7345 = vmatmul.msk.f32.gmra.mxu1 %vm215_vm1, %v7337_v3 }
 0x16e   : > { %8725 = vrot.lane.b32.xlu1 %v9817_v24, %s9035_s20  ;;  %7370 = vmatmul.msk.f32.vlgmr.msrb.gmra.mxu2 %vm215_vm1, %v9907_v12 }
 0x16f   : > { %8730 = vrot.lane.b32.xlu2 %v9853_v25, %s9035_s20  ;;  %8720 = vrot.lane.b32.xlu0 %v9876_v39, %s9034_s8  ;;  %v509_v36 = vpop.f32.mrf.mxu3 }
 0x170   : > { %v551_v59 = vadd.f32 %v509_v36, %v383_v42  ;;  %1916 = vmatpush.msrb.mxu2 %v8257_v48  ;;  %v9924_v3 = vpop.f32.mrf.mxu0  ;;  %v7351_v42 = vld [vmem:[%s13002_s1 + $0x128] sm:$0xff]  ;;  %v406_v48 = vadd.f32 %v9731_v60, %v9593_v40 }
 0x171   : > { %v807_v22 = vpop.f32.mrf.mxu2 }
 0x172   : > { %v9926_v53 = vpop.f32.mrf.mxu1  ;;  %1917 = vmatpush.msrb.mxu2 %v8258_v16  ;;  %v9928_v46 = vadd.f32 %v648_v7, %v551_v59 }
 0x173   : > { %7358 = vmatmul.msk.f32.vlgmr.msrb.gmra.mxu0 %vm215_vm1, %v7350_v9 }
 0x174   : > { %7354 = vmatmul.msk.f32.vlgmr.msrb.gmra.mxu3 %vm215_vm1, %v7350_v9 }
 0x175   : > { %7362 = vmatmul.msk.f32.vlgmr.msrb.gmra.mxu1 %vm215_vm1, %v7350_v9  ;;  %1777 = vmatpush.msrb.mxu3 %v8243_v41  ;;  %v8268_v41 = vunpack.i.h.bf16 %v8266_v23 }
 0x176   : > { %8740 = vrot.lane.b32.xlu1 %v9662_v0, %s9035_s20  ;;  %7371 = vmatmul.msk.f32.gmra.mxu2 %vm215_vm1, %v9933_v14 }
 0x177   : > { %8745 = vrot.lane.b32.xlu2 %v9762_v34, %s9036_s27  ;;  %8735 = vrot.lane.b32.xlu0 %v9762_v34, %s9035_s20  ;;  %v668_v54 = vpop.f32.mrf.mxu3  ;;  %v1823_v11 = vsel %vm1821_vm12, %v8268_v41, %v8258_v16 }
 0x178   : > { %v682_v7 = vadd.f32 %v668_v54, %v543_v47  ;;  %1778 = vmatpush.msrb.mxu3 %v8248_v52  ;;  %1887 = vmatpush.msrb.mxu1 %v1825_v18  ;;  %v9953_v36 = vpop.f32.mrf.mxu0  ;;  %v546_v47 = vadd.f32 %v9844_v58, %v406_v48  ;;  %v7352_v58 = vld [vmem:[%s13002_s1 + $0x130] sm:$0xff]  ;;  %v8267_v48 = vunpack.i.l.bf16 %v8266_v23 }
 0x179   : > { %v810_v52 = vpop.f32.mrf.mxu2 }
 0x17a   : > { %v9955_v59 = vpop.f32.mrf.mxu1  ;;  %v9957_v9 = vadd.f32 %v807_v22, %v682_v7  ;;  %v1824_v22 = vsel %vm1821_vm12, %v8262_v15, %v8263_v31  ;;  %1888 = vmatpush.msrb.mxu1 %v1823_v11  ;;  %v9992_v7 = vld [vmem:[%s13002_s1 + $0x158] sm:$0xff]  ;;  %v409_v15 = vadd.f32 %v9758_v30, %v9624_v49  ;;  %v1822_v23 = vsel %vm1821_vm12, %v8267_v48, %v8268_v41 }
 0x17b   : > { %7359 = vmatmul.msk.f32.gmra.mxu0 %vm215_vm1, %v7351_v42  ;;  %v7353_v11 = vld [vmem:[%s13002_s1 + $0x138] sm:$0xff]  ;;  %vm3555_vm12 = vcmask 482304  }
 0x17c   : > { %7355 = vmatmul.msk.f32.gmra.mxu3 %vm215_vm1, %v7351_v42  ;;  %1858 = vmatpush.msrb.mxu0 %v1824_v22 }
 0x17d   : > { %7363 = vmatmul.msk.f32.gmra.mxu1 %vm215_vm1, %v7351_v42  ;;  %v9999_v42 = vpop.permute.xlu1 %8275 }
 0x17e   : > { %8755 = vrot.lane.b32.xlu1 %v9762_v34, %s9037_s9  ;;  %7372 = vmatmul.msk.f32.gmra.mxu2 %vm215_vm1, %v9962_v20 }
 0x17f   : > { %8760 = vrot.lane.b32.xlu2 %v9662_v0, %s9037_s9  ;;  %8750 = vrot.lane.b32.xlu0 %v9662_v0, %s9036_s27  ;;  %v671_v40 = vpop.f32.mrf.mxu3 }
 0x180   : > { %v685_v60 = vadd.f32 %v671_v40, %v546_v47  ;;  %v9983_v16 = vpop.f32.mrf.mxu0  ;;  %1859 = vmatpush.msrb.mxu0 %v1822_v23 }
 0x181   : > { %v813_v18 = vpop.f32.mrf.mxu2 }
 0x182   : > { %v9985_v31 = vpop.f32.mrf.mxu1  ;;  %v9987_v54 = vadd.f32 %v810_v52, %v685_v60  ;;  %v549_v52 = vadd.f32 %v9872_v5, %v409_v15  ;;  %v412_v60 = vadd.f32 %v9784_v26, %v9669_v4 }
 0x183   : > { %7360 = vmatmul.msk.f32.gmra.mxu0 %vm215_vm1, %v7352_v58 }
 0x184   : > { %7356 = vmatmul.msk.f32.gmra.mxu3 %vm215_vm1, %v7352_v58 }
 0x185   : > { %7364 = vmatmul.msk.f32.gmra.mxu1 %vm215_vm1, %v7352_v58  ;;  %v552_v58 = vadd.f32 %v9898_v38, %v412_v60  ;;  %v8291_v41 = vpop.permute.xlu1 %8290  ;;  %v8278_v38 = vunpack.i.h.bf16 %v9999_v42  ;;  %v10045_v60 = vpop.permute.xlu2 %8280 }
 0x186   : > { %8770 = vrot.lane.b32.xlu1 %v9853_v25, %s9036_s27  ;;  %7373 = vmatmul.msk.f32.gmra.mxu2 %vm215_vm1, %v9992_v7 }
 0x187   : > { %8775 = vrot.lane.b32.xlu2 %v9700_v10, %s9037_s9  ;;  %8765 = vrot.lane.b32.xlu0 %v9817_v24, %s9036_s27  ;;  %v674_v49 = vpop.f32.mrf.mxu3  ;;  %v10022_v10 = vld [vmem:[%s13002_s1 + $0x160] sm:$0xff]  ;;  %s9038_s27 = smov 14  }
 0x188   : > { %v688_v30 = vadd.f32 %v674_v49, %v549_v52  ;;  %v10013_v5 = vpop.f32.mrf.mxu0  ;;  %v8292_v49 = vunpack.i.l.bf16 %v8291_v41 }
 0x189   : > { %v816_v40 = vpop.f32.mrf.mxu2 }
 0x18a   : > { %v10015_v22 = vpop.f32.mrf.mxu1  ;;  %v10017_v47 = vadd.f32 %v813_v18, %v688_v30  ;;  %v8271_v18 = vpop.permute.xlu0 %8270  ;;  %v8293_v30 = vunpack.i.h.bf16 %v8291_v41 }
 0x18b   : > { %7361 = vmatmul.msk.f32.gmra.mxu0 %vm215_vm1, %v7353_v11  ;;  %v8273_v26 = vunpack.i.h.bf16 %v8271_v18  ;;  %v8272_v15 = vunpack.i.l.bf16 %v8271_v18  ;;  %v680_v18 = vadd.f32 %v9806_v61, %v9736_v6 }
 0x18c   : > { %7357 = vmatmul.msk.f32.gmra.mxu3 %vm215_vm1, %v7353_v11  ;;  %v1962_v61 = vsel %vm1960_vm13, %v8278_v38, %v8293_v30 }
 0x18d   : > { %7365 = vmatmul.msk.f32.gmra.mxu1 %vm215_vm1, %v7353_v11 }
 0x18e   : > { %8785 = vrot.lane.b32.xlu1 %v9696_v29, %s9038_s27  ;;  %7390 = vmatmul.msk.f32.vlgmr.msra.gmra.mxu2 %vm215_vm1, %v10022_v10  ;;  %v8277_v29 = vunpack.i.l.bf16 %v9999_v42  ;;  %v8282_v42 = vunpack.i.l.bf16 %v10045_v60 }
 0x18f   : > { %8790 = vrot.lane.b32.xlu2 %v9876_v39, %s9037_s9  ;;  %8780 = vrot.lane.b32.xlu0 %v9691_v27, %s9038_s27  ;;  %v677_v4 = vpop.f32.mrf.mxu3  ;;  %v10052_v27 = vld [vmem:[%s13002_s1 + $0x168] sm:$0xff] }
 0x190   : > { %v691_v52 = vadd.f32 %v677_v4, %v552_v58  ;;  %v10041_v48 = vpop.f32.mrf.mxu0  ;;  %v8283_v58 = vunpack.i.h.bf16 %v10045_v60  ;;  %v1964_v4 = vsel %vm1960_vm13, %v8273_v26, %v8292_v49  ;;  %v1961_v41 = vsel %vm1960_vm13, %v8277_v29, %v8278_v38 }
 0x191   : > { %v1027_v23 = vpop.f32.mrf.mxu2 }
 0x192   : > { %v10043_v11 = vpop.f32.mrf.mxu1  ;;  %v10047_v2 = vadd.f32 %v816_v40, %v691_v52  ;;  %v1963_v40 = vsel %vm1960_vm13, %v8272_v15, %v8273_v26  ;;  %v819_v52 = vadd.f32 %v9924_v3, %v680_v18  ;;  %v2109_v3 = vsel %vm2105_vm14, %v8282_v42, %v8283_v58 }
 0x193   : > { %7378 = vmatmul.msk.f32.vlgmr.msra.gmra.mxu0 %vm215_vm1, %v9907_v12  ;;  %2144 = vmatpush.msra.mxu2 %v2109_v3  ;;  %v683_v18 = vadd.f32 %v9846_v51, %v9760_v32  ;;  %vm3700_vm13 = vcmask 474112  }
 0x194   : > { %7374 = vmatmul.msk.f32.vlgmr.msra.gmra.mxu3 %vm215_vm1, %v9907_v12  ;;  %2026 = vmatpush.msra.mxu0 %v1964_v4  ;;  %v10117_v4 = vld [vmem:[%s13002_s1 + $0x178] sm:$0xff] }
 0x195   : > { %7386 = vmatmul.msk.f32.vlgmr.msra.gmra.mxu1 %vm215_vm1, %v10022_v10  ;;  %1997 = vmatpush.msra.mxu3 %v1963_v40 }
 0x196   : > { %8800 = vrot.lane.b32.xlu1 %v9876_v39, %s9038_s27  ;;  %7391 = vmatmul.msk.f32.gmra.mxu2 %vm215_vm1, %v10052_v27 }
 0x197   : > { %8805 = vrot.lane.b32.xlu2 %v9817_v24, %s9039_s4  ;;  %8795 = vrot.lane.b32.xlu0 %v9734_v13, %s9038_s27  ;;  %v888_v6 = vpop.f32.mrf.mxu3  ;;  %v10088_v13 = vld [vmem:[%s13002_s1 + $0x170] sm:$0xff] }
 0x198   : > { %v958_v12 = vadd.f32 %v888_v6, %v819_v52  ;;  %1998 = vmatpush.msra.mxu3 %v1961_v41  ;;  %2055 = vmatpush.msra.mxu1 %v8292_v49  ;;  %v10079_v26 = vpop.f32.mrf.mxu0  ;;  %v10096_v49 = vpop.permute.xlu0 %8285  ;;  %v686_v6 = vadd.f32 %v9874_v33, %v9786_v44 }
 0x199   : > { %2027 = vmatpush.msra.mxu0 %v1962_v61  ;;  %v1030_v38 = vpop.f32.mrf.mxu2  ;;  %v8296_v52 = vpop.permute.xlu2 %8295 }
 0x19a   : > { %v10081_v15 = vpop.f32.mrf.mxu1  ;;  %v10083_v29 = vadd.f32 %v1027_v23, %v958_v12  ;;  %2056 = vmatpush.msra.mxu1 %v8293_v30  ;;  %v822_v23 = vadd.f32 %v9953_v36, %v683_v18  ;;  %v8287_v30 = vunpack.i.l.bf16 %v10096_v49  ;;  %v825_v61 = vadd.f32 %v9983_v16, %v686_v6 }
 0x19b   : > { %7379 = vmatmul.msk.f32.gmra.mxu0 %vm215_vm1, %v9933_v14 }
 0x19c   : > { %7375 = vmatmul.msk.f32.gmra.mxu3 %vm215_vm1, %v9933_v14  ;;  %v8288_v14 = vunpack.i.h.bf16 %v10096_v49  ;;  %v689_v49 = vadd.f32 %v9900_v50, %v9813_v28  ;;  %v8298_v50 = vunpack.i.h.bf16 %v8296_v52 }
 0x19d   : > { %7387 = vmatmul.msk.f32.gmra.mxu1 %vm215_vm1, %v10052_v27 }
 0x19e   : > { %8815 = vrot.lane.b32.xlu1 %v9762_v34, %s9039_s4  ;;  %7392 = vmatmul.msk.f32.gmra.mxu2 %vm215_vm1, %v10088_v13  ;;  %v2106_v12 = vsel %vm2105_vm14, %v8287_v30, %v8288_v14  ;;  %v2107_v60 = vsel %vm2105_vm14, %v8288_v14, %v8298_v50 }
 0x19f   : > { %8820 = vrot.lane.b32.xlu2 %v9662_v0, %s9039_s4  ;;  %8810 = vrot.lane.b32.xlu0 %v9853_v25, %s9039_s4  ;;  %v891_v32 = vpop.f32.mrf.mxu3  ;;  %s9044_s4 = smov 118  }
 0x1a0   : > { %v961_v51 = vadd.f32 %v891_v32, %v822_v23  ;;  %v10108_v42 = vpop.f32.mrf.mxu0  ;;  %v10132_v44 = vpop.permute.xlu0 %8300  ;;  %2145 = vmatpush.msra.mxu2 %v2106_v12  ;;  %v828_v23 = vadd.f32 %v10013_v5, %v689_v49 }
 0x1a1   : > { %v1033_v41 = vpop.f32.mrf.mxu2  ;;  %v8302_v5 = vunpack.i.l.bf16 %v10132_v44 }
 0x1a2   : > { %v10110_v40 = vpop.f32.mrf.mxu1  ;;  %v10112_v36 = vadd.f32 %v1030_v38, %v961_v51 }
 0x1a3   : > { %7380 = vmatmul.msk.f32.gmra.mxu0 %vm215_vm1, %v9962_v20 }
 0x1a4   : > { %7376 = vmatmul.msk.f32.gmra.mxu3 %vm215_vm1, %v9962_v20 }
 0x1a5   : > { %7388 = vmatmul.msk.f32.gmra.mxu1 %vm215_vm1, %v10088_v13 }
 0x1a6   : > { %8830 = vrot.lane.b32.xlu1 %v9662_v0, %s9040_s17  ;;  %7393 = vmatmul.msk.f32.gmra.mxu2 %vm215_vm1, %v10117_v4  ;;  %v7398_v0 = vld [vmem:[%s13002_s1 + $0x180] sm:$0xff] }
 0x1a7   : > { %8835 = vrot.lane.b32.xlu2 %v9817_v24, %s9040_s17  ;;  %8825 = vrot.lane.b32.xlu0 %v9762_v34, %s9040_s17  ;;  %v894_v33 = vpop.f32.mrf.mxu3  ;;  %v8297_v34 = vunpack.i.l.bf16 %v8296_v52  ;;  %v8311_v24 = vpop.permute.xlu2 %8310 }
 0x1a8   : > { %v964_v20 = vadd.f32 %v894_v33, %v825_v61  ;;  %v10136_v3 = vpop.f32.mrf.mxu0  ;;  %v8312_v32 = vunpack.i.l.bf16 %v8311_v24  ;;  %v8313_v51 = vunpack.i.h.bf16 %v8311_v24  ;;  %v8316_v30 = vpop.permute.xlu0 %8315  ;;  %v820_v24 = vadd.f32 %v9926_v53, %v9849_v8 }
 0x1a9   : > { %v1036_v18 = vpop.f32.mrf.mxu2  ;;  %v8317_v6 = vunpack.i.l.bf16 %v8316_v30  ;;  %v2110_v33 = vsel %vm2105_vm14, %v8283_v58, %v8297_v34 }
 0x1aa   : > { %v10138_v16 = vpop.f32.mrf.mxu1  ;;  %v10140_v38 = vadd.f32 %v1033_v41, %v964_v20  ;;  %v8303_v41 = vunpack.i.h.bf16 %v10132_v44  ;;  %v2111_v49 = vsel %vm2105_vm14, %v8297_v34, %v8312_v32  ;;  %v2108_v58 = vsel %vm2105_vm14, %v8298_v50, %v8313_v51 }
 0x1ab   : > { %7381 = vmatmul.msk.f32.gmra.mxu0 %vm215_vm1, %v9992_v7  ;;  %v2254_v8 = vsel %vm2250_vm15, %v8317_v6, %v8302_v5  ;;  %vm3845_vm14 = vcmask 465920  }
 0x1ac   : > { %7377 = vmatmul.msk.f32.gmra.mxu3 %vm215_vm1, %v9992_v7  ;;  %v2255_v53 = vsel %vm2250_vm15, %v8302_v5, %v8303_v41 }
 0x1ad   : > { %7389 = vmatmul.msk.f32.gmra.mxu1 %vm215_vm1, %v10117_v4 }
 0x1ae   : > { %8845 = vrot.lane.b32.xlu1 %v9876_v39, %s9003_s5  ;;  %7410 = vmatmul.msk.f32.vlgmr.msrb.gmra.mxu2 %vm215_vm1, %v7398_v0  ;;  %s9043_s5 = smov 119  }
 0x1af   : > { %8850 = vrot.lane.b32.xlu2 %v9876_v39, %s9004_s6  ;;  %8840 = vrot.lane.b32.xlu0 %v9853_v25, %s9040_s17  ;;  %v897_v28 = vpop.f32.mrf.mxu3  ;;  %v7399_v25 = vld [vmem:[%s13002_s1 + $0x188] sm:$0xff]  ;;  %s8001_s17 = smul.u32 96, %s9089_s16 }
 0x1b0   : > { %v967_v7 = vadd.f32 %v897_v28, %v828_v23  ;;  %v10162_v61 = vpop.f32.mrf.mxu0  ;;  %2318 = vmatpush.msrb.mxu2 %v2255_v53  ;;  %v829_v53 = vadd.f32 %v10015_v22, %v9928_v46  ;;  %v7414_v46 = vld [vmem:[%s13002_s1 + $0x1a0] sm:$0xff] }
 0x1b1   : > { %v1195_v52 = vpop.f32.mrf.mxu2 }
 0x1b2   : > { %v10164_v12 = vpop.f32.mrf.mxu1  ;;  %v10169_v20 = vadd.f32 %v1036_v18, %v967_v7  ;;  %v959_v18 = vadd.f32 %v10041_v48, %v820_v24  ;;  %v8318_v48 = vunpack.i.h.bf16 %v8316_v30  ;;  %v823_v7 = vadd.f32 %v9955_v59, %v9879_v1 }
 0x1b3   : > { %7402 = vmatmul.msk.f32.vlgmr.msrb.gmra.mxu0 %vm215_vm1, %v7398_v0 }
 0x1b4   : > { %7394 = vmatmul.msk.f32.vlgmr.msrb.gmra.mxu3 %vm215_vm1, %v10022_v10  ;;  %2202 = vmatpush.msrb.mxu0 %v2111_v49  ;;  %v962_v30 = vadd.f32 %v10079_v26, %v823_v7  ;;  %v826_v26 = vadd.f32 %v9985_v31, %v9902_v21 }
 0x1b5   : > { %7406 = vmatmul.msk.f32.vlgmr.msrb.gmra.mxu1 %vm215_vm1, %v7398_v0  ;;  %2173 = vmatpush.msrb.mxu3 %v2110_v33  ;;  %v10191_v0 = vpop.permute.xlu1 %8305 }
 0x1b6   : > { %7411 = vmatmul.msk.f32.gmra.mxu2 %vm215_vm1, %v7399_v25  ;;  %2203 = vmatpush.msrb.mxu0 %v2108_v58  ;;  %v8307_v32 = vunpack.i.l.bf16 %v10191_v0  ;;  %v8308_v33 = vunpack.i.h.bf16 %v10191_v0  ;;  %v965_v49 = vadd.f32 %v10108_v42, %v826_v26 }
 0x1b7   : > { %8855 = vrot.lane.b32.xlu0 %v9876_v39, %s9005_s7  ;;  %v1056_v10 = vpop.f32.mrf.mxu3  ;;  %2174 = vmatpush.msrb.mxu3 %v2107_v60  ;;  %v7400_v39 = vld [vmem:[%s13002_s1 + $0x190] sm:$0xff] }
 0x1b8   : > { %v1098_v14 = vadd.f32 %v1056_v10, %v959_v18  ;;  %2289 = vmatpush.msrb.mxu1 %v2254_v8  ;;  %v10193_v34 = vpop.f32.mrf.mxu0  ;;  %v2251_v51 = vsel %vm2250_vm15, %v8318_v48, %v8307_v32  ;;  %v2252_v24 = vsel %vm2250_vm15, %v8307_v32, %v8308_v33 }
 0x1b9   : > { %v1198_v50 = vpop.f32.mrf.mxu2  ;;  %2319 = vmatpush.msrb.mxu2 %v2252_v24 }
 0x1ba   : > { %v10195_v23 = vpop.f32.mrf.mxu1  ;;  %v10198_v28 = vadd.f32 %v1195_v52, %v1098_v14  ;;  %2290 = vmatpush.msrb.mxu1 %v2251_v51  ;;  %v968_v14 = vadd.f32 %v10136_v3, %v829_v53 }
 0x1bb   : > { %7403 = vmatmul.msk.f32.gmra.mxu0 %vm215_vm1, %v7399_v25 }
 0x1bc   : > { %7395 = vmatmul.msk.f32.gmra.mxu3 %vm215_vm1, %v10052_v27  ;;  %v7401_v27 = vld [vmem:[%s13002_s1 + $0x198] sm:$0xff] }
 0x1bd   : > { %7407 = vmatmul.msk.f32.gmra.mxu1 %vm215_vm1, %v7399_v25  ;;  %v8321_v60 = vpop.permute.xlu1 %8320 }
 0x1be   : > { %7412 = vmatmul.msk.f32.gmra.mxu2 %vm215_vm1, %v7400_v39  ;;  %v8322_v10 = vunpack.i.l.bf16 %v8321_v60  ;;  %v8323_v48 = vunpack.i.h.bf16 %v8321_v60 }
 0x1bf   : > { %v1059_v5 = vpop.f32.mrf.mxu3 }
 0x1c0   : > { %v1101_v6 = vadd.f32 %v1059_v5, %v962_v30  ;;  %v10213_v52 = vpop.f32.mrf.mxu0  ;;  %v2256_v3 = vsel %vm2250_vm15, %v8303_v41, %v8322_v10  ;;  %v2253_v44 = vsel %vm2250_vm15, %v8308_v33, %v8323_v48  ;;  %v7415_v33 = vld [vmem:[%s13002_s1 + $0x1a8] sm:$0xff]  ;;  %v963_v10 = vadd.f32 %v10081_v15, %v9987_v54  ;;  %v7416_v54 = vld [vmem:[%s13002_s1 + $0x1b0] sm:$0xff] }
 0x1c1   : > { %v1201_v25 = vpop.f32.mrf.mxu2  ;;  %vm3990_vm15 = vcmask 457728  }
 0x1c2   : > { %v10215_v1 = vpop.f32.mrf.mxu1  ;;  %v10217_v59 = vadd.f32 %v1198_v50, %v1101_v6  ;;  %v10266_v6 = vld [vmem:[%s13002_s1 + $0x1c8] sm:$0xff] }
 0x1c3   : > { %7404 = vmatmul.msk.f32.gmra.mxu0 %vm215_vm1, %v7400_v39 }
 0x1c4   : > { %7396 = vmatmul.msk.f32.gmra.mxu3 %vm215_vm1, %v10088_v13  ;;  %v10240_v13 = vld [vmem:[%s13002_s1 + $0x1c0] sm:$0xff] }
 0x1c5   : > { %7408 = vmatmul.msk.f32.gmra.mxu1 %vm215_vm1, %v7400_v39  ;;  %v8326_v39 = vpop.permute.xlu2 %8325  ;;  %v8336_v50 = vpop.permute.xlu1 %8335 }
 0x1c6   : > { %7413 = vmatmul.msk.f32.gmra.mxu2 %vm215_vm1, %v7401_v27  ;;  %v8328_v7 = vunpack.i.h.bf16 %v8326_v39  ;;  %v8327_v51 = vunpack.i.l.bf16 %v8326_v39  ;;  %v8338_v30 = vunpack.i.h.bf16 %v8336_v50  ;;  %v8337_v24 = vunpack.i.l.bf16 %v8336_v50  ;;  %v8331_v39 = vpop.permute.xlu0 %8330 }
 0x1c7   : > { %v1062_v58 = vpop.f32.mrf.mxu3  ;;  %v8333_v50 = vunpack.i.h.bf16 %v8331_v39 }
 0x1c8   : > { %v1104_v18 = vadd.f32 %v1062_v58, %v965_v49  ;;  %v10231_v8 = vpop.f32.mrf.mxu0  ;;  %v2400_v49 = vsel %vm2395_vm0, %v8338_v30, %v8327_v51 }
 0x1c9   : > { %v1204_v42 = vpop.f32.mrf.mxu2 }
 0x1ca   : > { %v10233_v21 = vpop.f32.mrf.mxu1  ;;  %v10235_v31 = vadd.f32 %v1201_v25, %v1104_v18  ;;  %v960_v25 = vadd.f32 %v10043_v11, %v9957_v9  ;;  %v2401_v9 = vsel %vm2395_vm0, %v8327_v51, %v8328_v7  ;;  %v10291_v18 = vld [vmem:[%s13002_s1 + $0x1d0] sm:$0xff] }
 0x1cb   : > { %7405 = vmatmul.msk.f32.gmra.mxu0 %vm215_vm1, %v7401_v27 }
 0x1cc   : > { %7397 = vmatmul.msk.f32.gmra.mxu3 %vm215_vm1, %v10117_v4  ;;  %v1099_v41 = vadd.f32 %v10162_v61, %v960_v25 }
 0x1cd   : > { %7409 = vmatmul.msk.f32.gmra.mxu1 %vm215_vm1, %v7401_v27  ;;  %v8341_v53 = vpop.permute.xlu2 %8340  ;;  %v8351_v25 = vpop.permute.xlu1 %8350 }
 0x1ce   : > { %7434 = vmatmul.msk.f32.vlgmr.msra.gmra.mxu2 %vm215_vm1, %v10240_v13  ;;  %v8343_v15 = vunpack.i.h.bf16 %v8341_v53 }
 0x1cf   : > { %v1065_v0 = vpop.f32.mrf.mxu3  ;;  %2492 = vmatpush.msra.mxu2 %v2401_v9 }
 0x1d0   : > { %v1107_v32 = vadd.f32 %v1065_v0, %v968_v14  ;;  %v10254_v22 = vpop.f32.mrf.mxu0  ;;  %v2399_v14 = vsel %vm2395_vm0, %v8337_v24, %v8338_v30  ;;  %v1102_v0 = vadd.f32 %v10193_v34, %v963_v10  ;;  %v10314_v34 = vld [vmem:[%s13002_s1 + $0x1d8] sm:$0xff] }
 0x1d1   : > { %v1363_v27 = vpop.f32.mrf.mxu2 }
 0x1d2   : > { %v10256_v4 = vpop.f32.mrf.mxu1  ;;  %v10261_v5 = vadd.f32 %v1204_v42, %v1107_v32 }
 0x1d3   : > { %7422 = vmatmul.msk.f32.vlgmr.msra.gmra.mxu0 %vm215_vm1, %v7414_v46 }
 0x1d4   : > { %7418 = vmatmul.msk.f32.vlgmr.msra.gmra.mxu3 %vm215_vm1, %v7414_v46  ;;  %2434 = vmatpush.msra.mxu0 %v2399_v14  ;;  %v969_v14 = vadd.f32 %v10138_v16, %v10047_v2 }
 0x1d5   : > { %7426 = vmatmul.msk.f32.vlgmr.msra.gmra.mxu1 %vm215_vm1, %v7414_v46  ;;  %2347 = vmatpush.msra.mxu3 %v2256_v3  ;;  %v8332_v46 = vunpack.i.l.bf16 %v8331_v39 }
 0x1d6   : > { %7435 = vmatmul.msk.f32.gmra.mxu2 %vm215_vm1, %v10266_v6  ;;  %2463 = vmatpush.msra.mxu1 %v2400_v49 }
 0x1d7   : > { %v1224_v26 = vpop.f32.mrf.mxu3  ;;  %2348 = vmatpush.msra.mxu3 %v2253_v44  ;;  %v10321_v44 = vpop.permute.xlu2 %8355  ;;  %v2398_v49 = vsel %vm2395_vm0, %v8332_v46, %v8333_v50 }
 0x1d8   : > { %v1238_v11 = vadd.f32 %v1224_v26, %v1099_v41  ;;  %v10282_v60 = vpop.f32.mrf.mxu0  ;;  %v2397_v26 = vsel %vm2395_vm0, %v8343_v15, %v8332_v46  ;;  %2493 = vmatpush.msra.mxu2 %v2398_v49  ;;  %v8357_v49 = vunpack.i.l.bf16 %v10321_v44 }
 0x1d9   : > { %v1366_v42 = vpop.f32.mrf.mxu2  ;;  %2464 = vmatpush.msra.mxu1 %v2397_v26 }
 0x1da   : > { %v10284_v61 = vpop.f32.mrf.mxu1  ;;  %v10286_v58 = vadd.f32 %v1363_v27, %v1238_v11  ;;  %v966_v27 = vadd.f32 %v10110_v40, %v10017_v47  ;;  %v8342_v40 = vunpack.i.l.bf16 %v8341_v53  ;;  %v7417_v11 = vld [vmem:[%s13002_s1 + $0x1b8] sm:$0xff] }
 0x1db   : > { %7423 = vmatmul.msk.f32.gmra.mxu0 %vm215_vm1, %v7415_v33 }
 0x1dc   : > { %7419 = vmatmul.msk.f32.gmra.mxu3 %vm215_vm1, %v7415_v33  ;;  %v1105_v41 = vadd.f32 %v10213_v52, %v966_v27  ;;  %v2396_v53 = vsel %vm2395_vm0, %v8342_v40, %v8343_v15  ;;  %v8353_v27 = vunpack.i.h.bf16 %v8351_v25  ;;  %vm4135_vm0 = vcmask 326656  }
 0x1dd   : > { %7427 = vmatmul.msk.f32.gmra.mxu1 %vm215_vm1, %v7415_v33  ;;  %2435 = vmatpush.msra.mxu0 %v2396_v53 }
 0x1de   : > { %7436 = vmatmul.msk.f32.gmra.mxu2 %vm215_vm1, %v10291_v18 }
 0x1df   : > { %v1227_v48 = vpop.f32.mrf.mxu3 }
 0x1e0   : > { %v1241_v32 = vadd.f32 %v1227_v48, %v1102_v0  ;;  %v10305_v3 = vpop.f32.mrf.mxu0  ;;  %v8346_v0 = vpop.permute.xlu0 %8345  ;;  %v1108_v48 = vadd.f32 %v10231_v8, %v969_v14  ;;  %v8358_v8 = vunpack.i.h.bf16 %v10321_v44 }
 0x1e1   : > { %v1369_v30 = vpop.f32.mrf.mxu2  ;;  %v8348_v2 = vunpack.i.h.bf16 %v8346_v0  ;;  %v8347_v16 = vunpack.i.l.bf16 %v8346_v0 }
 0x1e2   : > { %v10307_v7 = vpop.f32.mrf.mxu1  ;;  %v10309_v51 = vadd.f32 %v1366_v42, %v1241_v32  ;;  %v10340_v42 = vld [vmem:[%s13002_s1 + $0x1e0] sm:$0xff]  ;;  %v8366_v32 = vpop.permute.xlu1 %8365  ;;  %v2689_v53 = vsel %vm2685_vm3, %v8357_v49, %v8358_v8 }
 0x1e3   : > { %7424 = vmatmul.msk.f32.gmra.mxu0 %vm215_vm1, %v7416_v54  ;;  %v8367_v50 = vunpack.i.l.bf16 %v8366_v32 }
 0x1e4   : > { %7420 = vmatmul.msk.f32.gmra.mxu3 %vm215_vm1, %v7416_v54 }
 0x1e5   : > { %7428 = vmatmul.msk.f32.gmra.mxu1 %vm215_vm1, %v7416_v54  ;;  %v10351_v54 = vpop.permute.xlu2 %8370 }
 0x1e6   : > { %7437 = vmatmul.msk.f32.gmra.mxu2 %vm215_vm1, %v10314_v34 }
 0x1e7   : > { %v1230_v9 = vpop.f32.mrf.mxu3 }
 0x1e8   : > { %v1244_v47 = vadd.f32 %v1230_v9, %v1105_v41  ;;  %v10331_v24 = vpop.f32.mrf.mxu0  ;;  %v8352_v41 = vunpack.i.l.bf16 %v8351_v25  ;;  %v1236_v25 = vadd.f32 %v10164_v12, %v10083_v29 }
 0x1e9   : > { %v1372_v10 = vpop.f32.mrf.mxu2 }
 0x1ea   : > { %v10333_v33 = vpop.f32.mrf.mxu1  ;;  %v10335_v52 = vadd.f32 %v1369_v30, %v1244_v47  ;;  %v8372_v30 = vunpack.i.l.bf16 %v10351_v54  ;;  %v10365_v47 = vld [vmem:[%s13002_s1 + $0x1e8] sm:$0xff]  ;;  %v2541_v14 = vsel %vm2540_vm2, %v8352_v41, %v8353_v27  ;;  %v1375_v12 = vadd.f32 %v10254_v22, %v1236_v25 }
 0x1eb   : > { %7425 = vmatmul.msk.f32.gmra.mxu0 %vm215_vm1, %v7417_v11  ;;  %v1239_v41 = vadd.f32 %v10195_v23, %v10112_v36 }
 0x1ec   : > { %7421 = vmatmul.msk.f32.gmra.mxu3 %vm215_vm1, %v7417_v11  ;;  %v2542_v29 = vsel %vm2540_vm2, %v8353_v27, %v8372_v30 }
 0x1ed   : > { %7429 = vmatmul.msk.f32.gmra.mxu1 %vm215_vm1, %v7417_v11  ;;  %v2544_v11 = vsel %vm2540_vm2, %v8347_v16, %v8348_v2  ;;  %v1378_v49 = vadd.f32 %v10282_v60, %v1239_v41  ;;  %v10423_v60 = vld [vmem:[%s13002_s1 + $0x1f8] sm:$0xff]  ;;  %v1245_v41 = vadd.f32 %v10233_v21, %v10169_v20 }
 0x1ee   : > { %7454 = vmatmul.msk.f32.vlgmr.msrb.gmra.mxu2 %vm215_vm1, %v10340_v42 }
 0x1ef   : > { %v1233_v39 = vpop.f32.mrf.mxu3  ;;  %2724 = vmatpush.msrb.mxu2 %v2689_v53  ;;  %v10437_v53 = vpop.permute.xlu1 %8380 }
 0x1f0   : > { %v1247_v46 = vadd.f32 %v1233_v39, %v1108_v48  ;;  %v10354_v15 = vpop.f32.mrf.mxu0  ;;  %v8368_v48 = vunpack.i.h.bf16 %v8366_v32  ;;  %v10387_v39 = vpop.permute.xlu0 %8360 }
 0x1f1   : > { %v1583_v40 = vpop.f32.mrf.mxu2  ;;  %v8363_v36 = vunpack.i.h.bf16 %v10387_v39  ;;  %v8362_v23 = vunpack.i.l.bf16 %v10387_v39 }
 0x1f2   : > { %v10356_v26 = vpop.f32.mrf.mxu1  ;;  %v10360_v9 = vadd.f32 %v1372_v10, %v1247_v46  ;;  %v2545_v10 = vsel %vm2540_vm2, %v8348_v2, %v8367_v50  ;;  %v10398_v46 = vld [vmem:[%s13002_s1 + $0x1f0] sm:$0xff]  ;;  %v2546_v32 = vsel %vm2540_vm2, %v8367_v50, %v8368_v48 }
 0x1f3   : > { %7442 = vmatmul.msk.f32.vlgmr.msrb.gmra.mxu0 %vm215_vm1, %v10240_v13 }
 0x1f4   : > { %7438 = vmatmul.msk.f32.vlgmr.msrb.gmra.mxu3 %vm215_vm1, %v10240_v13  ;;  %2608 = vmatpush.msrb.mxu0 %v2545_v10 }
 0x1f5   : > { %7450 = vmatmul.msk.f32.vlgmr.msrb.gmra.mxu1 %vm215_vm1, %v10340_v42  ;;  %2579 = vmatpush.msrb.mxu3 %v2544_v11 }
 0x1f6   : > { %7455 = vmatmul.msk.f32.gmra.mxu2 %vm215_vm1, %v10365_v47  ;;  %2609 = vmatpush.msrb.mxu0 %v2542_v29  ;;  %v1242_v29 = vadd.f32 %v10215_v1, %v10140_v38  ;;  %v8373_v1 = vunpack.i.h.bf16 %v10351_v54 }
 0x1f7   : > { %v1444_v13 = vpop.f32.mrf.mxu3  ;;  %2580 = vmatpush.msrb.mxu3 %v2541_v14  ;;  %2637 = vmatpush.msrb.mxu1 %v2546_v32 }
 0x1f8   : > { %v1514_v0 = vadd.f32 %v1444_v13, %v1375_v12  ;;  %v10389_v2 = vpop.f32.mrf.mxu0  ;;  %v8376_v14 = vpop.permute.xlu0 %8375  ;;  %v1381_v12 = vadd.f32 %v10305_v3, %v1242_v29  ;;  %v2686_v13 = vsel %vm2685_vm3, %v8362_v23, %v8363_v36  ;;  %v7462_v3 = vld [vmem:[%s13002_s1 + $0x200] sm:$0xff]  ;;  %v2543_v32 = vsel %vm2540_vm2, %v8372_v30, %v8373_v1 }
 0x1f9   : > { %v1586_v27 = vpop.f32.mrf.mxu2  ;;  %2725 = vmatpush.msrb.mxu2 %v2686_v13  ;;  %2638 = vmatpush.msrb.mxu1 %v2543_v32  ;;  %v8378_v23 = vunpack.i.h.bf16 %v8376_v14  ;;  %v8396_v29 = vpop.permute.xlu1 %8395  ;;  %v8382_v13 = vunpack.i.l.bf16 %v10437_v53  ;;  %v1376_v32 = vadd.f32 %v10256_v4, %v10198_v28  ;;  %vm4280_vm2 = vcmask 318464  }
 0x1fa   : > { %v10391_v22 = vpop.f32.mrf.mxu1  ;;  %v10393_v16 = vadd.f32 %v1583_v40, %v1514_v0  ;;  %v8397_v54 = vunpack.i.l.bf16 %v8396_v29 }
 0x1fb   : > { %7443 = vmatmul.msk.f32.gmra.mxu0 %vm215_vm1, %v10266_v6 }
 0x1fc   : > { %7439 = vmatmul.msk.f32.gmra.mxu3 %vm215_vm1, %v10266_v6  ;;  %v2834_v28 = vsel %vm2830_vm7, %v8397_v54, %v8382_v13 }
 0x1fd   : > { %7451 = vmatmul.msk.f32.gmra.mxu1 %vm215_vm1, %v10365_v47 }
 0x1fe   : > { %7456 = vmatmul.msk.f32.gmra.mxu2 %vm215_vm1, %v10398_v46 }
 0x1ff   : > { %v1447_v40 = vpop.f32.mrf.mxu3 }
 0x200   : > { %v1517_v25 = vadd.f32 %v1447_v40, %v1378_v49  ;;  %v10414_v11 = vpop.f32.mrf.mxu0  ;;  %v8377_v49 = vunpack.i.l.bf16 %v8376_v14  ;;  %v8391_v40 = vpop.permute.xlu0 %8390  ;;  %v7463_v14 = vld [vmem:[%s13002_s1 + $0x208] sm:$0xff] }
 0x201   : > { %v1589_v50 = vpop.f32.mrf.mxu2  ;;  %v8392_v20 = vunpack.i.l.bf16 %v8391_v40 }
 0x202   : > { %v10416_v6 = vpop.f32.mrf.mxu1  ;;  %v10418_v10 = vadd.f32 %v1586_v27, %v1517_v25  ;;  %v1384_v25 = vadd.f32 %v10331_v24, %v1245_v41  ;;  %v2690_v24 = vsel %vm2685_vm3, %v8358_v8, %v8377_v49  ;;  %v1515_v8 = vadd.f32 %v10354_v15, %v1376_v32 }
 0x203   : > { %7444 = vmatmul.msk.f32.gmra.mxu0 %vm215_vm1, %v10291_v18  ;;  %v2691_v41 = vsel %vm2685_vm3, %v8377_v49, %v8392_v20  ;;  %v8398_v49 = vunpack.i.h.bf16 %v8396_v29 }
 0x204   : > { %7440 = vmatmul.msk.f32.gmra.mxu3 %vm215_vm1, %v10291_v18 }
 0x205   : > { %7452 = vmatmul.msk.f32.gmra.mxu1 %vm215_vm1, %v10398_v46 }
 0x206   : > { %7457 = vmatmul.msk.f32.gmra.mxu2 %vm215_vm1, %v10423_v60 }
 0x207   : > { %v1450_v0 = vpop.f32.mrf.mxu3 }
 0x208   : > { %v1520_v38 = vadd.f32 %v1450_v0, %v1381_v12  ;;  %v10440_v48 = vpop.f32.mrf.mxu0  ;;  %v8393_v12 = vunpack.i.h.bf16 %v8391_v40 }
 0x209   : > { %v1592_v27 = vpop.f32.mrf.mxu2 }
 0x20a   : > { %v10442_v18 = vpop.f32.mrf.mxu1  ;;  %v10444_v39 = vadd.f32 %v1589_v50, %v1520_v38  ;;  %v2688_v44 = vsel %vm2685_vm3, %v8378_v23, %v8393_v12 }
 0x20b   : > { %7445 = vmatmul.msk.f32.gmra.mxu0 %vm215_vm1, %v10314_v34 }
 0x20c   : > { %7441 = vmatmul.msk.f32.gmra.mxu3 %vm215_vm1, %v10314_v34  ;;  %v8383_v34 = vunpack.i.h.bf16 %v10437_v53 }
 0x20d   : > { %7453 = vmatmul.msk.f32.gmra.mxu1 %vm215_vm1, %v10423_v60 }
 0x20e   : > { %7474 = vmatmul.msk.f32.vlgmr.msra.gmra.mxu2 %vm215_vm1, %v7462_v3  ;;  %v2835_v4 = vsel %vm2830_vm7, %v8382_v13, %v8383_v34 }
 0x20f   : > { %v1453_v21 = vpop.f32.mrf.mxu3  ;;  %2898 = vmatpush.msra.mxu2 %v2835_v4  ;;  %v1385_v4 = vadd.f32 %v10333_v33, %v10261_v5  ;;  %v7478_v5 = vld [vmem:[%s13002_s1 + $0x220] sm:$0xff] }
 0x210   : > { %v1523_v50 = vadd.f32 %v1453_v21, %v1384_v25  ;;  %v10466_v30 = vpop.f32.mrf.mxu0  ;;  %v7464_v21 = vld [vmem:[%s13002_s1 + $0x210] sm:$0xff] }
 0x211   : > { %v1751_v1 = vpop.f32.mrf.mxu2 }
 0x212   : > { %v10464_v0 = vadd.f32 %v1592_v27, %v1523_v50  ;;  %v10468_v38 = vpop.f32.mrf.mxu1  ;;  %v2687_v27 = vsel %vm2685_vm3, %v8363_v36, %v8378_v23  ;;  %v1379_v50 = vadd.f32 %v10284_v61, %v10217_v59  ;;  %vm4425_vm3 = vcmask 310272  }
 0x213   : > { %7466 = vmatmul.msk.f32.vlgmr.msra.gmra.mxu0 %vm215_vm1, %v7462_v3 }
 0x214   : > { %7458 = vmatmul.msk.f32.vlgmr.msra.gmra.mxu3 %vm215_vm1, %v10340_v42  ;;  %2782 = vmatpush.msra.mxu0 %v2691_v41  ;;  %v1518_v12 = vadd.f32 %v10389_v2, %v1379_v50  ;;  %v1382_v2 = vadd.f32 %v10307_v7, %v10235_v31 }
 0x215   : > { %7470 = vmatmul.msk.f32.vlgmr.msra.gmra.mxu1 %vm215_vm1, %v7462_v3  ;;  %2753 = vmatpush.msra.mxu3 %v2690_v24  ;;  %v10491_v3 = vpop.permute.xlu2 %8385 }
 0x216   : > { %7475 = vmatmul.msk.f32.gmra.mxu2 %vm215_vm1, %v7463_v14  ;;  %2869 = vmatpush.msra.mxu1 %v2834_v28  ;;  %v8387_v20 = vunpack.i.l.bf16 %v10491_v3  ;;  %v8388_v24 = vunpack.i.h.bf16 %v10491_v3  ;;  %v1521_v41 = vadd.f32 %v10414_v11, %v1382_v2 }
 0x217   : > { %v1612_v42 = vpop.f32.mrf.mxu3  ;;  %2754 = vmatpush.msra.mxu3 %v2687_v27  ;;  %2783 = vmatpush.msra.mxu0 %v2688_v44 }
 0x218   : > { %v1654_v36 = vadd.f32 %v1612_v42, %v1515_v8  ;;  %v10493_v40 = vpop.f32.mrf.mxu0  ;;  %v2831_v29 = vsel %vm2830_vm7, %v8398_v49, %v8387_v20  ;;  %v2832_v32 = vsel %vm2830_vm7, %v8387_v20, %v8388_v24 }
 0x219   : > { %v1754_v23 = vpop.f32.mrf.mxu2  ;;  %2870 = vmatpush.msra.mxu1 %v2831_v29  ;;  %2899 = vmatpush.msra.mxu2 %v2832_v32 }
 0x21a   : > { %v10495_v15 = vpop.f32.mrf.mxu1  ;;  %v10497_v25 = vadd.f32 %v1751_v1, %v1654_v36  ;;  %v1524_v36 = vadd.f32 %v10440_v48, %v1385_v4 }
 0x21b   : > { %7467 = vmatmul.msk.f32.gmra.mxu0 %vm215_vm1, %v7463_v14 }
 0x21c   : > { %7459 = vmatmul.msk.f32.gmra.mxu3 %vm215_vm1, %v10365_v47  ;;  %v7465_v47 = vld [vmem:[%s13002_s1 + $0x218] sm:$0xff] }
 0x21d   : > { %7471 = vmatmul.msk.f32.gmra.mxu1 %vm215_vm1, %v7463_v14  ;;  %v8401_v27 = vpop.permute.xlu2 %8400 }
 0x21e   : > { %7476 = vmatmul.msk.f32.gmra.mxu2 %vm215_vm1, %v7464_v21  ;;  %v8402_v42 = vunpack.i.l.bf16 %v8401_v27  ;;  %v8403_v49 = vunpack.i.h.bf16 %v8401_v27 }
 0x21f   : > { %v1615_v13 = vpop.f32.mrf.mxu3 }
 0x220   : > { %v1657_v54 = vadd.f32 %v1615_v13, %v1518_v12  ;;  %v10513_v1 = vpop.f32.mrf.mxu0  ;;  %v2836_v48 = vsel %vm2830_vm7, %v8383_v34, %v8402_v42  ;;  %v2833_v53 = vsel %vm2830_vm7, %v8388_v24, %v8403_v49  ;;  %v7479_v24 = vld [vmem:[%s13002_s1 + $0x228] sm:$0xff]  ;;  %v1519_v42 = vadd.f32 %v10391_v22, %v10309_v51  ;;  %v7480_v51 = vld [vmem:[%s13002_s1 + $0x230] sm:$0xff] }
 0x221   : > { %v1757_v14 = vpop.f32.mrf.mxu2  ;;  %vm4570_vm7 = vcmask 302080  }
 0x222   : > { %v10515_v59 = vpop.f32.mrf.mxu1  ;;  %v10517_v61 = vadd.f32 %v1754_v23, %v1657_v54  ;;  %v8406_v23 = vpop.permute.xlu0 %8405  ;;  %v10566_v54 = vld [vmem:[%s13002_s1 + $0x248] sm:$0xff] }
 0x223   : > { %7468 = vmatmul.msk.f32.gmra.mxu0 %vm215_vm1, %v7464_v21  ;;  %v8408_v12 = vunpack.i.h.bf16 %v8406_v23  ;;  %v8407_v13 = vunpack.i.l.bf16 %v8406_v23 }
 0x224   : > { %7460 = vmatmul.msk.f32.gmra.mxu3 %vm215_vm1, %v10398_v46  ;;  %v10540_v46 = vld [vmem:[%s13002_s1 + $0x240] sm:$0xff] }
 0x225   : > { %7472 = vmatmul.msk.f32.gmra.mxu1 %vm215_vm1, %v7464_v21  ;;  %v8416_v21 = vpop.permute.xlu2 %8415 }
 0x226   : > { %7477 = vmatmul.msk.f32.gmra.mxu2 %vm215_vm1, %v7465_v47  ;;  %v8418_v29 = vunpack.i.h.bf16 %v8416_v21  ;;  %v8417_v32 = vunpack.i.l.bf16 %v8416_v21  ;;  %v8411_v21 = vpop.permute.xlu1 %8410 }
 0x227   : > { %v1618_v44 = vpop.f32.mrf.mxu3  ;;  %v8413_v22 = vunpack.i.h.bf16 %v8411_v21  ;;  %v8412_v23 = vunpack.i.l.bf16 %v8411_v21 }
 0x228   : > { %v1660_v8 = vadd.f32 %v1618_v44, %v1521_v41  ;;  %v10531_v28 = vpop.f32.mrf.mxu0  ;;  %v2980_v41 = vsel %vm2975_vm8, %v8418_v29, %v8407_v13 }
 0x229   : > { %v1760_v11 = vpop.f32.mrf.mxu2 }
 0x22a   : > { %v10533_v31 = vpop.f32.mrf.mxu1  ;;  %v10535_v7 = vadd.f32 %v1757_v14, %v1660_v8  ;;  %v1516_v14 = vadd.f32 %v10356_v26, %v10286_v58  ;;  %v2981_v58 = vsel %vm2975_vm8, %v8407_v13, %v8408_v12  ;;  %v10591_v8 = vld [vmem:[%s13002_s1 + $0x250] sm:$0xff]  ;;  %v8421_v4 = vpop.permute.xlu0 %8420 }
 0x22b   : > { %7469 = vmatmul.msk.f32.gmra.mxu0 %vm215_vm1, %v7465_v47 }
 0x22c   : > { %7461 = vmatmul.msk.f32.gmra.mxu3 %vm215_vm1, %v10423_v60  ;;  %v1655_v34 = vadd.f32 %v10466_v30, %v1516_v14  ;;  %v1522_v14 = vadd.f32 %v10416_v6, %v10335_v52  ;;  %v8422_v6 = vunpack.i.l.bf16 %v8421_v4 }
 0x22d   : > { %7473 = vmatmul.msk.f32.gmra.mxu1 %vm215_vm1, %v7465_v47 }
 0x22e   : > { %7498 = vmatmul.msk.f32.vlgmr.msrb.gmra.mxu2 %vm215_vm1, %v10540_v46 }
 0x22f   : > { %v1621_v3 = vpop.f32.mrf.mxu3  ;;  %3072 = vmatpush.msrb.mxu2 %v2981_v58 }
 0x230   : > { %v1663_v20 = vadd.f32 %v1621_v3, %v1524_v36  ;;  %v10556_v60 = vpop.f32.mrf.mxu0  ;;  %v2979_v36 = vsel %vm2975_vm8, %v8417_v32, %v8418_v29  ;;  %v1658_v3 = vadd.f32 %v10493_v40, %v1519_v42  ;;  %v10614_v40 = vld [vmem:[%s13002_s1 + $0x258] sm:$0xff] }
 0x231   : > { %v1919_v47 = vpop.f32.mrf.mxu2 }
 0x232   : > { %v10554_v33 = vadd.f32 %v1760_v11, %v1663_v20  ;;  %v10558_v50 = vpop.f32.mrf.mxu1 }
 0x233   : > { %7486 = vmatmul.msk.f32.vlgmr.msrb.gmra.mxu0 %vm215_vm1, %v7478_v5 }
 0x234   : > { %7482 = vmatmul.msk.f32.vlgmr.msrb.gmra.mxu3 %vm215_vm1, %v7478_v5  ;;  %3014 = vmatpush.msrb.mxu0 %v2979_v36  ;;  %v1525_v36 = vadd.f32 %v10442_v18, %v10360_v9 }
 0x235   : > { %7490 = vmatmul.msk.f32.vlgmr.msrb.gmra.mxu1 %vm215_vm1, %v7478_v5  ;;  %2927 = vmatpush.msrb.mxu3 %v2836_v48  ;;  %v8423_v5 = vunpack.i.h.bf16 %v8421_v4 }
 0x236   : > { %7499 = vmatmul.msk.f32.gmra.mxu2 %vm215_vm1, %v10566_v54  ;;  %3043 = vmatpush.msrb.mxu1 %v2980_v41  ;;  %v2978_v41 = vsel %vm2975_vm8, %v8412_v23, %v8413_v22 }
 0x237   : > { %v1780_v2 = vpop.f32.mrf.mxu3  ;;  %2928 = vmatpush.msrb.mxu3 %v2833_v53  ;;  %v10621_v53 = vpop.permute.xlu0 %8435  ;;  %3073 = vmatpush.msrb.mxu2 %v2978_v41  ;;  %v2976_v4 = vsel %vm2975_vm8, %v8422_v6, %v8423_v5 }
 0x238   : > { %v1794_v26 = vadd.f32 %v1780_v2, %v1655_v34  ;;  %v10582_v27 = vpop.f32.mrf.mxu0  ;;  %v1661_v34 = vadd.f32 %v10513_v1, %v1522_v14  ;;  %v2977_v2 = vsel %vm2975_vm8, %v8423_v5, %v8412_v23  ;;  %3015 = vmatpush.msrb.mxu0 %v2976_v4  ;;  %v8438_v41 = vunpack.i.h.bf16 %v10621_v53 }
 0x239   : > { %v1922_v11 = vpop.f32.mrf.mxu2  ;;  %3044 = vmatpush.msrb.mxu1 %v2977_v2  ;;  %vm4715_vm8 = vcmask 293888  }
 0x23a   : > { %v10584_v30 = vpop.f32.mrf.mxu1  ;;  %v10586_v44 = vadd.f32 %v1919_v47, %v1794_v26  ;;  %v8431_v47 = vpop.permute.xlu2 %8430  ;;  %v7481_v26 = vld [vmem:[%s13002_s1 + $0x238] sm:$0xff] }
 0x23b   : > { %7487 = vmatmul.msk.f32.gmra.mxu0 %vm215_vm1, %v7479_v24  ;;  %v8432_v14 = vunpack.i.l.bf16 %v8431_v47 }
 0x23c   : > { %7483 = vmatmul.msk.f32.gmra.mxu3 %vm215_vm1, %v7479_v24 }
 0x23d   : > { %7491 = vmatmul.msk.f32.gmra.mxu1 %vm215_vm1, %v7479_v24 }
 0x23e   : > { %7500 = vmatmul.msk.f32.gmra.mxu2 %vm215_vm1, %v10591_v8 }
 0x23f   : > { %v1783_v49 = vpop.f32.mrf.mxu3  ;;  %v10651_v18 = vpop.permute.xlu0 %8450 }
 0x240   : > { %v1797_v20 = vadd.f32 %v1783_v49, %v1658_v3  ;;  %v10605_v48 = vpop.f32.mrf.mxu0  ;;  %v1664_v49 = vadd.f32 %v10531_v28, %v1525_v36 }
 0x241   : > { %v1925_v13 = vpop.f32.mrf.mxu2 }
 0x242   : > { %v10607_v12 = vpop.f32.mrf.mxu1  ;;  %v10609_v29 = vadd.f32 %v1922_v11, %v1797_v20  ;;  %v10640_v11 = vld [vmem:[%s13002_s1 + $0x260] sm:$0xff]  ;;  %v8446_v3 = vpop.permute.xlu2 %8445 }
 0x243   : > { %7488 = vmatmul.msk.f32.gmra.mxu0 %vm215_vm1, %v7480_v51  ;;  %v8426_v20 = vpop.permute.xlu1 %8425 }
 0x244   : > { %7484 = vmatmul.msk.f32.gmra.mxu3 %vm215_vm1, %v7480_v51  ;;  %v8428_v22 = vunpack.i.h.bf16 %v8426_v20  ;;  %v8427_v9 = vunpack.i.l.bf16 %v8426_v20  ;;  %v8448_v20 = vunpack.i.h.bf16 %v8446_v3 }
 0x245   : > { %7492 = vmatmul.msk.f32.gmra.mxu1 %vm215_vm1, %v7480_v51  ;;  %v8447_v51 = vunpack.i.l.bf16 %v8446_v3 }
 0x246   : > { %7501 = vmatmul.msk.f32.gmra.mxu2 %vm215_vm1, %v10614_v40 }
 0x247   : > { %v1786_v58 = vpop.f32.mrf.mxu3  ;;  %v3126_v3 = vsel %vm3120_vm9, %v8447_v51, %v8448_v20 }
 0x248   : > { %v1800_v52 = vadd.f32 %v1786_v58, %v1661_v34  ;;  %v10631_v32 = vpop.f32.mrf.mxu0  ;;  %v8452_v34 = vunpack.i.l.bf16 %v10651_v18  ;;  %v8437_v58 = vunpack.i.l.bf16 %v10621_v53 }
 0x249   : > { %v1928_v42 = vpop.f32.mrf.mxu2 }
 0x24a   : > { %v10633_v24 = vpop.f32.mrf.mxu1  ;;  %v10635_v1 = vadd.f32 %v1925_v13, %v1800_v52  ;;  %v8433_v13 = vunpack.i.h.bf16 %v8431_v47  ;;  %v10665_v52 = vld [vmem:[%s13002_s1 + $0x268] sm:$0xff]  ;;  %v1792_v47 = vadd.f32 %v10468_v38, %v10393_v16  ;;  %v3269_v4 = vsel %vm3265_vm10, %v8437_v58, %v8438_v41 }
 0x24b   : > { %7489 = vmatmul.msk.f32.gmra.mxu0 %vm215_vm1, %v7481_v26 }
 0x24c   : > { %7485 = vmatmul.msk.f32.gmra.mxu3 %vm215_vm1, %v7481_v26  ;;  %v3121_v36 = vsel %vm3120_vm9, %v8432_v14, %v8433_v13  ;;  %v3122_v16 = vsel %vm3120_vm9, %v8433_v13, %v8452_v34  ;;  %v1931_v38 = vadd.f32 %v10556_v60, %v1792_v47  ;;  %v1795_v14 = vadd.f32 %v10495_v15, %v10418_v10 }
 0x24d   : > { %7493 = vmatmul.msk.f32.gmra.mxu1 %vm215_vm1, %v7481_v26  ;;  %v3124_v26 = vsel %vm3120_vm9, %v8427_v9, %v8428_v22 }
 0x24e   : > { %7518 = vmatmul.msk.f32.vlgmr.msra.gmra.mxu2 %vm215_vm1, %v10640_v11  ;;  %v1934_v58 = vadd.f32 %v10582_v27, %v1795_v14  ;;  %v10723_v27 = vld [vmem:[%s13002_s1 + $0x278] sm:$0xff]  ;;  %v1801_v14 = vadd.f32 %v10533_v31, %v10464_v0 }
 0x24f   : > { %v1789_v21 = vpop.f32.mrf.mxu3  ;;  %3304 = vmatpush.msra.mxu2 %v3269_v4  ;;  %v10737_v4 = vpop.permute.xlu2 %8460 }
 0x250   : > { %v1803_v23 = vadd.f32 %v1789_v21, %v1664_v49  ;;  %v10656_v2 = vpop.f32.mrf.mxu0  ;;  %v10687_v21 = vpop.permute.xlu1 %8440 }
 0x251   : > { %v2147_v6 = vpop.f32.mrf.mxu2  ;;  %v8443_v10 = vunpack.i.h.bf16 %v10687_v21  ;;  %v8442_v15 = vunpack.i.l.bf16 %v10687_v21 }
 0x252   : > { %v10654_v5 = vadd.f32 %v1928_v42, %v1803_v23  ;;  %v10658_v28 = vpop.f32.mrf.mxu1  ;;  %v3125_v42 = vsel %vm3120_vm9, %v8428_v22, %v8447_v51  ;;  %v10698_v23 = vld [vmem:[%s13002_s1 + $0x270] sm:$0xff] }
 0x253   : > { %7506 = vmatmul.msk.f32.vlgmr.msra.gmra.mxu0 %vm215_vm1, %v10540_v46 }
 0x254   : > { %7502 = vmatmul.msk.f32.vlgmr.msra.gmra.mxu3 %vm215_vm1, %v10540_v46  ;;  %3188 = vmatpush.msra.mxu0 %v3125_v42 }
 0x255   : > { %7514 = vmatmul.msk.f32.vlgmr.msra.gmra.mxu1 %vm215_vm1, %v10640_v11  ;;  %3159 = vmatpush.msra.mxu3 %v3124_v26 }
 0x256   : > { %7519 = vmatmul.msk.f32.gmra.mxu2 %vm215_vm1, %v10665_v52  ;;  %3189 = vmatpush.msra.mxu0 %v3122_v16  ;;  %v1798_v16 = vadd.f32 %v10515_v59, %v10444_v39  ;;  %v8453_v59 = vunpack.i.h.bf16 %v10651_v18 }
 0x257   : > { %v2000_v46 = vpop.f32.mrf.mxu3  ;;  %3160 = vmatpush.msra.mxu3 %v3121_v36  ;;  %3217 = vmatpush.msra.mxu1 %v3126_v3 }
 0x258   : > { %v2070_v49 = vadd.f32 %v2000_v46, %v1931_v38  ;;  %v10689_v22 = vpop.f32.mrf.mxu0  ;;  %v8456_v36 = vpop.permute.xlu1 %8455  ;;  %v1937_v38 = vadd.f32 %v10605_v48, %v1798_v16  ;;  %v3266_v46 = vsel %vm3265_vm10, %v8442_v15, %v8443_v10  ;;  %v7526_v48 = vld [vmem:[%s13002_s1 + $0x280] sm:$0xff]  ;;  %v3123_v3 = vsel %vm3120_vm9, %v8452_v34, %v8453_v59 }
 0x259   : > { %v2150_v13 = vpop.f32.mrf.mxu2  ;;  %3305 = vmatpush.msra.mxu2 %v3266_v46  ;;  %3218 = vmatpush.msra.mxu1 %v3123_v3  ;;  %v8458_v15 = vunpack.i.h.bf16 %v8456_v36  ;;  %v8476_v16 = vpop.permute.xlu2 %8475  ;;  %v8462_v46 = vunpack.i.l.bf16 %v10737_v4  ;;  %v1932_v3 = vadd.f32 %v10558_v50, %v10497_v25  ;;  %vm4860_vm9 = vcmask 285696  }
 0x25a   : > { %v10691_v60 = vpop.f32.mrf.mxu1  ;;  %v10693_v9 = vadd.f32 %v2147_v6, %v2070_v49  ;;  %v8477_v18 = vunpack.i.l.bf16 %v8476_v16 }
 0x25b   : > { %7507 = vmatmul.msk.f32.gmra.mxu0 %vm215_vm1, %v10566_v54 }
 0x25c   : > { %7503 = vmatmul.msk.f32.gmra.mxu3 %vm215_vm1, %v10566_v54  ;;  %v3414_v25 = vsel %vm3410_vm11, %v8477_v18, %v8462_v46 }
 0x25d   : > { %7515 = vmatmul.msk.f32.gmra.mxu1 %vm215_vm1, %v10665_v52 }
 0x25e   : > { %7520 = vmatmul.msk.f32.gmra.mxu2 %vm215_vm1, %v10698_v23 }
 0x25f   : > { %v2003_v6 = vpop.f32.mrf.mxu3 }
 0x260   : > { %v2073_v47 = vadd.f32 %v2003_v6, %v1934_v58  ;;  %v10714_v26 = vpop.f32.mrf.mxu0  ;;  %v8457_v58 = vunpack.i.l.bf16 %v8456_v36  ;;  %v8471_v6 = vpop.permute.xlu1 %8470  ;;  %v7527_v36 = vld [vmem:[%s13002_s1 + $0x288] sm:$0xff] }
 0x261   : > { %v2153_v51 = vpop.f32.mrf.mxu2  ;;  %v8472_v0 = vunpack.i.l.bf16 %v8471_v6 }
 0x262   : > { %v10716_v54 = vpop.f32.mrf.mxu1  ;;  %v10718_v42 = vadd.f32 %v2150_v13, %v2073_v47  ;;  %v1940_v47 = vadd.f32 %v10631_v32, %v1801_v14  ;;  %v3270_v32 = vsel %vm3265_vm10, %v8438_v41, %v8457_v58  ;;  %v2071_v41 = vadd.f32 %v10656_v2, %v1932_v3 }
 0x263   : > { %7508 = vmatmul.msk.f32.gmra.mxu0 %vm215_vm1, %v10591_v8  ;;  %v3271_v14 = vsel %vm3265_vm10, %v8457_v58, %v8472_v0  ;;  %v10791_v58 = vpop.permute.xlu0 %8465 }
 0x264   : > { %7504 = vmatmul.msk.f32.gmra.mxu3 %vm215_vm1, %v10591_v8  ;;  %v8467_v0 = vunpack.i.l.bf16 %v10791_v58 }
 0x265   : > { %7516 = vmatmul.msk.f32.gmra.mxu1 %vm215_vm1, %v10698_v23 }
 0x266   : > { %7521 = vmatmul.msk.f32.gmra.mxu2 %vm215_vm1, %v10723_v27 }
 0x267   : > { %v2006_v49 = vpop.f32.mrf.mxu3 }
 0x268   : > { %v2076_v39 = vadd.f32 %v2006_v49, %v1937_v38  ;;  %v10740_v20 = vpop.f32.mrf.mxu0  ;;  %v8473_v38 = vunpack.i.h.bf16 %v8471_v6 }
 0x269   : > { %v2156_v13 = vpop.f32.mrf.mxu2 }
 0x26a   : > { %v10742_v8 = vpop.f32.mrf.mxu1  ;;  %v10744_v21 = vadd.f32 %v2153_v51, %v2076_v39  ;;  %v3268_v53 = vsel %vm3265_vm10, %v8458_v15, %v8473_v38 }
 0x26b   : > { %7509 = vmatmul.msk.f32.gmra.mxu0 %vm215_vm1, %v10614_v40 }
 0x26c   : > { %7505 = vmatmul.msk.f32.gmra.mxu3 %vm215_vm1, %v10614_v40  ;;  %v8463_v40 = vunpack.i.h.bf16 %v10737_v4 }
 0x26d   : > { %7517 = vmatmul.msk.f32.gmra.mxu1 %vm215_vm1, %v10723_v27 }
 0x26e   : > { %7538 = vmatmul.msk.f32.vlgmr.msrb.gmra.mxu2 %vm215_vm1, %v7526_v48  ;;  %v3415_v50 = vsel %vm3410_vm11, %v8462_v46, %v8463_v40 }
 0x26f   : > { %v2009_v31 = vpop.f32.mrf.mxu3  ;;  %3478 = vmatpush.msrb.mxu2 %v3415_v50  ;;  %v1941_v50 = vadd.f32 %v10633_v24, %v10554_v33  ;;  %v7542_v33 = vld [vmem:[%s13002_s1 + $0x2a0] sm:$0xff] }
 0x270   : > { %v2079_v51 = vadd.f32 %v2009_v31, %v1940_v47  ;;  %v10766_v34 = vpop.f32.mrf.mxu0  ;;  %v7528_v31 = vld [vmem:[%s13002_s1 + $0x290] sm:$0xff] }
 0x271   : > { %v2321_v59 = vpop.f32.mrf.mxu2 }
 0x272   : > { %v10764_v49 = vadd.f32 %v2156_v13, %v2079_v51  ;;  %v10768_v39 = vpop.f32.mrf.mxu1  ;;  %v3267_v13 = vsel %vm3265_vm10, %v8443_v10, %v8458_v15  ;;  %v1935_v51 = vadd.f32 %v10584_v30, %v10517_v61  ;;  %vm5005_vm10 = vcmask 277504  }
 0x273   : > { %7530 = vmatmul.msk.f32.vlgmr.msrb.gmra.mxu0 %vm215_vm1, %v7526_v48 }
 0x274   : > { %7522 = vmatmul.msk.f32.vlgmr.msrb.gmra.mxu3 %vm215_vm1, %v10640_v11  ;;  %3362 = vmatpush.msrb.mxu0 %v3271_v14  ;;  %v2074_v38 = vadd.f32 %v10689_v22, %v1935_v51  ;;  %v1938_v22 = vadd.f32 %v10607_v12, %v10535_v7 }
 0x275   : > { %7534 = vmatmul.msk.f32.vlgmr.msrb.gmra.mxu1 %vm215_vm1, %v7526_v48  ;;  %3333 = vmatpush.msrb.mxu3 %v3270_v32  ;;  %v8478_v48 = vunpack.i.h.bf16 %v8476_v16  ;;  %v8468_v32 = vunpack.i.h.bf16 %v10791_v58 }
 0x276   : > { %7539 = vmatmul.msk.f32.gmra.mxu2 %vm215_vm1, %v7527_v36  ;;  %3449 = vmatpush.msrb.mxu1 %v3414_v25  ;;  %v2077_v14 = vadd.f32 %v10714_v26, %v1938_v22 }
 0x277   : > { %v2176_v11 = vpop.f32.mrf.mxu3  ;;  %3334 = vmatpush.msrb.mxu3 %v3267_v13  ;;  %3363 = vmatpush.msrb.mxu0 %v3268_v53  ;;  %v3411_v16 = vsel %vm3410_vm11, %v8478_v48, %v8467_v0  ;;  %v3412_v3 = vsel %vm3410_vm11, %v8467_v0, %v8468_v32  ;;  %v8481_v13 = vpop.permute.xlu0 %8480 }
 0x278   : > { %v2218_v10 = vadd.f32 %v2176_v11, %v2071_v41  ;;  %v10793_v6 = vpop.f32.mrf.mxu0  ;;  %3450 = vmatpush.msrb.mxu1 %v3411_v16  ;;  %3479 = vmatpush.msrb.mxu2 %v3412_v3  ;;  %v8482_v11 = vunpack.i.l.bf16 %v8481_v13  ;;  %v8483_v58 = vunpack.i.h.bf16 %v8481_v13 }
 0x279   : > { %v2324_v15 = vpop.f32.mrf.mxu2 }
 0x27a   : > { %v10795_v2 = vpop.f32.mrf.mxu1  ;;  %v10797_v47 = vadd.f32 %v2321_v59, %v2218_v10  ;;  %v2080_v10 = vadd.f32 %v10740_v20, %v1941_v50  ;;  %v3416_v20 = vsel %vm3410_vm11, %v8463_v40, %v8482_v11  ;;  %v3413_v4 = vsel %vm3410_vm11, %v8468_v32, %v8483_v58  ;;  %v7543_v32 = vld [vmem:[%s13002_s1 + $0x2a8] sm:$0xff] }
 0x27b   : > { %7531 = vmatmul.msk.f32.gmra.mxu0 %vm215_vm1, %v7527_v36  ;;  %v2075_v11 = vadd.f32 %v10691_v60, %v10609_v29  ;;  %v7544_v29 = vld [vmem:[%s13002_s1 + $0x2b0] sm:$0xff]  ;;  %vm5150_vm11 = vcmask 146432  }
 0x27c   : > { %7523 = vmatmul.msk.f32.gmra.mxu3 %vm215_vm1, %v10665_v52  ;;  %v7529_v52 = vld [vmem:[%s13002_s1 + $0x298] sm:$0xff] }
 0x27d   : > { %7535 = vmatmul.msk.f32.gmra.mxu1 %vm215_vm1, %v7527_v36 }
 0x27e   : > { %7540 = vmatmul.msk.f32.gmra.mxu2 %vm215_vm1, %v7528_v31 }
 0x27f   : > { %v2179_v46 = vpop.f32.mrf.mxu3 }
 0x280   : > { %v2221_v18 = vadd.f32 %v2179_v46, %v2074_v38  ;;  %v10813_v59 = vpop.f32.mrf.mxu0 }
 0x281   : > { %v2327_v36 = vpop.f32.mrf.mxu2 }
 0x282   : > { %v10815_v61 = vpop.f32.mrf.mxu1  ;;  %v10817_v30 = vadd.f32 %v2324_v15, %v2221_v18  ;;  %v8496_v15 = vpop.permute.xlu0 %8495  ;;  %v10866_v18 = vld [vmem:[%s13002_s1 + $0x2c8] sm:$0xff] }
 0x283   : > { %7532 = vmatmul.msk.f32.gmra.mxu0 %vm215_vm1, %v7528_v31  ;;  %v8498_v46 = vunpack.i.h.bf16 %v8496_v15  ;;  %v8497_v3 = vunpack.i.l.bf16 %v8496_v15 }
 0x284   : > { %7524 = vmatmul.msk.f32.gmra.mxu3 %vm215_vm1, %v10698_v23  ;;  %v10840_v23 = vld [vmem:[%s13002_s1 + $0x2c0] sm:$0xff] }
 0x285   : > { %7536 = vmatmul.msk.f32.gmra.mxu1 %vm215_vm1, %v7528_v31  ;;  %v8486_v31 = vpop.permute.xlu1 %8485 }
 0x286   : > { %7541 = vmatmul.msk.f32.gmra.mxu2 %vm215_vm1, %v7529_v52  ;;  %v8488_v16 = vunpack.i.h.bf16 %v8486_v31  ;;  %v8487_v38 = vunpack.i.l.bf16 %v8486_v31  ;;  %v8491_v31 = vpop.permute.xlu2 %8490 }
 0x287   : > { %v2182_v53 = vpop.f32.mrf.mxu3  ;;  %v8493_v60 = vunpack.i.h.bf16 %v8491_v31  ;;  %v8492_v15 = vunpack.i.l.bf16 %v8491_v31 }
 0x288   : > { %v2224_v41 = vadd.f32 %v2182_v53, %v2077_v14  ;;  %v10831_v25 = vpop.f32.mrf.mxu0  ;;  %v3560_v14 = vsel %vm3555_vm12, %v8498_v46, %v8487_v38 }
 0x289   : > { %v2330_v26 = vpop.f32.mrf.mxu2 }
 0x28a   : > { %v10833_v7 = vpop.f32.mrf.mxu1  ;;  %v10835_v12 = vadd.f32 %v2327_v36, %v2224_v41  ;;  %v2072_v36 = vadd.f32 %v10658_v28, %v10586_v44  ;;  %v3561_v44 = vsel %vm3555_vm12, %v8487_v38, %v8488_v16  ;;  %v10891_v41 = vld [vmem:[%s13002_s1 + $0x2d0] sm:$0xff] }
 0x28b   : > { %7533 = vmatmul.msk.f32.gmra.mxu0 %vm215_vm1, %v7529_v52 }
 0x28c   : > { %7525 = vmatmul.msk.f32.gmra.mxu3 %vm215_vm1, %v10723_v27  ;;  %v2219_v40 = vadd.f32 %v10766_v34, %v2072_v36  ;;  %v8511_v36 = vpop.permute.xlu0 %8510 }
 0x28d   : > { %7537 = vmatmul.msk.f32.gmra.mxu1 %vm215_vm1, %v7529_v52  ;;  %v8501_v50 = vpop.permute.xlu1 %8500 }
 0x28e   : > { %7562 = vmatmul.msk.f32.vlgmr.msra.gmra.mxu2 %vm215_vm1, %v10840_v23 }
 0x28f   : > { %v2185_v48 = vpop.f32.mrf.mxu3  ;;  %3652 = vmatpush.msra.mxu2 %v3561_v44 }
 0x290   : > { %v2227_v0 = vadd.f32 %v2185_v48, %v2080_v10  ;;  %v10856_v27 = vpop.f32.mrf.mxu0  ;;  %v3559_v10 = vsel %vm3555_vm12, %v8497_v3, %v8498_v46  ;;  %v2222_v48 = vadd.f32 %v10793_v6, %v2075_v11  ;;  %v10914_v6 = vld [vmem:[%s13002_s1 + $0x2d8] sm:$0xff] }
 0x291   : > { %v2495_v52 = vpop.f32.mrf.mxu2 }
 0x292   : > { %v10854_v24 = vadd.f32 %v2330_v26, %v2227_v0  ;;  %v10858_v51 = vpop.f32.mrf.mxu1 }
 0x293   : > { %7550 = vmatmul.msk.f32.vlgmr.msra.gmra.mxu0 %vm215_vm1, %v7542_v33 }
 0x294   : > { %7546 = vmatmul.msk.f32.vlgmr.msra.gmra.mxu3 %vm215_vm1, %v7542_v33  ;;  %3594 = vmatpush.msra.mxu0 %v3559_v10  ;;  %v2081_v10 = vadd.f32 %v10742_v8, %v10654_v5 }
 0x295   : > { %7554 = vmatmul.msk.f32.vlgmr.msra.gmra.mxu1 %vm215_vm1, %v7542_v33  ;;  %3507 = vmatpush.msra.mxu3 %v3416_v20  ;;  %v8503_v33 = vunpack.i.h.bf16 %v8501_v50 }
 0x296   : > { %7563 = vmatmul.msk.f32.gmra.mxu2 %vm215_vm1, %v10866_v18  ;;  %3623 = vmatpush.msra.mxu1 %v3560_v14  ;;  %v3558_v14 = vsel %vm3555_vm12, %v8492_v15, %v8493_v60 }
 0x297   : > { %v2350_v22 = vpop.f32.mrf.mxu3  ;;  %3508 = vmatpush.msra.mxu3 %v3413_v4  ;;  %v10921_v4 = vpop.permute.xlu1 %8515  ;;  %3653 = vmatpush.msra.mxu2 %v3558_v14 }
 0x298   : > { %v2364_v28 = vadd.f32 %v2350_v22, %v2219_v40  ;;  %v10882_v13 = vpop.f32.mrf.mxu0  ;;  %v3557_v22 = vsel %vm3555_vm12, %v8503_v33, %v8492_v15  ;;  %v8518_v14 = vunpack.i.h.bf16 %v10921_v4 }
 0x299   : > { %v2498_v26 = vpop.f32.mrf.mxu2  ;;  %3624 = vmatpush.msra.mxu1 %v3557_v22 }
 0x29a   : > { %v10884_v34 = vpop.f32.mrf.mxu1  ;;  %v10886_v53 = vadd.f32 %v2495_v52, %v2364_v28  ;;  %v2078_v52 = vadd.f32 %v10716_v54, %v10635_v1  ;;  %v8502_v54 = vunpack.i.l.bf16 %v8501_v50  ;;  %v7545_v28 = vld [vmem:[%s13002_s1 + $0x2b8] sm:$0xff] }
 0x29b   : > { %7551 = vmatmul.msk.f32.gmra.mxu0 %vm215_vm1, %v7543_v32 }
 0x29c   : > { %7547 = vmatmul.msk.f32.gmra.mxu3 %vm215_vm1, %v7543_v32  ;;  %v2225_v40 = vadd.f32 %v10813_v59, %v2078_v52  ;;  %v3556_v50 = vsel %vm3555_vm12, %v8502_v54, %v8503_v33  ;;  %v8512_v52 = vunpack.i.l.bf16 %v8511_v36  ;;  %vm5295_vm12 = vcmask 138240  }
 0x29d   : > { %7555 = vmatmul.msk.f32.gmra.mxu1 %vm215_vm1, %v7543_v32  ;;  %3595 = vmatpush.msra.mxu0 %v3556_v50 }
 0x29e   : > { %7564 = vmatmul.msk.f32.gmra.mxu2 %vm215_vm1, %v10891_v41 }
 0x29f   : > { %v2353_v58 = vpop.f32.mrf.mxu3  ;;  %v10951_v5 = vpop.permute.xlu1 %8530 }
 0x2a0   : > { %v2367_v0 = vadd.f32 %v2353_v58, %v2222_v48  ;;  %v10905_v20 = vpop.f32.mrf.mxu0  ;;  %v8506_v48 = vpop.permute.xlu2 %8505  ;;  %v2228_v58 = vadd.f32 %v10831_v25, %v2081_v10 }
 0x2a1   : > { %v2501_v46 = vpop.f32.mrf.mxu2  ;;  %v8507_v60 = vunpack.i.l.bf16 %v8506_v48 }
 0x2a2   : > { %v10907_v16 = vpop.f32.mrf.mxu1  ;;  %v10909_v38 = vadd.f32 %v2498_v26, %v2367_v0  ;;  %v10940_v26 = vld [vmem:[%s13002_s1 + $0x2e0] sm:$0xff]  ;;  %v8526_v0 = vpop.permute.xlu0 %8525 }
 0x2a3   : > { %7552 = vmatmul.msk.f32.gmra.mxu0 %vm215_vm1, %v7544_v29  ;;  %v8527_v8 = vunpack.i.l.bf16 %v8526_v0 }
 0x2a4   : > { %7548 = vmatmul.msk.f32.gmra.mxu3 %vm215_vm1, %v7544_v29 }
 0x2a5   : > { %7556 = vmatmul.msk.f32.gmra.mxu1 %vm215_vm1, %v7544_v29  ;;  %v8508_v29 = vunpack.i.h.bf16 %v8506_v48 }
 0x2a6   : > { %7565 = vmatmul.msk.f32.gmra.mxu2 %vm215_vm1, %v10914_v6 }
 0x2a7   : > { %v2356_v44 = vpop.f32.mrf.mxu3 }
 0x2a8   : > { %v2370_v1 = vadd.f32 %v2356_v44, %v2225_v40  ;;  %v10931_v3 = vpop.f32.mrf.mxu0  ;;  %v8532_v40 = vunpack.i.l.bf16 %v10951_v5  ;;  %v8517_v44 = vunpack.i.l.bf16 %v10921_v4 }
 0x2a9   : > { %v2504_v11 = vpop.f32.mrf.mxu2 }
 0x2aa   : > { %v10933_v32 = vpop.f32.mrf.mxu1  ;;  %v10935_v59 = vadd.f32 %v2501_v46, %v2370_v1  ;;  %v8513_v46 = vunpack.i.h.bf16 %v8511_v36  ;;  %v10965_v1 = vld [vmem:[%s13002_s1 + $0x2e8] sm:$0xff]  ;;  %v2362_v36 = vadd.f32 %v10768_v39, %v10693_v9  ;;  %v3849_v50 = vsel %vm3845_vm14, %v8517_v44, %v8518_v14 }
 0x2ab   : > { %7553 = vmatmul.msk.f32.gmra.mxu0 %vm215_vm1, %v7545_v28 }
 0x2ac   : > { %7549 = vmatmul.msk.f32.gmra.mxu3 %vm215_vm1, %v7545_v28  ;;  %v3701_v10 = vsel %vm3700_vm13, %v8512_v52, %v8513_v46  ;;  %v3702_v9 = vsel %vm3700_vm13, %v8513_v46, %v8532_v40  ;;  %v2507_v39 = vadd.f32 %v10856_v27, %v2362_v36  ;;  %v2365_v52 = vadd.f32 %v10795_v2, %v10718_v42 }
 0x2ad   : > { %7557 = vmatmul.msk.f32.gmra.mxu1 %vm215_vm1, %v7545_v28  ;;  %v3704_v28 = vsel %vm3700_vm13, %v8507_v60, %v8508_v29 }
 0x2ae   : > { %7582 = vmatmul.msk.f32.vlgmr.msrb.gmra.mxu2 %vm215_vm1, %v10940_v26  ;;  %v2510_v44 = vadd.f32 %v10882_v13, %v2365_v52  ;;  %v11023_v13 = vld [vmem:[%s13002_s1 + $0x2f8] sm:$0xff]  ;;  %v2371_v52 = vadd.f32 %v10833_v7, %v10764_v49 }
 0x2af   : > { %v2359_v31 = vpop.f32.mrf.mxu3  ;;  %3884 = vmatpush.msrb.mxu2 %v3849_v50  ;;  %v11037_v50 = vpop.permute.xlu0 %8540 }
 0x2b0   : > { %v2373_v15 = vadd.f32 %v2359_v31, %v2228_v58  ;;  %v10956_v22 = vpop.f32.mrf.mxu0  ;;  %v10987_v58 = vpop.permute.xlu2 %8520  ;;  %v8528_v31 = vunpack.i.h.bf16 %v8526_v0 }
 0x2b1   : > { %v2727_v54 = vpop.f32.mrf.mxu2  ;;  %v8523_v42 = vunpack.i.h.bf16 %v10987_v58  ;;  %v8522_v2 = vunpack.i.l.bf16 %v10987_v58 }
 0x2b2   : > { %v10954_v33 = vadd.f32 %v2504_v11, %v2373_v15  ;;  %v10958_v25 = vpop.f32.mrf.mxu1  ;;  %v3705_v11 = vsel %vm3700_vm13, %v8508_v29, %v8527_v8  ;;  %v10998_v15 = vld [vmem:[%s13002_s1 + $0x2f0] sm:$0xff]  ;;  %v3706_v0 = vsel %vm3700_vm13, %v8527_v8, %v8528_v31 }
 0x2b3   : > { %7570 = vmatmul.msk.f32.vlgmr.msrb.gmra.mxu0 %vm215_vm1, %v10840_v23 }
 0x2b4   : > { %7566 = vmatmul.msk.f32.vlgmr.msrb.gmra.mxu3 %vm215_vm1, %v10840_v23  ;;  %3768 = vmatpush.msrb.mxu0 %v3705_v11 }
 0x2b5   : > { %7578 = vmatmul.msk.f32.vlgmr.msrb.gmra.mxu1 %vm215_vm1, %v10940_v26  ;;  %3739 = vmatpush.msrb.mxu3 %v3704_v28 }
 0x2b6   : > { %7583 = vmatmul.msk.f32.gmra.mxu2 %vm215_vm1, %v10965_v1  ;;  %3769 = vmatpush.msrb.mxu0 %v3702_v9  ;;  %v2368_v9 = vadd.f32 %v10815_v61, %v10744_v21  ;;  %v8533_v61 = vunpack.i.h.bf16 %v10951_v5 }
 0x2b7   : > { %v2582_v23 = vpop.f32.mrf.mxu3  ;;  %3740 = vmatpush.msrb.mxu3 %v3701_v10  ;;  %3797 = vmatpush.msrb.mxu1 %v3706_v0 }
 0x2b8   : > { %v2652_v48 = vadd.f32 %v2582_v23, %v2507_v39  ;;  %v10989_v29 = vpop.f32.mrf.mxu0  ;;  %v8536_v10 = vpop.permute.xlu2 %8535  ;;  %v2513_v39 = vadd.f32 %v10905_v20, %v2368_v9  ;;  %v3846_v23 = vsel %vm3845_vm14, %v8522_v2, %v8523_v42  ;;  %v7590_v20 = vld [vmem:[%s13002_s1 + $0x300] sm:$0xff]  ;;  %v3703_v0 = vsel %vm3700_vm13, %v8532_v40, %v8533_v61 }
 0x2b9   : > { %v2730_v46 = vpop.f32.mrf.mxu2  ;;  %3885 = vmatpush.msrb.mxu2 %v3846_v23  ;;  %3798 = vmatpush.msrb.mxu1 %v3703_v0  ;;  %v8538_v2 = vunpack.i.h.bf16 %v8536_v10  ;;  %v8542_v23 = vunpack.i.l.bf16 %v11037_v50  ;;  %v2508_v0 = vadd.f32 %v10858_v51, %v10797_v47  ;;  %vm5584_vm13 = vcmask 121856  }
 0x2ba   : > { %v10991_v27 = vpop.f32.mrf.mxu1  ;;  %v10993_v60 = vadd.f32 %v2727_v54, %v2652_v48 }
 0x2bb   : > { %7571 = vmatmul.msk.f32.gmra.mxu0 %vm215_vm1, %v10866_v18 }
 0x2bc   : > { %7567 = vmatmul.msk.f32.gmra.mxu3 %vm215_vm1, %v10866_v18 }
 0x2bd   : > { %7579 = vmatmul.msk.f32.gmra.mxu1 %vm215_vm1, %v10965_v1 }
 0x2be   : > { %7584 = vmatmul.msk.f32.gmra.mxu2 %vm215_vm1, %v10998_v15 }
 0x2bf   : > { %v2585_v54 = vpop.f32.mrf.mxu3 }
 0x2c0   : > { %v2655_v36 = vadd.f32 %v2585_v54, %v2510_v44  ;;  %v11014_v28 = vpop.f32.mrf.mxu0  ;;  %v8537_v44 = vunpack.i.l.bf16 %v8536_v10  ;;  %v8551_v54 = vpop.permute.xlu2 %8550  ;;  %v7591_v10 = vld [vmem:[%s13002_s1 + $0x308] sm:$0xff] }
 0x2c1   : > { %v2733_v8 = vpop.f32.mrf.mxu2  ;;  %v8552_v49 = vunpack.i.l.bf16 %v8551_v54  ;;  %v8553_v9 = vunpack.i.h.bf16 %v8551_v54 }
 0x2c2   : > { %v11016_v18 = vpop.f32.mrf.mxu1  ;;  %v11018_v11 = vadd.f32 %v2730_v46, %v2655_v36  ;;  %v2516_v36 = vadd.f32 %v10931_v3, %v2371_v52  ;;  %v3850_v3 = vsel %vm3845_vm14, %v8518_v14, %v8537_v44  ;;  %v2653_v14 = vadd.f32 %v10956_v22, %v2508_v0 }
 0x2c3   : > { %7572 = vmatmul.msk.f32.gmra.mxu0 %vm215_vm1, %v10891_v41  ;;  %v3851_v52 = vsel %vm3845_vm14, %v8537_v44, %v8552_v49  ;;  %v3848_v4 = vsel %vm3845_vm14, %v8538_v2, %v8553_v9 }
 0x2c4   : > { %7568 = vmatmul.msk.f32.gmra.mxu3 %vm215_vm1, %v10891_v41 }
 0x2c5   : > { %7580 = vmatmul.msk.f32.gmra.mxu1 %vm215_vm1, %v10998_v15 }
 0x2c6   : > { %7585 = vmatmul.msk.f32.gmra.mxu2 %vm215_vm1, %v11023_v13 }
 0x2c7   : > { %v2588_v48 = vpop.f32.mrf.mxu3 }
 0x2c8   : > { %v2658_v21 = vadd.f32 %v2588_v48, %v2513_v39  ;;  %v11040_v58 = vpop.f32.mrf.mxu0  ;;  %v8556_v39 = vpop.permute.xlu0 %8555 }
 0x2c9   : > { %v2736_v46 = vpop.f32.mrf.mxu2  ;;  %v8557_v5 = vunpack.i.l.bf16 %v8556_v39  ;;  %v8558_v44 = vunpack.i.h.bf16 %v8556_v39 }
 0x2ca   : > { %v11042_v41 = vpop.f32.mrf.mxu1  ;;  %v11044_v31 = vadd.f32 %v2733_v8, %v2658_v21 }
 0x2cb   : > { %7573 = vmatmul.msk.f32.gmra.mxu0 %vm215_vm1, %v10914_v6  ;;  %v3994_v47 = vsel %vm3990_vm15, %v8557_v5, %v8542_v23 }
 0x2cc   : > { %7569 = vmatmul.msk.f32.gmra.mxu3 %vm215_vm1, %v10914_v6  ;;  %v8543_v6 = vunpack.i.h.bf16 %v11037_v50 }
 0x2cd   : > { %7581 = vmatmul.msk.f32.gmra.mxu1 %vm215_vm1, %v11023_v13 }
 0x2ce   : > { %7602 = vmatmul.msk.f32.vlgmr.msra.gmra.mxu2 %vm215_vm1, %v7590_v20  ;;  %v3995_v51 = vsel %vm3990_vm15, %v8542_v23, %v8543_v6 }
 0x2cf   : > { %v2591_v7 = vpop.f32.mrf.mxu3  ;;  %4058 = vmatpush.msra.mxu2 %v3995_v51  ;;  %v2517_v51 = vadd.f32 %v10933_v32, %v10854_v24  ;;  %v7606_v24 = vld [vmem:[%s13002_s1 + $0x320] sm:$0xff] }
 0x2d0   : > { %v2661_v8 = vadd.f32 %v2591_v7, %v2516_v36  ;;  %v11066_v40 = vpop.f32.mrf.mxu0  ;;  %v7592_v7 = vld [vmem:[%s13002_s1 + $0x310] sm:$0xff] }
 0x2d1   : > { %v2901_v61 = vpop.f32.mrf.mxu2 }
 0x2d2   : > { %v11064_v48 = vadd.f32 %v2736_v46, %v2661_v8  ;;  %v11068_v21 = vpop.f32.mrf.mxu1  ;;  %v3847_v46 = vsel %vm3845_vm14, %v8523_v42, %v8538_v2  ;;  %v2511_v8 = vadd.f32 %v10884_v34, %v10817_v30  ;;  %vm5729_vm14 = vcmask 113664  }
 0x2d3   : > { %7594 = vmatmul.msk.f32.vlgmr.msra.gmra.mxu0 %vm215_vm1, %v7590_v20 }
 0x2d4   : > { %7586 = vmatmul.msk.f32.vlgmr.msra.gmra.mxu3 %vm215_vm1, %v10940_v26  ;;  %3942 = vmatpush.msra.mxu0 %v3851_v52  ;;  %v2656_v39 = vadd.f32 %v10989_v29, %v2511_v8  ;;  %v2514_v29 = vadd.f32 %v10907_v16, %v10835_v12 }
 0x2d5   : > { %7598 = vmatmul.msk.f32.vlgmr.msra.gmra.mxu1 %vm215_vm1, %v7590_v20  ;;  %3913 = vmatpush.msra.mxu3 %v3850_v3  ;;  %v11091_v20 = vpop.permute.xlu1 %8545 }
 0x2d6   : > { %7603 = vmatmul.msk.f32.gmra.mxu2 %vm215_vm1, %v7591_v10  ;;  %4029 = vmatpush.msra.mxu1 %v3994_v47  ;;  %v8547_v49 = vunpack.i.l.bf16 %v11091_v20  ;;  %v8548_v3 = vunpack.i.h.bf16 %v11091_v20  ;;  %v2659_v52 = vadd.f32 %v11014_v28, %v2514_v29 }
 0x2d7   : > { %v2756_v26 = vpop.f32.mrf.mxu3  ;;  %3914 = vmatpush.msra.mxu3 %v3847_v46  ;;  %3943 = vmatpush.msra.mxu0 %v3848_v4 }
 0x2d8   : > { %v2798_v42 = vadd.f32 %v2756_v26, %v2653_v14  ;;  %v11093_v54 = vpop.f32.mrf.mxu0  ;;  %v3991_v9 = vsel %vm3990_vm15, %v8558_v44, %v8547_v49  ;;  %v3992_v0 = vsel %vm3990_vm15, %v8547_v49, %v8548_v3 }
 0x2d9   : > { %v2904_v2 = vpop.f32.mrf.mxu2  ;;  %4030 = vmatpush.msra.mxu1 %v3991_v9  ;;  %4059 = vmatpush.msra.mxu2 %v3992_v0 }
 0x2da   : > { %v11095_v22 = vpop.f32.mrf.mxu1  ;;  %v11097_v36 = vadd.f32 %v2901_v61, %v2798_v42  ;;  %v2662_v42 = vadd.f32 %v11040_v58, %v2517_v51 }
 0x2db   : > { %7595 = vmatmul.msk.f32.gmra.mxu0 %vm215_vm1, %v7591_v10 }
 0x2dc   : > { %7587 = vmatmul.msk.f32.gmra.mxu3 %vm215_vm1, %v10965_v1  ;;  %v7593_v1 = vld [vmem:[%s13002_s1 + $0x318] sm:$0xff] }
 0x2dd   : > { %7599 = vmatmul.msk.f32.gmra.mxu1 %vm215_vm1, %v7591_v10  ;;  %v8561_v46 = vpop.permute.xlu1 %8560 }
 0x2de   : > { %7604 = vmatmul.msk.f32.gmra.mxu2 %vm215_vm1, %v7592_v7  ;;  %v8562_v26 = vunpack.i.l.bf16 %v8561_v46  ;;  %v8563_v44 = vunpack.i.h.bf16 %v8561_v46 }
 0x2df   : > { %v2759_v23 = vpop.f32.mrf.mxu3 }
 0x2e0   : > { %v2801_v5 = vadd.f32 %v2759_v23, %v2656_v39  ;;  %v11113_v61 = vpop.f32.mrf.mxu0  ;;  %v3996_v58 = vsel %vm3990_vm15, %v8543_v6, %v8562_v26  ;;  %v3993_v50 = vsel %vm3990_vm15, %v8548_v3, %v8563_v44  ;;  %v7607_v3 = vld [vmem:[%s13002_s1 + $0x328] sm:$0xff]  ;;  %v2657_v26 = vadd.f32 %v10991_v27, %v10909_v38  ;;  %v7608_v38 = vld [vmem:[%s13002_s1 + $0x330] sm:$0xff] }
 0x2e1   : > { %v2907_v10 = vpop.f32.mrf.mxu2  ;;  %vm5874_vm15 = vcmask 105472  }
 0x2e2   : > { %v11115_v30 = vpop.f32.mrf.mxu1  ;;  %v11117_v34 = vadd.f32 %v2904_v2, %v2801_v5  ;;  %v11166_v5 = vld [vmem:[%s13002_s1 + $0x348] sm:$0xff] }
 0x2e3   : > { %7596 = vmatmul.msk.f32.gmra.mxu0 %vm215_vm1, %v7592_v7 }
 0x2e4   : > { %7588 = vmatmul.msk.f32.gmra.mxu3 %vm215_vm1, %v10998_v15  ;;  %v11140_v15 = vld [vmem:[%s13002_s1 + $0x340] sm:$0xff] }
 0x2e5   : > { %7600 = vmatmul.msk.f32.gmra.mxu1 %vm215_vm1, %v7592_v7  ;;  %v8566_v7 = vpop.permute.xlu2 %8565  ;;  %v8576_v2 = vpop.permute.xlu1 %8575 }
 0x2e6   : > { %7605 = vmatmul.msk.f32.gmra.mxu2 %vm215_vm1, %v7593_v1  ;;  %v8568_v9 = vunpack.i.h.bf16 %v8566_v7  ;;  %v8567_v39 = vunpack.i.l.bf16 %v8566_v7  ;;  %v8578_v23 = vunpack.i.h.bf16 %v8576_v2  ;;  %v8577_v0 = vunpack.i.l.bf16 %v8576_v2  ;;  %v8571_v7 = vpop.permute.xlu0 %8570 }
 0x2e7   : > { %v2762_v4 = vpop.f32.mrf.mxu3  ;;  %v8573_v2 = vunpack.i.h.bf16 %v8571_v7 }
 0x2e8   : > { %v2804_v14 = vadd.f32 %v2762_v4, %v2659_v52  ;;  %v11131_v47 = vpop.f32.mrf.mxu0  ;;  %v4140_v52 = vsel %vm4135_vm0, %v8578_v23, %v8567_v39 }
 0x2e9   : > { %v2910_v28 = vpop.f32.mrf.mxu2 }
 0x2ea   : > { %v11133_v12 = vpop.f32.mrf.mxu1  ;;  %v11135_v16 = vadd.f32 %v2907_v10, %v2804_v14  ;;  %v2654_v10 = vadd.f32 %v10958_v25, %v10886_v53  ;;  %v4141_v53 = vsel %vm4135_vm0, %v8567_v39, %v8568_v9  ;;  %v11191_v14 = vld [vmem:[%s13002_s1 + $0x350] sm:$0xff] }
 0x2eb   : > { %7597 = vmatmul.msk.f32.gmra.mxu0 %vm215_vm1, %v7593_v1 }
 0x2ec   : > { %7589 = vmatmul.msk.f32.gmra.mxu3 %vm215_vm1, %v11023_v13  ;;  %v2799_v6 = vadd.f32 %v11066_v40, %v2654_v10 }
 0x2ed   : > { %7601 = vmatmul.msk.f32.gmra.mxu1 %vm215_vm1, %v7593_v1  ;;  %v8581_v51 = vpop.permute.xlu2 %8580  ;;  %v8591_v10 = vpop.permute.xlu1 %8590 }
 0x2ee   : > { %7626 = vmatmul.msk.f32.vlgmr.msrb.gmra.mxu2 %vm215_vm1, %v11140_v15  ;;  %v8583_v27 = vunpack.i.h.bf16 %v8581_v51 }
 0x2ef   : > { %v2765_v20 = vpop.f32.mrf.mxu3  ;;  %4232 = vmatpush.msrb.mxu2 %v4141_v53 }
 0x2f0   : > { %v2807_v49 = vadd.f32 %v2765_v20, %v2662_v42  ;;  %v11156_v13 = vpop.f32.mrf.mxu0  ;;  %v4139_v42 = vsel %vm4135_vm0, %v8577_v0, %v8578_v23  ;;  %v2802_v20 = vadd.f32 %v11093_v54, %v2657_v26  ;;  %v11214_v54 = vld [vmem:[%s13002_s1 + $0x358] sm:$0xff] }
 0x2f1   : > { %v3075_v1 = vpop.f32.mrf.mxu2 }
 0x2f2   : > { %v11154_v32 = vadd.f32 %v2910_v28, %v2807_v49  ;;  %v11158_v8 = vpop.f32.mrf.mxu1 }
 0x2f3   : > { %7614 = vmatmul.msk.f32.vlgmr.msrb.gmra.mxu0 %vm215_vm1, %v7606_v24 }
 0x2f4   : > { %7610 = vmatmul.msk.f32.vlgmr.msrb.gmra.mxu3 %vm215_vm1, %v7606_v24  ;;  %4174 = vmatpush.msrb.mxu0 %v4139_v42  ;;  %v2663_v42 = vadd.f32 %v11042_v41, %v10954_v33 }
 0x2f5   : > { %7618 = vmatmul.msk.f32.vlgmr.msrb.gmra.mxu1 %vm215_vm1, %v7606_v24  ;;  %4087 = vmatpush.msrb.mxu3 %v3996_v58  ;;  %v8572_v24 = vunpack.i.l.bf16 %v8571_v7 }
 0x2f6   : > { %7627 = vmatmul.msk.f32.gmra.mxu2 %vm215_vm1, %v11166_v5  ;;  %4203 = vmatpush.msrb.mxu1 %v4140_v52 }
 0x2f7   : > { %v2930_v29 = vpop.f32.mrf.mxu3  ;;  %4088 = vmatpush.msrb.mxu3 %v3993_v50  ;;  %v11221_v50 = vpop.permute.xlu2 %8595  ;;  %v4138_v52 = vsel %vm4135_vm0, %v8572_v24, %v8573_v2 }
 0x2f8   : > { %v2944_v25 = vadd.f32 %v2930_v29, %v2799_v6  ;;  %v11182_v46 = vpop.f32.mrf.mxu0  ;;  %v4137_v29 = vsel %vm4135_vm0, %v8583_v27, %v8572_v24  ;;  %4233 = vmatpush.msrb.mxu2 %v4138_v52  ;;  %v8598_v52 = vunpack.i.h.bf16 %v11221_v50 }
 0x2f9   : > { %v3078_v28 = vpop.f32.mrf.mxu2  ;;  %4204 = vmatpush.msrb.mxu1 %v4137_v29 }
 0x2fa   : > { %v11184_v40 = vpop.f32.mrf.mxu1  ;;  %v11186_v4 = vadd.f32 %v3075_v1, %v2944_v25  ;;  %v2660_v1 = vadd.f32 %v11016_v18, %v10935_v59  ;;  %v8582_v18 = vunpack.i.l.bf16 %v8581_v51  ;;  %v7609_v25 = vld [vmem:[%s13002_s1 + $0x338] sm:$0xff] }
 0x2fb   : > { %7615 = vmatmul.msk.f32.gmra.mxu0 %vm215_vm1, %v7607_v3 }
 0x2fc   : > { %7611 = vmatmul.msk.f32.gmra.mxu3 %vm215_vm1, %v7607_v3  ;;  %v2805_v6 = vadd.f32 %v11113_v61, %v2660_v1  ;;  %v4136_v51 = vsel %vm4135_vm0, %v8582_v18, %v8583_v27  ;;  %v8593_v1 = vunpack.i.h.bf16 %v8591_v10  ;;  %vm6019_vm0 = vcmask 97280  }
 0x2fd   : > { %7619 = vmatmul.msk.f32.gmra.mxu1 %vm215_vm1, %v7607_v3  ;;  %4175 = vmatpush.msrb.mxu0 %v4136_v51 }
 0x2fe   : > { %7628 = vmatmul.msk.f32.gmra.mxu2 %vm215_vm1, %v11191_v14 }
 0x2ff   : > { %v2933_v44 = vpop.f32.mrf.mxu3 }
 0x300   : > { %v2947_v49 = vadd.f32 %v2933_v44, %v2802_v20  ;;  %v11205_v58 = vpop.f32.mrf.mxu0  ;;  %v8586_v20 = vpop.permute.xlu0 %8585  ;;  %v2808_v44 = vadd.f32 %v11131_v47, %v2663_v42 }
 0x301   : > { %v3081_v23 = vpop.f32.mrf.mxu2  ;;  %v8588_v33 = vunpack.i.h.bf16 %v8586_v20  ;;  %v8587_v41 = vunpack.i.l.bf16 %v8586_v20 }
 0x302   : > { %v11207_v9 = vpop.f32.mrf.mxu1  ;;  %v11209_v39 = vadd.f32 %v3078_v28, %v2947_v49  ;;  %v11240_v28 = vld [vmem:[%s13002_s1 + $0x360] sm:$0xff]  ;;  %v8606_v49 = vpop.permute.xlu1 %8605 }
 0x303   : > { %7616 = vmatmul.msk.f32.gmra.mxu0 %vm215_vm1, %v7608_v38  ;;  %v8607_v2 = vunpack.i.l.bf16 %v8606_v49 }
 0x304   : > { %7612 = vmatmul.msk.f32.gmra.mxu3 %vm215_vm1, %v7608_v38 }
 0x305   : > { %7620 = vmatmul.msk.f32.gmra.mxu1 %vm215_vm1, %v7608_v38  ;;  %v11251_v38 = vpop.permute.xlu2 %8610 }
 0x306   : > { %7629 = vmatmul.msk.f32.gmra.mxu2 %vm215_vm1, %v11214_v54 }
 0x307   : > { %v2936_v53 = vpop.f32.mrf.mxu3 }
 0x308   : > { %v2950_v59 = vadd.f32 %v2936_v53, %v2805_v6  ;;  %v11231_v0 = vpop.f32.mrf.mxu0  ;;  %v8592_v6 = vunpack.i.l.bf16 %v8591_v10  ;;  %v8597_v53 = vunpack.i.l.bf16 %v11221_v50  ;;  %v2942_v10 = vadd.f32 %v11068_v21, %v10993_v60 }
 0x309   : > { %v3084_v26 = vpop.f32.mrf.mxu2 }
 0x30a   : > { %v11233_v3 = vpop.f32.mrf.mxu1  ;;  %v11235_v61 = vadd.f32 %v3081_v23, %v2950_v59  ;;  %v8612_v23 = vunpack.i.l.bf16 %v11251_v38  ;;  %v11265_v59 = vld [vmem:[%s13002_s1 + $0x368] sm:$0xff]  ;;  %v4281_v42 = vsel %vm4280_vm2, %v8592_v6, %v8593_v1  ;;  %v3087_v21 = vadd.f32 %v11156_v13, %v2942_v10 }
 0x30b   : > { %7617 = vmatmul.msk.f32.gmra.mxu0 %vm215_vm1, %v7609_v25  ;;  %v4429_v51 = vsel %vm4425_vm3, %v8597_v53, %v8598_v52  ;;  %v2945_v6 = vadd.f32 %v11095_v22, %v11018_v11 }
 0x30c   : > { %7613 = vmatmul.msk.f32.gmra.mxu3 %vm215_vm1, %v7609_v25  ;;  %v4282_v60 = vsel %vm4280_vm2, %v8593_v1, %v8612_v23 }
 0x30d   : > { %7621 = vmatmul.msk.f32.gmra.mxu1 %vm215_vm1, %v7609_v25  ;;  %v4284_v25 = vsel %vm4280_vm2, %v8587_v41, %v8588_v33  ;;  %v3090_v53 = vadd.f32 %v11182_v46, %v2945_v6  ;;  %v11323_v46 = vld [vmem:[%s13002_s1 + $0x378] sm:$0xff]  ;;  %v2951_v6 = vadd.f32 %v11133_v12, %v11064_v48 }
 0x30e   : > { %7646 = vmatmul.msk.f32.vlgmr.msra.gmra.mxu2 %vm215_vm1, %v11240_v28 }
 0x30f   : > { %v2939_v7 = vpop.f32.mrf.mxu3  ;;  %4464 = vmatpush.msra.mxu2 %v4429_v51  ;;  %v11337_v51 = vpop.permute.xlu1 %8620 }
 0x310   : > { %v2953_v24 = vadd.f32 %v2939_v7, %v2808_v44  ;;  %v11256_v29 = vpop.f32.mrf.mxu0  ;;  %v8608_v44 = vunpack.i.h.bf16 %v8606_v49  ;;  %v11287_v7 = vpop.permute.xlu0 %8600 }
 0x311   : > { %v3307_v18 = vpop.f32.mrf.mxu2  ;;  %v8603_v11 = vunpack.i.h.bf16 %v11287_v7  ;;  %v8602_v22 = vunpack.i.l.bf16 %v11287_v7 }
 0x312   : > { %v11254_v27 = vadd.f32 %v3084_v26, %v2953_v24  ;;  %v11258_v47 = vpop.f32.mrf.mxu1  ;;  %v4285_v26 = vsel %vm4280_vm2, %v8588_v33, %v8607_v2  ;;  %v11298_v24 = vld [vmem:[%s13002_s1 + $0x370] sm:$0xff]  ;;  %v4286_v49 = vsel %vm4280_vm2, %v8607_v2, %v8608_v44 }
 0x313   : > { %7634 = vmatmul.msk.f32.vlgmr.msra.gmra.mxu0 %vm215_vm1, %v11140_v15 }
 0x314   : > { %7630 = vmatmul.msk.f32.vlgmr.msra.gmra.mxu3 %vm215_vm1, %v11140_v15  ;;  %4348 = vmatpush.msra.mxu0 %v4285_v26 }
 0x315   : > { %7642 = vmatmul.msk.f32.vlgmr.msra.gmra.mxu1 %vm215_vm1, %v11240_v28  ;;  %4319 = vmatpush.msra.mxu3 %v4284_v25 }
 0x316   : > { %7647 = vmatmul.msk.f32.gmra.mxu2 %vm215_vm1, %v11265_v59  ;;  %4349 = vmatpush.msra.mxu0 %v4282_v60  ;;  %v2948_v60 = vadd.f32 %v11115_v30, %v11044_v31  ;;  %v8613_v30 = vunpack.i.h.bf16 %v11251_v38 }
 0x317   : > { %v3162_v15 = vpop.f32.mrf.mxu3  ;;  %4320 = vmatpush.msra.mxu3 %v4281_v42  ;;  %4377 = vmatpush.msra.mxu1 %v4286_v49 }
 0x318   : > { %v3232_v20 = vadd.f32 %v3162_v15, %v3087_v21  ;;  %v11289_v33 = vpop.f32.mrf.mxu0  ;;  %v8616_v42 = vpop.permute.xlu0 %8615  ;;  %v3093_v21 = vadd.f32 %v11205_v58, %v2948_v60  ;;  %v4426_v15 = vsel %vm4425_vm3, %v8602_v22, %v8603_v11  ;;  %v7654_v58 = vld [vmem:[%s13002_s1 + $0x380] sm:$0xff]  ;;  %v4283_v49 = vsel %vm4280_vm2, %v8612_v23, %v8613_v30 }
 0x319   : > { %v3310_v1 = vpop.f32.mrf.mxu2  ;;  %4465 = vmatpush.msra.mxu2 %v4426_v15  ;;  %4378 = vmatpush.msra.mxu1 %v4283_v49  ;;  %v8618_v22 = vunpack.i.h.bf16 %v8616_v42  ;;  %v8636_v60 = vpop.permute.xlu1 %8635  ;;  %v8622_v15 = vunpack.i.l.bf16 %v11337_v51  ;;  %v3088_v49 = vadd.f32 %v11158_v8, %v11097_v36  ;;  %vm6955_vm2 = vcmask 965632  }
 0x31a   : > { %v11291_v13 = vpop.f32.mrf.mxu1  ;;  %v11293_v41 = vadd.f32 %v3307_v18, %v3232_v20  ;;  %v8637_v38 = vunpack.i.l.bf16 %v8636_v60 }
 0x31b   : > { %7635 = vmatmul.msk.f32.gmra.mxu0 %vm215_vm1, %v11166_v5 }
 0x31c   : > { %7631 = vmatmul.msk.f32.gmra.mxu3 %vm215_vm1, %v11166_v5  ;;  %v4574_v36 = vsel %vm4570_vm7, %v8637_v38, %v8622_v15 }
 0x31d   : > { %7643 = vmatmul.msk.f32.gmra.mxu1 %vm215_vm1, %v11265_v59 }
 0x31e   : > { %7648 = vmatmul.msk.f32.gmra.mxu2 %vm215_vm1, %v11298_v24 }
 0x31f   : > { %v3165_v18 = vpop.f32.mrf.mxu3 }
 0x320   : > { %v3235_v10 = vadd.f32 %v3165_v18, %v3090_v53  ;;  %v11314_v25 = vpop.f32.mrf.mxu0  ;;  %v8617_v53 = vunpack.i.l.bf16 %v8616_v42  ;;  %v8631_v18 = vpop.permute.xlu0 %8630  ;;  %v7655_v42 = vld [vmem:[%s13002_s1 + $0x388] sm:$0xff] }
 0x321   : > { %v3313_v2 = vpop.f32.mrf.mxu2  ;;  %v8632_v48 = vunpack.i.l.bf16 %v8631_v18 }
 0x322   : > { %v11316_v5 = vpop.f32.mrf.mxu1  ;;  %v11318_v26 = vadd.f32 %v3310_v1, %v3235_v10  ;;  %v3096_v10 = vadd.f32 %v11231_v0, %v2951_v6  ;;  %v4430_v0 = vsel %vm4425_vm3, %v8598_v52, %v8617_v53  ;;  %v3233_v52 = vadd.f32 %v11256_v29, %v3088_v49 }
 0x323   : > { %7636 = vmatmul.msk.f32.gmra.mxu0 %vm215_vm1, %v11191_v14  ;;  %v4431_v6 = vsel %vm4425_vm3, %v8617_v53, %v8632_v48  ;;  %v8638_v53 = vunpack.i.h.bf16 %v8636_v60 }
 0x324   : > { %7632 = vmatmul.msk.f32.gmra.mxu3 %vm215_vm1, %v11191_v14 }
 0x325   : > { %7644 = vmatmul.msk.f32.gmra.mxu1 %vm215_vm1, %v11298_v24 }
 0x326   : > { %7649 = vmatmul.msk.f32.gmra.mxu2 %vm215_vm1, %v11323_v46 }
 0x327   : > { %v3168_v20 = vpop.f32.mrf.mxu3 }
 0x328   : > { %v3238_v31 = vadd.f32 %v3168_v20, %v3093_v21  ;;  %v11340_v44 = vpop.f32.mrf.mxu0  ;;  %v8633_v21 = vunpack.i.h.bf16 %v8631_v18 }
 0x329   : > { %v3316_v1 = vpop.f32.mrf.mxu2 }
 0x32a   : > { %v11342_v14 = vpop.f32.mrf.mxu1  ;;  %v11344_v7 = vadd.f32 %v3313_v2, %v3238_v31  ;;  %v4428_v50 = vsel %vm4425_vm3, %v8618_v22, %v8633_v21 }
 0x32b   : > { %7637 = vmatmul.msk.f32.gmra.mxu0 %vm215_vm1, %v11214_v54 }
 0x32c   : > { %7633 = vmatmul.msk.f32.gmra.mxu3 %vm215_vm1, %v11214_v54  ;;  %v8623_v54 = vunpack.i.h.bf16 %v11337_v51 }
 0x32d   : > { %7645 = vmatmul.msk.f32.gmra.mxu1 %vm215_vm1, %v11323_v46 }
 0x32e   : > { %7666 = vmatmul.msk.f32.vlgmr.msrb.gmra.mxu2 %vm215_vm1, %v7654_v58  ;;  %v4575_v8 = vsel %vm4570_vm7, %v8622_v15, %v8623_v54 }
 0x32f   : > { %v3171_v12 = vpop.f32.mrf.mxu3  ;;  %4638 = vmatpush.msrb.mxu2 %v4575_v8  ;;  %v3097_v8 = vadd.f32 %v11233_v3, %v11154_v32  ;;  %v7670_v32 = vld [vmem:[%s13002_s1 + $0x3a0] sm:$0xff] }
 0x330   : > { %v3241_v2 = vadd.f32 %v3171_v12, %v3096_v10  ;;  %v11366_v23 = vpop.f32.mrf.mxu0  ;;  %v7656_v12 = vld [vmem:[%s13002_s1 + $0x390] sm:$0xff] }
 0x331   : > { %v3481_v30 = vpop.f32.mrf.mxu2 }
 0x332   : > { %v11364_v20 = vadd.f32 %v3316_v1, %v3241_v2  ;;  %v11368_v31 = vpop.f32.mrf.mxu1  ;;  %v4427_v1 = vsel %vm4425_vm3, %v8603_v11, %v8618_v22  ;;  %v3091_v2 = vadd.f32 %v11184_v40, %v11117_v34 }
 0x333   : > { %7658 = vmatmul.msk.f32.vlgmr.msrb.gmra.mxu0 %vm215_vm1, %v7654_v58 }
 0x334   : > { %7650 = vmatmul.msk.f32.vlgmr.msrb.gmra.mxu3 %vm215_vm1, %v11240_v28  ;;  %4522 = vmatpush.msrb.mxu0 %v4431_v6  ;;  %v3236_v21 = vadd.f32 %v11289_v33, %v3091_v2  ;;  %v3094_v33 = vadd.f32 %v11207_v9, %v11135_v16 }
 0x335   : > { %7662 = vmatmul.msk.f32.vlgmr.msrb.gmra.mxu1 %vm215_vm1, %v7654_v58  ;;  %4493 = vmatpush.msrb.mxu3 %v4430_v0  ;;  %v11391_v58 = vpop.permute.xlu2 %8625 }
 0x336   : > { %7667 = vmatmul.msk.f32.gmra.mxu2 %vm215_vm1, %v7655_v42  ;;  %4609 = vmatpush.msrb.mxu1 %v4574_v36  ;;  %v8627_v48 = vunpack.i.l.bf16 %v11391_v58  ;;  %v8628_v0 = vunpack.i.h.bf16 %v11391_v58  ;;  %v3239_v6 = vadd.f32 %v11314_v25, %v3094_v33 }
 0x337   : > { %v3336_v28 = vpop.f32.mrf.mxu3  ;;  %4494 = vmatpush.msrb.mxu3 %v4427_v1  ;;  %4523 = vmatpush.msrb.mxu0 %v4428_v50 }
 0x338   : > { %v3378_v11 = vadd.f32 %v3336_v28, %v3233_v52  ;;  %v11393_v18 = vpop.f32.mrf.mxu0  ;;  %v4571_v60 = vsel %vm4570_vm7, %v8638_v53, %v8627_v48  ;;  %v4572_v49 = vsel %vm4570_vm7, %v8627_v48, %v8628_v0 }
 0x339   : > { %v3484_v22 = vpop.f32.mrf.mxu2  ;;  %4610 = vmatpush.msrb.mxu1 %v4571_v60  ;;  %4639 = vmatpush.msrb.mxu2 %v4572_v49 }
 0x33a   : > { %v11395_v29 = vpop.f32.mrf.mxu1  ;;  %v11397_v10 = vadd.f32 %v3481_v30, %v3378_v11  ;;  %v3242_v11 = vadd.f32 %v11340_v44, %v3097_v8 }
 0x33b   : > { %7659 = vmatmul.msk.f32.gmra.mxu0 %vm215_vm1, %v7655_v42 }
 0x33c   : > { %7651 = vmatmul.msk.f32.gmra.mxu3 %vm215_vm1, %v11265_v59  ;;  %v7657_v59 = vld [vmem:[%s13002_s1 + $0x398] sm:$0xff] }
 0x33d   : > { %7663 = vmatmul.msk.f32.gmra.mxu1 %vm215_vm1, %v7655_v42  ;;  %v8641_v1 = vpop.permute.xlu2 %8640 }
 0x33e   : > { %7668 = vmatmul.msk.f32.gmra.mxu2 %vm215_vm1, %v7656_v12  ;;  %v8642_v28 = vunpack.i.l.bf16 %v8641_v1  ;;  %v8643_v53 = vunpack.i.h.bf16 %v8641_v1 }
 0x33f   : > { %v3339_v15 = vpop.f32.mrf.mxu3 }
 0x340   : > { %v3381_v38 = vadd.f32 %v3339_v15, %v3236_v21  ;;  %v11413_v30 = vpop.f32.mrf.mxu0  ;;  %v4576_v44 = vsel %vm4570_vm7, %v8623_v54, %v8642_v28  ;;  %v4573_v51 = vsel %vm4570_vm7, %v8628_v0, %v8643_v53  ;;  %v7671_v0 = vld [vmem:[%s13002_s1 + $0x3a8] sm:$0xff]  ;;  %v3237_v28 = vadd.f32 %v11291_v13, %v11209_v39  ;;  %v7672_v39 = vld [vmem:[%s13002_s1 + $0x3b0] sm:$0xff] }
 0x341   : > { %v3487_v42 = vpop.f32.mrf.mxu2 }
 0x342   : > { %v11415_v34 = vpop.f32.mrf.mxu1  ;;  %v11417_v40 = vadd.f32 %v3484_v22, %v3381_v38  ;;  %v8646_v22 = vpop.permute.xlu0 %8645  ;;  %v11466_v38 = vld [vmem:[%s13002_s1 + $0x3c8] sm:$0xff] }
 0x343   : > { %7660 = vmatmul.msk.f32.gmra.mxu0 %vm215_vm1, %v7656_v12  ;;  %v8648_v21 = vunpack.i.h.bf16 %v8646_v22  ;;  %v8647_v15 = vunpack.i.l.bf16 %v8646_v22 }
 0x344   : > { %7652 = vmatmul.msk.f32.gmra.mxu3 %vm215_vm1, %v11298_v24  ;;  %v11440_v24 = vld [vmem:[%s13002_s1 + $0x3c0] sm:$0xff] }
 0x345   : > { %7664 = vmatmul.msk.f32.gmra.mxu1 %vm215_vm1, %v7656_v12  ;;  %v8656_v12 = vpop.permute.xlu2 %8655 }
 0x346   : > { %7669 = vmatmul.msk.f32.gmra.mxu2 %vm215_vm1, %v7657_v59  ;;  %v8658_v60 = vunpack.i.h.bf16 %v8656_v12  ;;  %v8657_v49 = vunpack.i.l.bf16 %v8656_v12  ;;  %v8651_v12 = vpop.permute.xlu1 %8650 }
 0x347   : > { %v3342_v50 = vpop.f32.mrf.mxu3  ;;  %v8653_v13 = vunpack.i.h.bf16 %v8651_v12  ;;  %v8652_v22 = vunpack.i.l.bf16 %v8651_v12 }
 0x348   : > { %v3384_v52 = vadd.f32 %v3342_v50, %v3239_v6  ;;  %v11431_v36 = vpop.f32.mrf.mxu0  ;;  %v4720_v6 = vsel %vm4715_vm8, %v8658_v60, %v8647_v15 }
 0x349   : > { %v3490_v25 = vpop.f32.mrf.mxu2 }
 0x34a   : > { %v11433_v16 = vpop.f32.mrf.mxu1  ;;  %v11435_v9 = vadd.f32 %v3487_v42, %v3384_v52  ;;  %v3234_v42 = vadd.f32 %v11258_v47, %v11186_v4  ;;  %v4721_v4 = vsel %vm4715_vm8, %v8647_v15, %v8648_v21  ;;  %v11491_v52 = vld [vmem:[%s13002_s1 + $0x3d0] sm:$0xff]  ;;  %v8661_v8 = vpop.permute.xlu0 %8660 }
 0x34b   : > { %7661 = vmatmul.msk.f32.gmra.mxu0 %vm215_vm1, %v7657_v59 }
 0x34c   : > { %7653 = vmatmul.msk.f32.gmra.mxu3 %vm215_vm1, %v11323_v46  ;;  %v3379_v54 = vadd.f32 %v11366_v23, %v3234_v42  ;;  %v3240_v42 = vadd.f32 %v11316_v5, %v11235_v61  ;;  %v8662_v5 = vunpack.i.l.bf16 %v8661_v8 }
 0x34d   : > { %7665 = vmatmul.msk.f32.gmra.mxu1 %vm215_vm1, %v7657_v59 }
 0x34e   : > { %7690 = vmatmul.msk.f32.vlgmr.msra.gmra.mxu2 %vm215_vm1, %v11440_v24 }
 0x34f   : > { %v3345_v58 = vpop.f32.mrf.mxu3  ;;  %4812 = vmatpush.msra.mxu2 %v4721_v4 }
 0x350   : > { %v3387_v48 = vadd.f32 %v3345_v58, %v3242_v11  ;;  %v11456_v46 = vpop.f32.mrf.mxu0  ;;  %v4719_v11 = vsel %vm4715_vm8, %v8657_v49, %v8658_v60  ;;  %v3382_v58 = vadd.f32 %v11393_v18, %v3237_v28  ;;  %v11514_v18 = vld [vmem:[%s13002_s1 + $0x3d8] sm:$0xff] }
 0x351   : > { %v3655_v59 = vpop.f32.mrf.mxu2 }
 0x352   : > { %v11454_v3 = vadd.f32 %v3490_v25, %v3387_v48  ;;  %v11458_v2 = vpop.f32.mrf.mxu1 }
 0x353   : > { %7678 = vmatmul.msk.f32.vlgmr.msra.gmra.mxu0 %vm215_vm1, %v7670_v32 }
 0x354   : > { %7674 = vmatmul.msk.f32.vlgmr.msra.gmra.mxu3 %vm215_vm1, %v7670_v32  ;;  %4754 = vmatpush.msra.mxu0 %v4719_v11  ;;  %v3243_v11 = vadd.f32 %v11342_v14, %v11254_v27 }
 0x355   : > { %7682 = vmatmul.msk.f32.vlgmr.msra.gmra.mxu1 %vm215_vm1, %v7670_v32  ;;  %4667 = vmatpush.msra.mxu3 %v4576_v44  ;;  %v8663_v32 = vunpack.i.h.bf16 %v8661_v8 }
 0x356   : > { %7691 = vmatmul.msk.f32.gmra.mxu2 %vm215_vm1, %v11466_v38  ;;  %4783 = vmatpush.msra.mxu1 %v4720_v6  ;;  %v4718_v6 = vsel %vm4715_vm8, %v8652_v22, %v8653_v13 }
 0x357   : > { %v3510_v33 = vpop.f32.mrf.mxu3  ;;  %4668 = vmatpush.msra.mxu3 %v4573_v51  ;;  %v11521_v51 = vpop.permute.xlu0 %8675  ;;  %4813 = vmatpush.msra.mxu2 %v4718_v6  ;;  %v4716_v8 = vsel %vm4715_vm8, %v8662_v5, %v8663_v32 }
 0x358   : > { %v3524_v47 = vadd.f32 %v3510_v33, %v3379_v54  ;;  %v11482_v1 = vpop.f32.mrf.mxu0  ;;  %v3385_v54 = vadd.f32 %v11413_v30, %v3240_v42  ;;  %v4717_v33 = vsel %vm4715_vm8, %v8663_v32, %v8652_v22  ;;  %4755 = vmatpush.msra.mxu0 %v4716_v8  ;;  %v8678_v6 = vunpack.i.h.bf16 %v11521_v51 }
 0x359   : > { %v3658_v25 = vpop.f32.mrf.mxu2  ;;  %4784 = vmatpush.msra.mxu1 %v4717_v33 }
 0x35a   : > { %v11484_v23 = vpop.f32.mrf.mxu1  ;;  %v11486_v50 = vadd.f32 %v3655_v59, %v3524_v47  ;;  %v8671_v59 = vpop.permute.xlu2 %8670  ;;  %v7673_v47 = vld [vmem:[%s13002_s1 + $0x3b8] sm:$0xff] }
 0x35b   : > { %7679 = vmatmul.msk.f32.gmra.mxu0 %vm215_vm1, %v7671_v0  ;;  %v8672_v42 = vunpack.i.l.bf16 %v8671_v59 }
 0x35c   : > { %7675 = vmatmul.msk.f32.gmra.mxu3 %vm215_vm1, %v7671_v0 }
 0x35d   : > { %7683 = vmatmul.msk.f32.gmra.mxu1 %vm215_vm1, %v7671_v0 }
 0x35e   : > { %7692 = vmatmul.msk.f32.gmra.mxu2 %vm215_vm1, %v11491_v52 }
 0x35f   : > { %v3513_v53 = vpop.f32.mrf.mxu3  ;;  %v11551_v14 = vpop.permute.xlu0 %8690 }
 0x360   : > { %v3527_v48 = vadd.f32 %v3513_v53, %v3382_v58  ;;  %v11505_v44 = vpop.f32.mrf.mxu0  ;;  %v3388_v53 = vadd.f32 %v11431_v36, %v3243_v11 }
 0x361   : > { %v3661_v15 = vpop.f32.mrf.mxu2 }
 0x362   : > { %v11507_v21 = vpop.f32.mrf.mxu1  ;;  %v11509_v60 = vadd.f32 %v3658_v25, %v3527_v48  ;;  %v11540_v25 = vld [vmem:[%s13002_s1 + $0x3e0] sm:$0xff]  ;;  %v8686_v58 = vpop.permute.xlu2 %8685 }
 0x363   : > { %7680 = vmatmul.msk.f32.gmra.mxu0 %vm215_vm1, %v7672_v39  ;;  %v8666_v48 = vpop.permute.xlu1 %8665 }
 0x364   : > { %7676 = vmatmul.msk.f32.gmra.mxu3 %vm215_vm1, %v7672_v39  ;;  %v8668_v13 = vunpack.i.h.bf16 %v8666_v48  ;;  %v8667_v27 = vunpack.i.l.bf16 %v8666_v48  ;;  %v8688_v48 = vunpack.i.h.bf16 %v8686_v58 }
 0x365   : > { %7684 = vmatmul.msk.f32.gmra.mxu1 %vm215_vm1, %v7672_v39  ;;  %v8687_v39 = vunpack.i.l.bf16 %v8686_v58 }
 0x366   : > { %7693 = vmatmul.msk.f32.gmra.mxu2 %vm215_vm1, %v11514_v18 }
 0x367   : > { %v3516_v4 = vpop.f32.mrf.mxu3  ;;  %v4866_v58 = vsel %vm4860_vm9, %v8687_v39, %v8688_v48 }
 0x368   : > { %v3530_v61 = vadd.f32 %v3516_v4, %v3385_v54  ;;  %v11531_v49 = vpop.f32.mrf.mxu0  ;;  %v8692_v54 = vunpack.i.l.bf16 %v11551_v14  ;;  %v8677_v4 = vunpack.i.l.bf16 %v11521_v51 }
 0x369   : > { %v3664_v28 = vpop.f32.mrf.mxu2 }
 0x36a   : > { %v11533_v0 = vpop.f32.mrf.mxu1  ;;  %v11535_v30 = vadd.f32 %v3661_v15, %v3530_v61  ;;  %v8673_v15 = vunpack.i.h.bf16 %v8671_v59  ;;  %v11565_v61 = vld [vmem:[%s13002_s1 + $0x3e8] sm:$0xff]  ;;  %v3522_v59 = vadd.f32 %v11368_v31, %v11293_v41  ;;  %v5009_v8 = vsel %vm5005_vm10, %v8677_v4, %v8678_v6 }
 0x36b   : > { %7681 = vmatmul.msk.f32.gmra.mxu0 %vm215_vm1, %v7673_v47 }
 0x36c   : > { %7677 = vmatmul.msk.f32.gmra.mxu3 %vm215_vm1, %v7673_v47  ;;  %v4861_v11 = vsel %vm4860_vm9, %v8672_v42, %v8673_v15  ;;  %v4862_v41 = vsel %vm4860_vm9, %v8673_v15, %v8692_v54  ;;  %v3667_v31 = vadd.f32 %v11456_v46, %v3522_v59  ;;  %v3525_v42 = vadd.f32 %v11395_v29, %v11318_v26 }
 0x36d   : > { %7685 = vmatmul.msk.f32.gmra.mxu1 %vm215_vm1, %v7673_v47  ;;  %v4864_v47 = vsel %vm4860_vm9, %v8667_v27, %v8668_v13 }
 0x36e   : > { %7710 = vmatmul.msk.f32.vlgmr.msrb.gmra.mxu2 %vm215_vm1, %v11540_v25  ;;  %v3670_v4 = vadd.f32 %v11482_v1, %v3525_v42  ;;  %v11623_v1 = vld [vmem:[%s13002_s1 + $0x3f8] sm:$0xff]  ;;  %v3531_v42 = vadd.f32 %v11433_v16, %v11364_v20 }
 0x36f   : > { %v3519_v12 = vpop.f32.mrf.mxu3  ;;  %5044 = vmatpush.msrb.mxu2 %v5009_v8  ;;  %v11637_v8 = vpop.permute.xlu2 %8700 }
 0x370   : > { %v3533_v22 = vadd.f32 %v3519_v12, %v3388_v53  ;;  %v11556_v33 = vpop.f32.mrf.mxu0  ;;  %v11587_v12 = vpop.permute.xlu1 %8680 }
 0x371   : > { %v3887_v5 = vpop.f32.mrf.mxu2  ;;  %v8683_v26 = vunpack.i.h.bf16 %v11587_v12  ;;  %v8682_v29 = vunpack.i.l.bf16 %v11587_v12 }
 0x372   : > { %v11554_v32 = vadd.f32 %v3664_v28, %v3533_v22  ;;  %v11558_v36 = vpop.f32.mrf.mxu1  ;;  %v4865_v28 = vsel %vm4860_vm9, %v8668_v13, %v8687_v39  ;;  %v11598_v22 = vld [vmem:[%s13002_s1 + $0x3f0] sm:$0xff] }
 0x373   : > { %7698 = vmatmul.msk.f32.vlgmr.msrb.gmra.mxu0 %vm215_vm1, %v11440_v24 }
 0x374   : > { %7694 = vmatmul.msk.f32.vlgmr.msrb.gmra.mxu3 %vm215_vm1, %v11440_v24  ;;  %4928 = vmatpush.msrb.mxu0 %v4865_v28 }
 0x375   : > { %7706 = vmatmul.msk.f32.vlgmr.msrb.gmra.mxu1 %vm215_vm1, %v11540_v25  ;;  %4899 = vmatpush.msrb.mxu3 %v4864_v47 }
 0x376   : > { %7711 = vmatmul.msk.f32.gmra.mxu2 %vm215_vm1, %v11565_v61  ;;  %4929 = vmatpush.msrb.mxu0 %v4862_v41  ;;  %v3528_v41 = vadd.f32 %v11415_v34, %v11344_v7  ;;  %v8693_v34 = vunpack.i.h.bf16 %v11551_v14 }
 0x377   : > { %v3742_v24 = vpop.f32.mrf.mxu3  ;;  %4900 = vmatpush.msrb.mxu3 %v4861_v11  ;;  %4957 = vmatpush.msrb.mxu1 %v4866_v58 }
 0x378   : > { %v3812_v53 = vadd.f32 %v3742_v24, %v3667_v31  ;;  %v11589_v13 = vpop.f32.mrf.mxu0  ;;  %v8696_v11 = vpop.permute.xlu1 %8695  ;;  %v3673_v31 = vadd.f32 %v11505_v44, %v3528_v41  ;;  %v5006_v24 = vsel %vm5005_vm10, %v8682_v29, %v8683_v26  ;;  %v7718_v44 = vld [vmem:[%s13002_s1 + $0x400] sm:$0xff]  ;;  %v4863_v58 = vsel %vm4860_vm9, %v8692_v54, %v8693_v34 }
 0x379   : > { %v3890_v15 = vpop.f32.mrf.mxu2  ;;  %5045 = vmatpush.msrb.mxu2 %v5006_v24  ;;  %4958 = vmatpush.msrb.mxu1 %v4863_v58  ;;  %v8698_v29 = vunpack.i.h.bf16 %v8696_v11  ;;  %v8716_v41 = vpop.permute.xlu2 %8715  ;;  %v8702_v24 = vunpack.i.l.bf16 %v11637_v8  ;;  %v3668_v58 = vadd.f32 %v11458_v2, %v11397_v10 }
 0x37a   : > { %v11591_v46 = vpop.f32.mrf.mxu1  ;;  %v11593_v27 = vadd.f32 %v3887_v5, %v3812_v53  ;;  %v8717_v14 = vunpack.i.l.bf16 %v8716_v41 }
 0x37b   : > { %7699 = vmatmul.msk.f32.gmra.mxu0 %vm215_vm1, %v11466_v38 }
 0x37c   : > { %7695 = vmatmul.msk.f32.gmra.mxu3 %vm215_vm1, %v11466_v38  ;;  %v5154_v10 = vsel %vm5150_vm11, %v8717_v14, %v8702_v24 }
 0x37d   : > { %7707 = vmatmul.msk.f32.gmra.mxu1 %vm215_vm1, %v11565_v61 }
 0x37e   : > { %7712 = vmatmul.msk.f32.gmra.mxu2 %vm215_vm1, %v11598_v22 }
 0x37f   : > { %v3745_v5 = vpop.f32.mrf.mxu3 }
 0x380   : > { %v3815_v59 = vadd.f32 %v3745_v5, %v3670_v4  ;;  %v11614_v47 = vpop.f32.mrf.mxu0  ;;  %v8697_v4 = vunpack.i.l.bf16 %v8696_v11  ;;  %v8711_v5 = vpop.permute.xlu1 %8710  ;;  %v7719_v11 = vld [vmem:[%s13002_s1 + $0x408] sm:$0xff] }
 0x381   : > { %v3893_v39 = vpop.f32.mrf.mxu2  ;;  %v8712_v20 = vunpack.i.l.bf16 %v8711_v5 }
 0x382   : > { %v11616_v38 = vpop.f32.mrf.mxu1  ;;  %v11618_v28 = vadd.f32 %v3890_v15, %v3815_v59  ;;  %v3676_v59 = vadd.f32 %v11531_v49, %v3531_v42  ;;  %v5010_v49 = vsel %vm5005_vm10, %v8678_v6, %v8697_v4  ;;  %v3813_v6 = vadd.f32 %v11556_v33, %v3668_v58 }
 0x383   : > { %7700 = vmatmul.msk.f32.gmra.mxu0 %vm215_vm1, %v11491_v52  ;;  %v5011_v42 = vsel %vm5005_vm10, %v8697_v4, %v8712_v20  ;;  %v11691_v4 = vpop.permute.xlu0 %8705 }
 0x384   : > { %7696 = vmatmul.msk.f32.gmra.mxu3 %vm215_vm1, %v11491_v52  ;;  %v8707_v20 = vunpack.i.l.bf16 %v11691_v4 }
 0x385   : > { %7708 = vmatmul.msk.f32.gmra.mxu1 %vm215_vm1, %v11598_v22 }
 0x386   : > { %7713 = vmatmul.msk.f32.gmra.mxu2 %vm215_vm1, %v11623_v1 }
 0x387   : > { %v3748_v53 = vpop.f32.mrf.mxu3 }
 0x388   : > { %v3818_v7 = vadd.f32 %v3748_v53, %v3673_v31  ;;  %v11640_v48 = vpop.f32.mrf.mxu0  ;;  %v8713_v31 = vunpack.i.h.bf16 %v8711_v5 }
 0x389   : > { %v3896_v15 = vpop.f32.mrf.mxu2 }
 0x38a   : > { %v11642_v52 = vpop.f32.mrf.mxu1  ;;  %v11644_v12 = vadd.f32 %v3893_v39, %v3818_v7  ;;  %v5008_v51 = vsel %vm5005_vm10, %v8698_v29, %v8713_v31 }
 0x38b   : > { %7701 = vmatmul.msk.f32.gmra.mxu0 %vm215_vm1, %v11514_v18 }
 0x38c   : > { %7697 = vmatmul.msk.f32.gmra.mxu3 %vm215_vm1, %v11514_v18  ;;  %v8703_v18 = vunpack.i.h.bf16 %v11637_v8 }
 0x38d   : > { %7709 = vmatmul.msk.f32.gmra.mxu1 %vm215_vm1, %v11623_v1 }
 0x38e   : > { %7730 = vmatmul.msk.f32.vlgmr.msra.gmra.mxu2 %vm215_vm1, %v7718_v44  ;;  %v5155_v2 = vsel %vm5150_vm11, %v8702_v24, %v8703_v18 }
 0x38f   : > { %v3751_v16 = vpop.f32.mrf.mxu3  ;;  %5218 = vmatpush.msra.mxu2 %v5155_v2  ;;  %v3677_v2 = vadd.f32 %v11533_v0, %v11454_v3  ;;  %v7734_v3 = vld [vmem:[%s13002_s1 + $0x420] sm:$0xff] }
 0x390   : > { %v3821_v39 = vadd.f32 %v3751_v16, %v3676_v59  ;;  %v11666_v54 = vpop.f32.mrf.mxu0  ;;  %v7720_v16 = vld [vmem:[%s13002_s1 + $0x410] sm:$0xff] }
 0x391   : > { %v4061_v34 = vpop.f32.mrf.mxu2 }
 0x392   : > { %v11664_v53 = vadd.f32 %v3896_v15, %v3821_v39  ;;  %v11668_v7 = vpop.f32.mrf.mxu1  ;;  %v5007_v15 = vsel %vm5005_vm10, %v8683_v26, %v8698_v29  ;;  %v3671_v39 = vadd.f32 %v11484_v23, %v11417_v40 }
 0x393   : > { %7722 = vmatmul.msk.f32.vlgmr.msra.gmra.mxu0 %vm215_vm1, %v7718_v44 }
 0x394   : > { %7714 = vmatmul.msk.f32.vlgmr.msra.gmra.mxu3 %vm215_vm1, %v11540_v25  ;;  %5102 = vmatpush.msra.mxu0 %v5011_v42  ;;  %v3816_v31 = vadd.f32 %v11589_v13, %v3671_v39  ;;  %v3674_v13 = vadd.f32 %v11507_v21, %v11435_v9 }
 0x395   : > { %7726 = vmatmul.msk.f32.vlgmr.msra.gmra.mxu1 %vm215_vm1, %v7718_v44  ;;  %5073 = vmatpush.msra.mxu3 %v5010_v49  ;;  %v8718_v44 = vunpack.i.h.bf16 %v8716_v41  ;;  %v8708_v49 = vunpack.i.h.bf16 %v11691_v4 }
 0x396   : > { %7731 = vmatmul.msk.f32.gmra.mxu2 %vm215_vm1, %v7719_v11  ;;  %5189 = vmatpush.msra.mxu1 %v5154_v10  ;;  %v3819_v42 = vadd.f32 %v11614_v47, %v3674_v13 }
 0x397   : > { %v3916_v25 = vpop.f32.mrf.mxu3  ;;  %5074 = vmatpush.msra.mxu3 %v5007_v15  ;;  %5103 = vmatpush.msra.mxu0 %v5008_v51  ;;  %v5151_v41 = vsel %vm5150_vm11, %v8718_v44, %v8707_v20  ;;  %v5152_v58 = vsel %vm5150_vm11, %v8707_v20, %v8708_v49  ;;  %v8721_v15 = vpop.permute.xlu0 %8720 }
 0x398   : > { %v3958_v26 = vadd.f32 %v3916_v25, %v3813_v6  ;;  %v11693_v5 = vpop.f32.mrf.mxu0  ;;  %5190 = vmatpush.msra.mxu1 %v5151_v41  ;;  %5219 = vmatpush.msra.mxu2 %v5152_v58  ;;  %v8722_v25 = vunpack.i.l.bf16 %v8721_v15  ;;  %v8723_v4 = vunpack.i.h.bf16 %v8721_v15 }
 0x399   : > { %v4064_v29 = vpop.f32.mrf.mxu2 }
 0x39a   : > { %v11695_v33 = vpop.f32.mrf.mxu1  ;;  %v11697_v59 = vadd.f32 %v4061_v34, %v3958_v26  ;;  %v3822_v26 = vadd.f32 %v11640_v48, %v3677_v2  ;;  %v5156_v48 = vsel %vm5150_vm11, %v8703_v18, %v8722_v25  ;;  %v5153_v8 = vsel %vm5150_vm11, %v8708_v49, %v8723_v4  ;;  %v7735_v49 = vld [vmem:[%s13002_s1 + $0x428] sm:$0xff] }
 0x39b   : > { %7723 = vmatmul.msk.f32.gmra.mxu0 %vm215_vm1, %v7719_v11  ;;  %v3817_v25 = vadd.f32 %v11591_v46, %v11509_v60  ;;  %v7736_v60 = vld [vmem:[%s13002_s1 + $0x430] sm:$0xff] }
 0x39c   : > { %7715 = vmatmul.msk.f32.gmra.mxu3 %vm215_vm1, %v11565_v61  ;;  %v7721_v61 = vld [vmem:[%s13002_s1 + $0x418] sm:$0xff] }
 0x39d   : > { %7727 = vmatmul.msk.f32.gmra.mxu1 %vm215_vm1, %v7719_v11 }
 0x39e   : > { %7732 = vmatmul.msk.f32.gmra.mxu2 %vm215_vm1, %v7720_v16 }
 0x39f   : > { %v3919_v24 = vpop.f32.mrf.mxu3 }
 0x3a0   : > { %v3961_v14 = vadd.f32 %v3919_v24, %v3816_v31  ;;  %v11713_v34 = vpop.f32.mrf.mxu0 }
 0x3a1   : > { %v4067_v11 = vpop.f32.mrf.mxu2 }
 0x3a2   : > { %v11715_v40 = vpop.f32.mrf.mxu1  ;;  %v11717_v23 = vadd.f32 %v4064_v29, %v3961_v14  ;;  %v8736_v29 = vpop.permute.xlu0 %8735  ;;  %v11766_v14 = vld [vmem:[%s13002_s1 + $0x448] sm:$0xff] }
 0x3a3   : > { %7724 = vmatmul.msk.f32.gmra.mxu0 %vm215_vm1, %v7720_v16  ;;  %v8738_v24 = vunpack.i.h.bf16 %v8736_v29  ;;  %v8737_v58 = vunpack.i.l.bf16 %v8736_v29 }
 0x3a4   : > { %7716 = vmatmul.msk.f32.gmra.mxu3 %vm215_vm1, %v11598_v22  ;;  %v11740_v22 = vld [vmem:[%s13002_s1 + $0x440] sm:$0xff] }
 0x3a5   : > { %7728 = vmatmul.msk.f32.gmra.mxu1 %vm215_vm1, %v7720_v16  ;;  %v8726_v16 = vpop.permute.xlu1 %8725 }
 0x3a6   : > { %7733 = vmatmul.msk.f32.gmra.mxu2 %vm215_vm1, %v7721_v61  ;;  %v8728_v41 = vunpack.i.h.bf16 %v8726_v16  ;;  %v8727_v31 = vunpack.i.l.bf16 %v8726_v16  ;;  %v8731_v16 = vpop.permute.xlu2 %8730 }
 0x3a7   : > { %v3922_v51 = vpop.f32.mrf.mxu3  ;;  %v8733_v46 = vunpack.i.h.bf16 %v8731_v16  ;;  %v8732_v29 = vunpack.i.l.bf16 %v8731_v16 }
 0x3a8   : > { %v3964_v6 = vadd.f32 %v3922_v51, %v3819_v42  ;;  %v11731_v10 = vpop.f32.mrf.mxu0  ;;  %v5300_v42 = vsel %vm5295_vm12, %v8738_v24, %v8727_v31 }
 0x3a9   : > { %v4070_v47 = vpop.f32.mrf.mxu2 }
 0x3aa   : > { %v11733_v9 = vpop.f32.mrf.mxu1  ;;  %v11735_v21 = vadd.f32 %v4067_v11, %v3964_v6  ;;  %v3814_v11 = vadd.f32 %v11558_v36, %v11486_v50  ;;  %v5301_v50 = vsel %vm5295_vm12, %v8727_v31, %v8728_v41  ;;  %v11791_v6 = vld [vmem:[%s13002_s1 + $0x450] sm:$0xff] }
 0x3ab   : > { %7725 = vmatmul.msk.f32.gmra.mxu0 %vm215_vm1, %v7721_v61 }
 0x3ac   : > { %7717 = vmatmul.msk.f32.gmra.mxu3 %vm215_vm1, %v11623_v1  ;;  %v3959_v18 = vadd.f32 %v11666_v54, %v3814_v11  ;;  %v3820_v11 = vadd.f32 %v11616_v38, %v11535_v30 }
 0x3ad   : > { %7729 = vmatmul.msk.f32.gmra.mxu1 %vm215_vm1, %v7721_v61  ;;  %v8741_v2 = vpop.permute.xlu1 %8740 }
 0x3ae   : > { %7754 = vmatmul.msk.f32.vlgmr.msrb.gmra.mxu2 %vm215_vm1, %v11740_v22  ;;  %v8742_v38 = vunpack.i.l.bf16 %v8741_v2 }
 0x3af   : > { %v3925_v44 = vpop.f32.mrf.mxu3  ;;  %5392 = vmatpush.msrb.mxu2 %v5301_v50 }
 0x3b0   : > { %v3967_v20 = vadd.f32 %v3925_v44, %v3822_v26  ;;  %v11756_v1 = vpop.f32.mrf.mxu0  ;;  %v5299_v26 = vsel %vm5295_vm12, %v8737_v58, %v8738_v24  ;;  %v3962_v44 = vadd.f32 %v11693_v5, %v3817_v25  ;;  %v11814_v5 = vld [vmem:[%s13002_s1 + $0x458] sm:$0xff] }
 0x3b1   : > { %v4235_v61 = vpop.f32.mrf.mxu2 }
 0x3b2   : > { %v11754_v0 = vadd.f32 %v4070_v47, %v3967_v20  ;;  %v11758_v39 = vpop.f32.mrf.mxu1 }
 0x3b3   : > { %7742 = vmatmul.msk.f32.vlgmr.msrb.gmra.mxu0 %vm215_vm1, %v7734_v3 }
 0x3b4   : > { %7738 = vmatmul.msk.f32.vlgmr.msrb.gmra.mxu3 %vm215_vm1, %v7734_v3  ;;  %5334 = vmatpush.msrb.mxu0 %v5299_v26  ;;  %v3823_v26 = vadd.f32 %v11642_v52, %v11554_v32 }
 0x3b5   : > { %7746 = vmatmul.msk.f32.vlgmr.msrb.gmra.mxu1 %vm215_vm1, %v7734_v3  ;;  %5247 = vmatpush.msrb.mxu3 %v5156_v48  ;;  %v8743_v3 = vunpack.i.h.bf16 %v8741_v2 }
 0x3b6   : > { %7755 = vmatmul.msk.f32.gmra.mxu2 %vm215_vm1, %v11766_v14  ;;  %5363 = vmatpush.msrb.mxu1 %v5300_v42  ;;  %v5298_v42 = vsel %vm5295_vm12, %v8732_v29, %v8733_v46 }
 0x3b7   : > { %v4090_v13 = vpop.f32.mrf.mxu3  ;;  %5248 = vmatpush.msrb.mxu3 %v5153_v8  ;;  %v11821_v8 = vpop.permute.xlu1 %8755  ;;  %5393 = vmatpush.msrb.mxu2 %v5298_v42  ;;  %v5296_v2 = vsel %vm5295_vm12, %v8742_v38, %v8743_v3 }
 0x3b8   : > { %v4104_v36 = vadd.f32 %v4090_v13, %v3959_v18  ;;  %v11782_v15 = vpop.f32.mrf.mxu0  ;;  %v3965_v18 = vadd.f32 %v11713_v34, %v3820_v11  ;;  %v5297_v13 = vsel %vm5295_vm12, %v8743_v3, %v8732_v29  ;;  %5335 = vmatpush.msrb.mxu0 %v5296_v2  ;;  %v8758_v42 = vunpack.i.h.bf16 %v11821_v8 }
 0x3b9   : > { %v4238_v47 = vpop.f32.mrf.mxu2  ;;  %5364 = vmatpush.msrb.mxu1 %v5297_v13 }
 0x3ba   : > { %v11784_v54 = vpop.f32.mrf.mxu1  ;;  %v11786_v51 = vadd.f32 %v4235_v61, %v4104_v36  ;;  %v8751_v61 = vpop.permute.xlu0 %8750  ;;  %v7737_v36 = vld [vmem:[%s13002_s1 + $0x438] sm:$0xff] }
 0x3bb   : > { %7743 = vmatmul.msk.f32.gmra.mxu0 %vm215_vm1, %v7735_v49  ;;  %v8752_v11 = vunpack.i.l.bf16 %v8751_v61 }
 0x3bc   : > { %7739 = vmatmul.msk.f32.gmra.mxu3 %vm215_vm1, %v7735_v49 }
 0x3bd   : > { %7747 = vmatmul.msk.f32.gmra.mxu1 %vm215_vm1, %v7735_v49 }
 0x3be   : > { %7756 = vmatmul.msk.f32.gmra.mxu2 %vm215_vm1, %v11791_v6 }
 0x3bf   : > { %v4093_v4 = vpop.f32.mrf.mxu3  ;;  %v11851_v52 = vpop.permute.xlu1 %8770 }
 0x3c0   : > { %v4107_v20 = vadd.f32 %v4093_v4, %v3962_v44  ;;  %v11805_v48 = vpop.f32.mrf.mxu0  ;;  %v8746_v44 = vpop.permute.xlu2 %8745 }
 0x3c1   : > { %v4241_v24 = vpop.f32.mrf.mxu2  ;;  %v8748_v16 = vunpack.i.h.bf16 %v8746_v44 }
 0x3c2   : > { %v11807_v41 = vpop.f32.mrf.mxu1  ;;  %v11809_v31 = vadd.f32 %v4238_v47, %v4107_v20  ;;  %v11840_v47 = vld [vmem:[%s13002_s1 + $0x460] sm:$0xff]  ;;  %v8766_v4 = vpop.permute.xlu0 %8765  ;;  %v3968_v20 = vadd.f32 %v11731_v10, %v3823_v26 }
 0x3c3   : > { %7744 = vmatmul.msk.f32.gmra.mxu0 %vm215_vm1, %v7736_v60  ;;  %v8767_v46 = vunpack.i.l.bf16 %v8766_v4 }
 0x3c4   : > { %7740 = vmatmul.msk.f32.gmra.mxu3 %vm215_vm1, %v7736_v60 }
 0x3c5   : > { %7748 = vmatmul.msk.f32.gmra.mxu1 %vm215_vm1, %v7736_v60  ;;  %v8747_v60 = vunpack.i.l.bf16 %v8746_v44 }
 0x3c6   : > { %7757 = vmatmul.msk.f32.gmra.mxu2 %vm215_vm1, %v11814_v5 }
 0x3c7   : > { %v4096_v50 = vpop.f32.mrf.mxu3 }
 0x3c8   : > { %v4110_v30 = vadd.f32 %v4096_v50, %v3965_v18  ;;  %v11831_v58 = vpop.f32.mrf.mxu0  ;;  %v8772_v18 = vunpack.i.l.bf16 %v11851_v52  ;;  %v8757_v50 = vunpack.i.l.bf16 %v11821_v8 }
 0x3c9   : > { %v4244_v25 = vpop.f32.mrf.mxu2 }
 0x3ca   : > { %v11833_v49 = vpop.f32.mrf.mxu1  ;;  %v11835_v34 = vadd.f32 %v4241_v24, %v4110_v30  ;;  %v8753_v24 = vunpack.i.h.bf16 %v8751_v61  ;;  %v11865_v30 = vld [vmem:[%s13002_s1 + $0x468] sm:$0xff]  ;;  %v5443_v61 = vsel %vm215_vm1, %v8747_v60, %v8748_v16 }
 0x3cb   : > { %7745 = vmatmul.msk.f32.gmra.mxu0 %vm215_vm1, %v7737_v36 }
 0x3cc   : > { %7741 = vmatmul.msk.f32.gmra.mxu3 %vm215_vm1, %v7737_v36  ;;  %v5440_v26 = vsel %vm215_vm1, %v8752_v11, %v8753_v24  ;;  %v5441_v2 = vsel %vm215_vm1, %v8753_v24, %v8772_v18  ;;  %v4105_v11 = vadd.f32 %v11695_v33, %v11618_v28 }
 0x3cd   : > { %7749 = vmatmul.msk.f32.gmra.mxu1 %vm215_vm1, %v7737_v36  ;;  %v5444_v36 = vsel %vm215_vm1, %v8748_v16, %v8767_v46  ;;  %v8768_v16 = vunpack.i.h.bf16 %v8766_v4 }
 0x3ce   : > { %7774 = vmatmul.msk.f32.vlgmr.msra.gmra.mxu2 %vm215_vm1, %v11840_v47 }
 0x3cf   : > { %v4099_v32 = vpop.f32.mrf.mxu3  ;;  %v5445_v4 = vsel %vm215_vm1, %v8767_v46, %v8768_v16 }
 0x3d0   : > { %v4113_v29 = vadd.f32 %v4099_v32, %v3968_v20  ;;  %v11856_v13 = vpop.f32.mrf.mxu0  ;;  %v11887_v20 = vpop.permute.xlu2 %8760 }
 0x3d1   : > { %v4467_v38 = vpop.f32.mrf.mxu2  ;;  %v8763_v28 = vunpack.i.h.bf16 %v11887_v20  ;;  %v8762_v33 = vunpack.i.l.bf16 %v11887_v20 }
 0x3d2   : > { %v11854_v3 = vadd.f32 %v4244_v25, %v4113_v29  ;;  %v11858_v10 = vpop.f32.mrf.mxu1  ;;  %v4102_v25 = vadd.f32 %v11668_v7, %v11593_v27  ;;  %v5588_v7 = vsel %vm5584_vm13, %v8757_v50, %v8758_v42  ;;  %v11898_v29 = vld [vmem:[%s13002_s1 + $0x470] sm:$0xff]  ;;  %v4250_v50 = vadd.f32 %v11782_v15, %v4105_v11  ;;  %v11923_v15 = vld [vmem:[%s13002_s1 + $0x478] sm:$0xff] }
 0x3d3   : > { %7762 = vmatmul.msk.f32.vlgmr.msra.gmra.mxu0 %vm215_vm1, %v11740_v22  ;;  %5623 = vmatpush.msra.mxu2 %v5588_v7  ;;  %v11937_v7 = vpop.permute.xlu0 %8780  ;;  %v4111_v11 = vadd.f32 %v11733_v9, %v11664_v53 }
 0x3d4   : > { %7758 = vmatmul.msk.f32.vlgmr.msra.gmra.mxu3 %vm215_vm1, %v11740_v22  ;;  %v4247_v44 = vadd.f32 %v11756_v1, %v4102_v25  ;;  %5507 = vmatpush.msra.mxu0 %v5444_v36 }
 0x3d5   : > { %7770 = vmatmul.msk.f32.vlgmr.msra.gmra.mxu1 %vm215_vm1, %v11840_v47  ;;  %5478 = vmatpush.msra.mxu3 %v5443_v61 }
 0x3d6   : > { %7775 = vmatmul.msk.f32.gmra.mxu2 %vm215_vm1, %v11865_v30  ;;  %5508 = vmatpush.msra.mxu0 %v5441_v2  ;;  %v4108_v2 = vadd.f32 %v11715_v40, %v11644_v12  ;;  %v8773_v40 = vunpack.i.h.bf16 %v11851_v52 }
 0x3d7   : > { %v4322_v27 = vpop.f32.mrf.mxu3  ;;  %5479 = vmatpush.msra.mxu3 %v5440_v26  ;;  %5536 = vmatpush.msra.mxu1 %v5445_v4 }
 0x3d8   : > { %v4392_v22 = vadd.f32 %v4322_v27, %v4247_v44  ;;  %v11889_v60 = vpop.f32.mrf.mxu0  ;;  %v8776_v26 = vpop.permute.xlu2 %8775  ;;  %v4253_v44 = vadd.f32 %v11805_v48, %v4108_v2  ;;  %v5585_v27 = vsel %vm5584_vm13, %v8762_v33, %v8763_v28  ;;  %v7782_v48 = vld [vmem:[%s13002_s1 + $0x480] sm:$0xff]  ;;  %v5442_v4 = vsel %vm215_vm1, %v8772_v18, %v8773_v40 }
 0x3d9   : > { %v4470_v24 = vpop.f32.mrf.mxu2  ;;  %5624 = vmatpush.msra.mxu2 %v5585_v27  ;;  %5537 = vmatpush.msra.mxu1 %v5442_v4  ;;  %v8778_v33 = vunpack.i.h.bf16 %v8776_v26  ;;  %v8782_v27 = vunpack.i.l.bf16 %v11937_v7  ;;  %v4248_v4 = vadd.f32 %v11758_v39, %v11697_v59 }
 0x3da   : > { %v11891_v1 = vpop.f32.mrf.mxu1  ;;  %v11893_v32 = vadd.f32 %v4467_v38, %v4392_v22 }
 0x3db   : > { %7763 = vmatmul.msk.f32.gmra.mxu0 %vm215_vm1, %v11766_v14 }
 0x3dc   : > { %7759 = vmatmul.msk.f32.gmra.mxu3 %vm215_vm1, %v11766_v14 }
 0x3dd   : > { %7771 = vmatmul.msk.f32.gmra.mxu1 %vm215_vm1, %v11865_v30 }
 0x3de   : > { %7776 = vmatmul.msk.f32.gmra.mxu2 %vm215_vm1, %v11898_v29 }
 0x3df   : > { %v4325_v38 = vpop.f32.mrf.mxu3 }
 0x3e0   : > { %v4395_v61 = vadd.f32 %v4325_v38, %v4250_v50  ;;  %v11914_v36 = vpop.f32.mrf.mxu0  ;;  %v8777_v50 = vunpack.i.l.bf16 %v8776_v26  ;;  %v8791_v38 = vpop.permute.xlu2 %8790  ;;  %v7783_v26 = vld [vmem:[%s13002_s1 + $0x488] sm:$0xff] }
 0x3e1   : > { %v4473_v46 = vpop.f32.mrf.mxu2  ;;  %v8792_v53 = vunpack.i.l.bf16 %v8791_v38  ;;  %v8793_v2 = vunpack.i.h.bf16 %v8791_v38 }
 0x3e2   : > { %v11916_v14 = vpop.f32.mrf.mxu1  ;;  %v11918_v25 = vadd.f32 %v4470_v24, %v4395_v61  ;;  %v4256_v61 = vadd.f32 %v11831_v58, %v4111_v11  ;;  %v5589_v58 = vsel %vm5584_vm13, %v8758_v42, %v8777_v50  ;;  %v4393_v42 = vadd.f32 %v11856_v13, %v4248_v4 }
 0x3e3   : > { %7764 = vmatmul.msk.f32.gmra.mxu0 %vm215_vm1, %v11791_v6  ;;  %v5590_v11 = vsel %vm5584_vm13, %v8777_v50, %v8792_v53  ;;  %v5587_v8 = vsel %vm5584_vm13, %v8778_v33, %v8793_v2 }
 0x3e4   : > { %7760 = vmatmul.msk.f32.gmra.mxu3 %vm215_vm1, %v11791_v6 }
 0x3e5   : > { %7772 = vmatmul.msk.f32.gmra.mxu1 %vm215_vm1, %v11898_v29 }
 0x3e6   : > { %7777 = vmatmul.msk.f32.gmra.mxu2 %vm215_vm1, %v11923_v15 }
 0x3e7   : > { %v4328_v22 = vpop.f32.mrf.mxu3 }
 0x3e8   : > { %v4398_v12 = vadd.f32 %v4328_v22, %v4253_v44  ;;  %v11940_v20 = vpop.f32.mrf.mxu0  ;;  %v8796_v44 = vpop.permute.xlu0 %8795 }
 0x3e9   : > { %v4476_v24 = vpop.f32.mrf.mxu2  ;;  %v8797_v52 = vunpack.i.l.bf16 %v8796_v44  ;;  %v8798_v50 = vunpack.i.h.bf16 %v8796_v44 }
 0x3ea   : > { %v11942_v6 = vpop.f32.mrf.mxu1  ;;  %v11944_v16 = vadd.f32 %v4473_v46, %v4398_v12 }
 0x3eb   : > { %7765 = vmatmul.msk.f32.gmra.mxu0 %vm215_vm1, %v11814_v5  ;;  %v5733_v59 = vsel %vm5729_vm14, %v8797_v52, %v8782_v27 }
 0x3ec   : > { %7761 = vmatmul.msk.f32.gmra.mxu3 %vm215_vm1, %v11814_v5  ;;  %v8783_v5 = vunpack.i.h.bf16 %v11937_v7 }
 0x3ed   : > { %7773 = vmatmul.msk.f32.gmra.mxu1 %vm215_vm1, %v11923_v15 }
 0x3ee   : > { %7794 = vmatmul.msk.f32.vlgmr.msrb.gmra.mxu2 %vm215_vm1, %v7782_v48  ;;  %v5734_v39 = vsel %vm5729_vm14, %v8782_v27, %v8783_v5 }
 0x3ef   : > { %v4331_v9 = vpop.f32.mrf.mxu3  ;;  %5797 = vmatpush.msrb.mxu2 %v5734_v39 }
 0x3f0   : > { %v4401_v46 = vadd.f32 %v4331_v9, %v4256_v61  ;;  %v11966_v18 = vpop.f32.mrf.mxu0  ;;  %v7784_v9 = vld [vmem:[%s13002_s1 + $0x490] sm:$0xff] }
 0x3f1   : > { %v4641_v40 = vpop.f32.mrf.mxu2 }
 0x3f2   : > { %v11964_v22 = vadd.f32 %v4476_v24, %v4401_v46  ;;  %v11968_v12 = vpop.f32.mrf.mxu1  ;;  %v5586_v24 = vsel %vm5584_vm13, %v8763_v28, %v8778_v33  ;;  %v4251_v46 = vadd.f32 %v11784_v54, %v11717_v23 }
 0x3f3   : > { %7786 = vmatmul.msk.f32.vlgmr.msrb.gmra.mxu0 %vm215_vm1, %v7782_v48 }
 0x3f4   : > { %7778 = vmatmul.msk.f32.vlgmr.msrb.gmra.mxu3 %vm215_vm1, %v11840_v47  ;;  %5681 = vmatpush.msrb.mxu0 %v5590_v11  ;;  %v4396_v44 = vadd.f32 %v11889_v60, %v4251_v46  ;;  %v4254_v60 = vadd.f32 %v11807_v41, %v11735_v21  ;;  %v8806_v11 = vpop.permute.xlu2 %8805  ;;  %v12031_v41 = vpop.permute.xlu0 %8810 }
 0x3f5   : > { %7790 = vmatmul.msk.f32.vlgmr.msrb.gmra.mxu1 %vm215_vm1, %v7782_v48  ;;  %5652 = vmatpush.msrb.mxu3 %v5589_v58  ;;  %v11991_v48 = vpop.permute.xlu1 %8785  ;;  %v8807_v39 = vunpack.i.l.bf16 %v8806_v11 }
 0x3f6   : > { %7795 = vmatmul.msk.f32.gmra.mxu2 %vm215_vm1, %v7783_v26  ;;  %5768 = vmatpush.msrb.mxu1 %v5733_v59  ;;  %v8787_v53 = vunpack.i.l.bf16 %v11991_v48  ;;  %v8788_v58 = vunpack.i.h.bf16 %v11991_v48  ;;  %v4399_v4 = vadd.f32 %v11914_v36, %v4254_v60  ;;  %v8808_v59 = vunpack.i.h.bf16 %v8806_v11 }
 0x3f7   : > { %v4496_v47 = vpop.f32.mrf.mxu3  ;;  %5653 = vmatpush.msrb.mxu3 %v5586_v24  ;;  %5682 = vmatpush.msrb.mxu0 %v5587_v8 }
 0x3f8   : > { %v4538_v28 = vadd.f32 %v4496_v47, %v4393_v42  ;;  %v11993_v38 = vpop.f32.mrf.mxu0  ;;  %v5730_v2 = vsel %vm5729_vm14, %v8798_v50, %v8787_v53  ;;  %v5731_v24 = vsel %vm5729_vm14, %v8787_v53, %v8788_v58  ;;  %v8812_v47 = vunpack.i.l.bf16 %v12031_v41  ;;  %v12044_v50 = vld [vmem:[%s13002_s1 + $0x4c0] sm:$0xff] }
 0x3f9   : > { %v4644_v33 = vpop.f32.mrf.mxu2  ;;  %5769 = vmatpush.msrb.mxu1 %v5730_v2  ;;  %5798 = vmatpush.msrb.mxu2 %v5731_v24 }
 0x3fa   : > { %v11995_v13 = vpop.f32.mrf.mxu1  ;;  %v11997_v61 = vadd.f32 %v4641_v40, %v4538_v28 }
 0x3fb   : > { %7787 = vmatmul.msk.f32.gmra.mxu0 %vm215_vm1, %v7783_v26 }
 0x3fc   : > { %7779 = vmatmul.msk.f32.gmra.mxu3 %vm215_vm1, %v11865_v30  ;;  %v7785_v30 = vld [vmem:[%s13002_s1 + $0x498] sm:$0xff] }
 0x3fd   : > { %7791 = vmatmul.msk.f32.gmra.mxu1 %vm215_vm1, %v7783_v26  ;;  %v8801_v8 = vpop.permute.xlu1 %8800 }
 0x3fe   : > { %7796 = vmatmul.msk.f32.gmra.mxu2 %vm215_vm1, %v7784_v9  ;;  %v8802_v46 = vunpack.i.l.bf16 %v8801_v8 }
 0x3ff   : > { %v4499_v27 = vpop.f32.mrf.mxu3 }
 0x400   : > { %v4541_v52 = vadd.f32 %v4499_v27, %v4396_v44  ;;  %v12013_v40 = vpop.f32.mrf.mxu0  ;;  %v5735_v11 = vsel %vm5729_vm14, %v8783_v5, %v8802_v46 }
 0x401   : > { %v4647_v26 = vpop.f32.mrf.mxu2 }
 0x402   : > { %v12015_v23 = vpop.f32.mrf.mxu1  ;;  %v12017_v54 = vadd.f32 %v4644_v33, %v4541_v52  ;;  %v5880_v33 = vsel %vm5874_vm15, %v8807_v39, %v8808_v59  ;;  %v7798_v52 = vld [vmem:[%s13002_s1 + $0x4a0] sm:$0xff] }
 0x403   : > { %7788 = vmatmul.msk.f32.gmra.mxu0 %vm215_vm1, %v7784_v9 }
 0x404   : > { %7780 = vmatmul.msk.f32.gmra.mxu3 %vm215_vm1, %v11898_v29  ;;  %v8813_v29 = vunpack.i.h.bf16 %v12031_v41  ;;  %v12172_v41 = vld [vmem:[%s13002_s1 + $0x4e0] sm:$0xff] }
 0x405   : > { %7792 = vmatmul.msk.f32.gmra.mxu1 %vm215_vm1, %v7784_v9  ;;  %v4257_v9 = vadd.f32 %v11833_v49, %v11754_v0  ;;  %v8803_v49 = vunpack.i.h.bf16 %v8801_v8  ;;  %v8816_v27 = vpop.permute.xlu1 %8815  ;;  %v4394_v8 = vadd.f32 %v11858_v10, %v11786_v51  ;;  %v12087_v10 = vld [vmem:[%s9121_s28 + $0x28] sm:$0xff] }
 0x406   : > { %7797 = vmatmul.msk.f32.gmra.mxu2 %vm215_vm1, %v7785_v30  ;;  %v5877_v44 = vsel %vm5874_vm15, %v8812_v47, %v8813_v29  ;;  %v8817_v29 = vunpack.i.l.bf16 %v8816_v27 }
 0x407   : > { %v4502_v42 = vpop.f32.mrf.mxu3  ;;  %v4402_v2 = vadd.f32 %v11940_v20, %v4257_v9  ;;  %v4539_v7 = vadd.f32 %v11966_v18, %v4394_v8  ;;  %v7799_v18 = vld [vmem:[%s13002_s1 + $0x4a8] sm:$0xff] }
 0x408   : > { %v4544_v21 = vadd.f32 %v4502_v42, %v4399_v4  ;;  %v12035_v28 = vpop.f32.mrf.mxu0  ;;  %v12074_v4 = vld [vmem:[%s13002_s1 + $0x4c8] sm:$0xff]  ;;  %v5732_v42 = vsel %vm5729_vm14, %v8788_v58, %v8803_v49 }
 0x409   : > { %v4650_v53 = vpop.f32.mrf.mxu2 }
 0x40a   : > { %v12037_v48 = vpop.f32.mrf.mxu1  ;;  %v12039_v36 = vadd.f32 %v4647_v26, %v4544_v21  ;;  %v12090_v21 = vld [vmem:[%s9121_s28 + $0x30] sm:$0xff] }
 0x40b   : > { %7789 = vmatmul.msk.f32.gmra.mxu0 %vm215_vm1, %v7785_v30  ;;  %v12094_v58 = vpack.i.bf16 %v12090_v21, %v12087_v10 }
 0x40c   : > { %7781 = vmatmul.msk.f32.gmra.mxu3 %vm215_vm1, %v11923_v15 }
 0x40d   : > { %7793 = vmatmul.msk.f32.gmra.mxu1 %vm215_vm1, %v7785_v30  ;;  %v8818_v30 = vunpack.i.h.bf16 %v8816_v27  ;;  %8870 = vrot.lane.b32.xlu0 %v12094_v58, %s9041_s19 }
 0x40e   : > { %7818 = vmatmul.msk.f32.vlgmr.msra.gmra.mxu2 %vm215_vm1, %v12044_v50  ;;  %8860 = vrot.lane.b32.xlu1 %v12094_v58, %s9042_s26 }
 0x40f   : > { %v4505_v0 = vpop.f32.mrf.mxu3  ;;  %5971 = vmatpush.msra.mxu2 %v5880_v33  ;;  %v5879_v5 = vsel %vm5874_vm15, %v8818_v30, %v8807_v39  ;;  %v12110_v33 = vld [vmem:[%s13002_s1 + $0x4d0] sm:$0xff] }
 0x410   : > { %v4547_v15 = vadd.f32 %v4505_v0, %v4402_v2  ;;  %v12064_v20 = vpop.f32.mrf.mxu0  ;;  %v4397_v2 = vadd.f32 %v11891_v1, %v11809_v31  ;;  %v12124_v1 = vld [vmem:[%s9121_s28 + $0x18] sm:$0xff] }
 0x411   : > { %5972 = vmatpush.msra.mxu2 %v5877_v44  ;;  %v4815_v24 = vpop.f32.mrf.mxu2  ;;  %v5878_v44 = vsel %vm5874_vm15, %v8817_v29, %v8818_v30  ;;  %v7800_v30 = vld [vmem:[%s13002_s1 + $0x4b0] sm:$0xff] }
 0x412   : > { %v12062_v26 = vadd.f32 %v4650_v53, %v4547_v15  ;;  %v12066_v60 = vpop.f32.mrf.mxu1  ;;  %v4542_v0 = vadd.f32 %v11993_v38, %v4397_v2  ;;  %v12127_v15 = vld [vmem:[%s9121_s28 + $0x38] sm:$0xff] }
 0x413   : > { %7806 = vmatmul.msk.f32.vlgmr.msra.gmra.mxu0 %vm215_vm1, %v7798_v52  ;;  %v12131_v27 = vpack.i.bf16 %v12124_v1, %v12127_v15 }
 0x414   : > { %7802 = vmatmul.msk.f32.vlgmr.msra.gmra.mxu3 %vm215_vm1, %v7798_v52  ;;  %5913 = vmatpush.msra.mxu0 %v5878_v44 }
 0x415   : > { %7810 = vmatmul.msk.f32.vlgmr.msra.gmra.mxu1 %vm215_vm1, %v7798_v52  ;;  %5826 = vmatpush.msra.mxu3 %v5735_v11  ;;  %v8821_v52 = vpop.permute.xlu2 %8820 }
 0x416   : > { %7819 = vmatmul.msk.f32.gmra.mxu2 %vm215_vm1, %v12074_v4  ;;  %5942 = vmatpush.msra.mxu1 %v5879_v5  ;;  %v8823_v38 = vunpack.i.h.bf16 %v8821_v52  ;;  %v4400_v5 = vadd.f32 %v11916_v14, %v11835_v34  ;;  %v8822_v14 = vunpack.i.l.bf16 %v8821_v52  ;;  %v4403_v52 = vadd.f32 %v11942_v6, %v11854_v3 }
 0x417   : > { %v4670_v59 = vpop.f32.mrf.mxu3  ;;  %5827 = vmatpush.msra.mxu3 %v5732_v42  ;;  %8885 = vrot.lane.b32.xlu0 %v12131_v27, %s9041_s19  ;;  %v12147_v42 = vld [vmem:[%s13002_s1 + $0x4d8] sm:$0xff] }
 0x418   : > { %v4684_v51 = vadd.f32 %v4670_v59, %v4539_v7  ;;  %v12099_v53 = vpop.f32.mrf.mxu0  ;;  %v8826_v59 = vpop.permute.xlu0 %8825  ;;  %v5876_v29 = vsel %vm5874_vm15, %v8823_v38, %v8812_v47 }
 0x419   : > { %v4818_v46 = vpop.f32.mrf.mxu2  ;;  %5943 = vmatpush.msra.mxu1 %v5876_v29  ;;  %v4548_v29 = vadd.f32 %v12035_v28, %v4403_v52 }
 0x41a   : > { %v12101_v39 = vpop.f32.mrf.mxu1  ;;  %v12103_v9 = vadd.f32 %v4815_v24, %v4684_v51  ;;  %v4545_v51 = vadd.f32 %v12013_v40, %v4400_v5  ;;  %v8828_v5 = vunpack.i.h.bf16 %v8826_v59 }
 0x41b   : > { %7807 = vmatmul.msk.f32.gmra.mxu0 %vm215_vm1, %v7799_v18 }
 0x41c   : > { %7803 = vmatmul.msk.f32.gmra.mxu3 %vm215_vm1, %v7799_v18 }
 0x41d   : > { %7811 = vmatmul.msk.f32.gmra.mxu1 %vm215_vm1, %v7799_v18 }
 0x41e   : > { %7820 = vmatmul.msk.f32.gmra.mxu2 %vm215_vm1, %v12110_v33 }
 0x41f   : > { %v4673_v49 = vpop.f32.mrf.mxu3 }
 0x420   : > { %v4687_v31 = vadd.f32 %v4673_v49, %v4542_v0  ;;  %v12136_v11 = vpop.f32.mrf.mxu0  ;;  %v12175_v0 = vld [vmem:[%s9121_s28 + $0x8] sm:$0xff]  ;;  %v12178_v49 = vld [vmem:[%s9121_s28 + $0x10] sm:$0xff]  ;;  %s12934_s28 = scalar_lea.vmem [#allocation2], %s8000_s11 }
 0x421   : > { %v4821_v7 = vpop.f32.mrf.mxu2  ;;  %s7139_s16 = sshll.u32 %s12934_s28, 4  ;;  %s7140_s16 = int_to_ptr.vmem [resolvable:$true] %s7139_s16 }
 0x422   : > { %v12138_v24 = vpop.f32.mrf.mxu1  ;;  %v12140_v8 = vadd.f32 %v4818_v46, %v4687_v31  ;;  %v7801_v46 = vld [vmem:[%s13002_s1 + $0x4b8] sm:$0xff]  ;;  %v12182_v31 = vpack.i.bf16 %v12178_v49, %v12175_v0 }
 0x423   : > { %7808 = vmatmul.msk.f32.gmra.mxu0 %vm215_vm1, %v7800_v30 }
 0x424   : > { %13009 = vst [vmem:[#allocation6_spill] sm:$0xff] %v12140_v8  ;;  %7804 = vmatmul.msk.f32.gmra.mxu3 %vm215_vm1, %v7800_v30  ;;  %8865 = vrot.lane.b32.xlu2 %v12182_v31, %s9042_s26 }
 0x425   : > { %7812 = vmatmul.msk.f32.gmra.mxu1 %vm215_vm1, %v7800_v30  ;;  %v5875_v30 = vsel %vm5874_vm15, %v8822_v14, %v8823_v38  ;;  %v8841_v14 = vpop.permute.xlu0 %8840  ;;  %8875 = vrot.lane.b32.xlu1 %v12182_v31, %s9041_s19  ;;  %s7127_s19 = scalar_lea.sflag [#allocation3], %s161_s10 }
 0x426   : > { %7821 = vmatmul.msk.f32.gmra.mxu2 %vm215_vm1, %v12147_v42  ;;  %5914 = vmatpush.msra.mxu0 %v5875_v30  ;;  %v8842_v8 = vunpack.i.l.bf16 %v8841_v14 }
 0x427   : > { %v4676_v18 = vpop.f32.mrf.mxu3 }
 0x428   : > { %v4690_v34 = vadd.f32 %v4676_v18, %v4545_v51  ;;  %v12163_v2 = vpop.f32.mrf.mxu0  ;;  %v8827_v51 = vunpack.i.l.bf16 %v8826_v59  ;;  %v12195_v18 = vpop.permute.xlu1 %8830  ;;  %v8843_v59 = vunpack.i.h.bf16 %v8841_v14 }
 0x429   : > { %v4824_v47 = vpop.f32.mrf.mxu2  ;;  %v8832_v38 = vunpack.i.l.bf16 %v12195_v18 }
 0x42a   : > { %v12165_v44 = vpop.f32.mrf.mxu1  ;;  %v12167_v40 = vadd.f32 %v4821_v7, %v4690_v34  ;;  %v8836_v7 = vpop.permute.xlu2 %8835 }
 0x42b   : > { %7809 = vmatmul.msk.f32.gmra.mxu0 %vm215_vm1, %v7801_v46  ;;  %v8838_v3 = vunpack.i.h.bf16 %v8836_v7  ;;  %v8837_v6 = vunpack.i.l.bf16 %v8836_v7  ;;  %v12211_v7 = vld [vmem:[%s13002_s1 + $0x4e8] sm:$0xff] }
 0x42c   : > { %13010 = vst [vmem:[#allocation7_spill] sm:$0xff] %v12167_v40  ;;  %7805 = vmatmul.msk.f32.gmra.mxu3 %vm215_vm1, %v7801_v46  ;;  %8880 = vrot.lane.b32.xlu2 %v12131_v27, %s9042_s26 }
 0x42d   : > { %7813 = vmatmul.msk.f32.gmra.mxu1 %vm215_vm1, %v7801_v46  ;;  %v8833_v46 = vunpack.i.h.bf16 %v12195_v18 }
 0x42e   : > { %7838 = vmatmul.msk.f32.vlgmr.msrb.gmra.mxu2 %vm215_vm1, %v12172_v41 }
 0x42f   : > { %6184 = vmatpush.msrb.mxu2 %v9349_v17  ;;  %v4679_v34 = vpop.f32.mrf.mxu3  ;;  %v6023_v17 = vsel %vm6019_vm0, %v8827_v51, %v8828_v5  ;;  %v6022_v51 = vsel %vm6019_vm0, %v8842_v8, %v8843_v59 }
 0x430   : > { %v4693_v40 = vadd.f32 %v4679_v34, %v4548_v29  ;;  %v12203_v52 = vpop.f32.mrf.mxu0  ;;  %v6024_v29 = vsel %vm6019_vm0, %v8828_v5, %v8837_v6 }
 0x431   : > { %6185 = vmatpush.msrb.mxu2 %v9362_v19  ;;  %v5047_v18 = vpop.f32.mrf.mxu2  ;;  %v6025_v19 = vsel %vm6019_vm0, %v8837_v6, %v8838_v3  ;;  %v4685_v6 = vadd.f32 %v11995_v13, %v11918_v25  ;;  %v8899_v25 = vpack.i.bf16 %v12175_v0, %v12087_v10  ;;  %v4688_v10 = vadd.f32 %v12015_v23, %v11944_v16 }
 0x432   : > { %v12201_v28 = vadd.f32 %v4824_v47, %v4693_v40  ;;  %v12205_v30 = vpop.f32.mrf.mxu1  ;;  %v4682_v40 = vadd.f32 %v11968_v12, %v11893_v32  ;;  %v6020_v47 = vsel %vm6019_vm0, %v8832_v38, %v8833_v46 }
 0x433   : > { %7826 = vmatmul.msk.f32.vlgmr.msrb.gmra.mxu0 %vm215_vm1, %v12044_v50  ;;  %v4830_v14 = vadd.f32 %v12099_v53, %v4685_v6  ;;  %8900 = vrot.lane.b32.xlu0 %v8899_v25, %s9043_s5  ;;  %v12269_v53 = vld [vmem:[%s13002_s1 + $0x4f8] sm:$0xff]  ;;  %v4833_v0 = vadd.f32 %v12136_v11, %v4688_v10  ;;  %v7846_v11 = vld [vmem:[%s13002_s1 + $0x500] sm:$0xff]  ;;  %v7847_v25 = vld [vmem:[%s13002_s1 + $0x508] sm:$0xff] }
 0x434   : > { %7822 = vmatmul.msk.f32.vlgmr.msrb.gmra.mxu3 %vm215_vm1, %v12044_v50  ;;  %v4827_v3 = vadd.f32 %v12064_v20, %v4682_v40  ;;  %6087 = vmatpush.msrb.mxu0 %v6024_v29  ;;  %v12241_v20 = vld [vmem:[%s13002_s1 + $0x4f0] sm:$0xff]  ;;  %v12283_v40 = vpop.permute.xlu2 %8850 }
 0x435   : > { %7834 = vmatmul.msk.f32.vlgmr.msrb.gmra.mxu1 %vm215_vm1, %v12172_v41  ;;  %6058 = vmatpush.msrb.mxu3 %v6023_v17 }
 0x436   : > { %7839 = vmatmul.msk.f32.gmra.mxu2 %vm215_vm1, %v12211_v7  ;;  %6116 = vmatpush.msrb.mxu1 %v6025_v19 }
 0x437   : > { %v4902_v32 = vpop.f32.mrf.mxu3  ;;  %6059 = vmatpush.msrb.mxu3 %v6020_v47  ;;  %v8852_v47 = vunpack.i.l.bf16 %v12283_v40 }
 0x438   : > { %v4972_v12 = vadd.f32 %v4902_v32, %v4827_v3  ;;  %6117 = vmatpush.msrb.mxu1 %v6022_v51  ;;  %v12232_v50 = vpop.f32.mrf.mxu0  ;;  %v4691_v3 = vadd.f32 %v12037_v48, %v11964_v22  ;;  %v8846_v32 = vpop.permute.xlu1 %8845 }
 0x439   : > { %v5050_v5 = vpop.f32.mrf.mxu2  ;;  %v8847_v48 = vunpack.i.l.bf16 %v8846_v32 }
 0x43a   : > { %v12234_v34 = vpop.f32.mrf.mxu1  ;;  %v12236_v38 = vadd.f32 %v5047_v18, %v4972_v12  ;;  %v8889_v18 = vpack.i.bf16 %v12127_v15, %v12090_v21  ;;  %v6021_v15 = vsel %vm6019_vm0, %v8833_v46, %v8842_v8  ;;  %v8853_v46 = vunpack.i.h.bf16 %v12283_v40 }
 0x43b   : > { %7827 = vmatmul.msk.f32.gmra.mxu0 %vm215_vm1, %v12074_v4  ;;  %v4836_v12 = vadd.f32 %v12163_v2, %v4691_v3  ;;  %8915 = vrot.lane.b32.xlu0 %v12182_v31, %s9044_s4 }
 0x43c   : > { %7823 = vmatmul.msk.f32.gmra.mxu3 %vm215_vm1, %v12074_v4  ;;  %8890 = vrot.lane.b32.xlu1 %v8889_v18, %s9043_s5 }
 0x43d   : > { %7835 = vmatmul.msk.f32.gmra.mxu1 %vm215_vm1, %v12211_v7  ;;  %6088 = vmatpush.msrb.mxu0 %v6021_v15 }
 0x43e   : > { %7840 = vmatmul.msk.f32.gmra.mxu2 %vm215_vm1, %v12241_v20 }
 0x43f   : > { %v4905_v59 = vpop.f32.mrf.mxu3 }
 0x440   : > { %v4975_v17 = vadd.f32 %v4905_v59, %v4830_v14  ;;  %v12258_v13 = vpop.f32.mrf.mxu0  ;;  %v8848_v14 = vunpack.i.h.bf16 %v8846_v32  ;;  %v12387_v32 = vld [vmem:[%s13002_s1 + $0x540] sm:$0xff] }
 0x441   : > { %v5053_v21 = vpop.f32.mrf.mxu2 }
 0x442   : > { %v12260_v19 = vpop.f32.mrf.mxu1  ;;  %v12262_v4 = vadd.f32 %v5050_v5, %v4975_v17  ;;  %v6279_v5 = vsel %vm848_vm5, %v9407_v35, %v8852_v47  ;;  %v4828_v35 = vadd.f32 %v12066_v60, %v11997_v61  ;;  %v6152_v61 = vsel %vm709_vm4, %v9317_v63, %v8848_v14  ;;  %v7848_v63 = vld [vmem:[%s13002_s1 + $0x510] sm:$0xff] }
 0x443   : > { %7828 = vmatmul.msk.f32.gmra.mxu0 %vm215_vm1, %v12110_v33 }
 0x444   : > { %7824 = vmatmul.msk.f32.gmra.mxu3 %vm215_vm1, %v12110_v33  ;;  %8905 = vrot.lane.b32.xlu1 %v12131_v27, %s9044_s4  ;;  %v7849_v27 = vld [vmem:[%s13002_s1 + $0x518] sm:$0xff] }
 0x445   : > { %7836 = vmatmul.msk.f32.gmra.mxu1 %vm215_vm1, %v12241_v20 }
 0x446   : > { %7841 = vmatmul.msk.f32.gmra.mxu2 %vm215_vm1, %v12269_v53 }
 0x447   : > { %v4908_v16 = vpop.f32.mrf.mxu3 }
 0x448   : > { %v4978_v23 = vadd.f32 %v4908_v16, %v4833_v0  ;;  %v12286_v51 = vpop.f32.mrf.mxu0 }
 0x449   : > { %v5056_v8 = vpop.f32.mrf.mxu2 }
 0x44a   : > { %v12288_v33 = vpop.f32.mrf.mxu1  ;;  %v12290_v29 = vadd.f32 %v5053_v21, %v4978_v23  ;;  %v4973_v21 = vadd.f32 %v12203_v52, %v4828_v35 }
 0x44b   : > { %7829 = vmatmul.msk.f32.gmra.mxu0 %vm215_vm1, %v12147_v42 }
 0x44c   : > { %7825 = vmatmul.msk.f32.gmra.mxu3 %vm215_vm1, %v12147_v42  ;;  %v6278_v42 = vsel %vm848_vm5, %v9410_v37, %v8853_v46  ;;  %v6153_v37 = vsel %vm709_vm4, %v9309_v62, %v8847_v48  ;;  %vm6538_vm4 = vcmask 990208   ;;  %vm6677_vm5 = vcmask 982016  }
 0x44d   : > { %7837 = vmatmul.msk.f32.gmra.mxu1 %vm215_vm1, %v12269_v53 }
 0x44e   : > { %7858 = vmatmul.msk.f32.vlgmr.msra.gmra.mxu2 %vm215_vm1, %v7846_v11 }
 0x44f   : > { %6339 = vmatpush.msra.mxu2 %v6279_v5  ;;  %v4911_v22 = vpop.f32.mrf.mxu3 }
 0x450   : > { %v4981_v6 = vadd.f32 %v4911_v22, %v4836_v12  ;;  %v12316_v2 = vpop.f32.mrf.mxu0 }
 0x451   : > { %6340 = vmatpush.msra.mxu2 %v6278_v42  ;;  %v5221_v18 = vpop.f32.mrf.mxu2 }
 0x452   : > { %v12314_v59 = vadd.f32 %v5056_v8, %v4981_v6  ;;  %v12318_v17 = vpop.f32.mrf.mxu1  ;;  %v8856_v8 = vpop.permute.xlu0 %8855 }
 0x453   : > { %7850 = vmatmul.msk.f32.vlgmr.msra.gmra.mxu0 %vm215_vm1, %v7846_v11  ;;  %v8857_v12 = vunpack.i.l.bf16 %v8856_v8  ;;  %v8858_v22 = vunpack.i.h.bf16 %v8856_v8 }
 0x454   : > { %7842 = vmatmul.msk.f32.vlgmr.msra.gmra.mxu3 %vm215_vm1, %v12172_v41  ;;  %6242 = vmatpush.msra.mxu0 %v8847_v48 }
 0x455   : > { %7854 = vmatmul.msk.f32.vlgmr.msra.gmra.mxu1 %vm215_vm1, %v7846_v11  ;;  %6213 = vmatpush.msra.mxu3 %v6153_v37  ;;  %v6405_v35 = vsel %vm987_vm6, %v9486_v55, %v8857_v12  ;;  %v7863_v55 = vld [vmem:[%s13002_s1 + $0x528] sm:$0xff] }
 0x456   : > { %6310 = vmatpush.msra.mxu1 %v9425_v43  ;;  %7859 = vmatmul.msk.f32.gmra.mxu2 %vm215_vm1, %v7847_v25  ;;  %v4831_v43 = vadd.f32 %v12101_v39, %v12017_v54 }
 0x457   : > { %6214 = vmatpush.msra.mxu3 %v6152_v61  ;;  %v5076_v60 = vpop.f32.mrf.mxu3  ;;  %6243 = vmatpush.msra.mxu0 %v8848_v14  ;;  %v12448_v61 = vld [vmem:[%s13002_s1 + $0x550] sm:$0xff] }
 0x458   : > { %6311 = vmatpush.msra.mxu1 %v9436_v45  ;;  %v5118_v62 = vadd.f32 %v5076_v60, %v4973_v21  ;;  %v12337_v41 = vpop.f32.mrf.mxu0  ;;  %v8894_v45 = vpack.i.bf16 %v12124_v1, %v12178_v49  ;;  %v4976_v0 = vadd.f32 %v12232_v50, %v4831_v43  ;;  %v4834_v49 = vadd.f32 %v12138_v24, %v12039_v36 }
 0x459   : > { %v5224_v52 = vpop.f32.mrf.mxu2 }
 0x45a   : > { %v12339_v10 = vpop.f32.mrf.mxu1  ;;  %v12341_v15 = vadd.f32 %v5221_v18, %v5118_v62  ;;  %8895 = vrot.lane.b32.xlu2 %v8894_v45, %s9043_s5  ;;  %v4979_v50 = vadd.f32 %v12258_v13, %v4834_v49  ;;  %v4837_v13 = vadd.f32 %v12165_v44, %v12062_v26  ;;  %v7862_v26 = vld [vmem:[%s13002_s1 + $0x520] sm:$0xff]  ;;  %v12414_v18 = vld [vmem:[%s13002_s1 + $0x548] sm:$0xff]  ;;  %s7138_s5 = scalar_lea.hbm %s13004_s3, %s8001_s17 }
 0x45b   : > { %7851 = vmatmul.msk.f32.gmra.mxu0 %vm215_vm1, %v7847_v25  ;;  %s7141_s6 = sshll.u32 %s7138_s5, 4  ;;  %s7142_s6 = int_to_ptr.hbm [resolvable:$true] %s7141_s6 }
 0x45c   : > { %7843 = vmatmul.msk.f32.gmra.mxu3 %vm215_vm1, %v12211_v7  ;;  %v4982_v5 = vadd.f32 %v12286_v51, %v4837_v13  ;;  %v4974_v51 = vadd.f32 %v12205_v30, %v12103_v9  ;;  %v6404_v9 = vsel %vm987_vm6, %v9492_v56, %v8858_v22  ;;  %v12494_v13 = vld [vmem:[%s13002_s1 + $0x560] sm:$0xff]  ;;  %vm6816_vm6 = vcmask 973824   ;;  %s8950_s25 = sshra.s32 %s7142_s6, 4  ;;  %s8951_s25 = int_to_ptr.hbm [resolvable:$true] %s8950_s25 }
 0x45d   : > { %7855 = vmatmul.msk.f32.gmra.mxu1 %vm215_vm1, %v7847_v25  ;;  %v13011_v25 = vld [vmem:[#allocation5_spill] sm:$0xff]  ;;  %s8952_s7 = scalar_lea.hbm %s8951_s25, 96  ;;  %p8957_p0 = scmp.lt.s32.totalorder %s8951_s25, %s13004_s3 }
 0x45e   : > { %7860 = vmatmul.msk.f32.gmra.mxu2 %vm215_vm1, %v7848_v63  ;;  %v5119_v37 = vadd.f32 %v12316_v2, %v4974_v51  ;;  %v13012_v2 = vld [vmem:[#allocation6_spill] sm:$0xff]  ;;  %p8953_p11 = scmp.ne.s32.totalorder %s8951_s25, %s8952_s7  ;;  %p8958_p1 = scmp.lt.s32.totalorder %s8956_s29, %s8952_s7 }
 0x45f   : > { %v5079_v16 = vpop.f32.mrf.mxu3  ;;  %v4977_v21 = vadd.f32 %v12234_v34, %v13012_v2  ;;  %v7864_v34 = vld [vmem:[%s13002_s1 + $0x530] sm:$0xff] }
 0x460   : > { %v5121_v54 = vadd.f32 %v5079_v16, %v4976_v0  ;;  %v12359_v39 = vpop.f32.mrf.mxu0  ;;  %v13013_v0 = vld [vmem:[#allocation7_spill] sm:$0xff]  ;;  %p8954_p12 = pnand %p8953_p11, %p9106_p5  ;;  %p8959_p2 = por %p8958_p1, %p8957_p0 }
 0x461   : > { %v5227_v1 = vpop.f32.mrf.mxu2  ;;  %v4980_v16 = vadd.f32 %v12260_v19, %v13013_v0  ;;  %v7865_v19 = vld [vmem:[%s13002_s1 + $0x538] sm:$0xff] }
 0x462   : > { %v12361_v7 = vpop.f32.mrf.mxu1  ;;  %v12363_v23 = vadd.f32 %v5224_v52, %v5121_v54  ;;  %8910 = vrot.lane.b32.xlu2 %v12094_v58, %s9044_s4  ;;  %v5122_v58 = vadd.f32 %v12337_v41, %v4977_v21  ;;  %v12470_v41 = vld [vmem:[%s13002_s1 + $0x558] sm:$0xff]  ;;  %p8955_p13 = pneg %p8954_p12 }
 0x463   : > { %7852 = vmatmul.msk.f32.gmra.mxu0 %vm215_vm1, %v7848_v63  ;;  %v5125_v54 = vadd.f32 %v12359_v39, %v4980_v16  ;;  %v4983_v39 = vadd.f32 %v12288_v33, %v12201_v28  ;;  %v5265_v16 = vadd.f32 %v12339_v10, %v12262_v4 }
 0x464   : > { %7844 = vmatmul.msk.f32.gmra.mxu3 %vm215_vm1, %v12241_v20  ;;  %p8960_p3 = pnand %p8959_p2, %p8955_p13 }
 0x465   : > { %7856 = vmatmul.msk.f32.gmra.mxu1 %vm215_vm1, %v7848_v63 }
 0x466   : > { %7861 = vmatmul.msk.f32.gmra.mxu2 %vm215_vm1, %v7849_v27 }
 0x467   : > { %v5082_v31 = vpop.f32.mrf.mxu3 }
 0x468   : > { %v5124_v11 = vadd.f32 %v5082_v31, %v4979_v50  ;;  %v12378_v3 = vpop.f32.mrf.mxu0 }
 0x469   : > { %v5230_v20 = vpop.f32.mrf.mxu2 }
 0x46a   : > { %v12380_v36 = vpop.f32.mrf.mxu1  ;;  %v12382_v24 = vadd.f32 %v5227_v1, %v5124_v11 }
 0x46b   : > { %7853 = vmatmul.msk.f32.gmra.mxu0 %vm215_vm1, %v7849_v27 }
 0x46c   : > { %7845 = vmatmul.msk.f32.gmra.mxu3 %vm215_vm1, %v12269_v53 }
 0x46d   : > { %7857 = vmatmul.msk.f32.gmra.mxu1 %vm215_vm1, %v7849_v27 }
 0x46e   : > { %7882 = vmatmul.msk.f32.vlgmr.msrb.gmra.mxu2 %vm215_vm1, %v12387_v32 }
 0x46f   : > { %v5085_v48 = vpop.f32.mrf.mxu3  ;;  %6494 = vmatpush.msrb.mxu2 %v8857_v12 }
 0x470   : > { %v5127_v6 = vadd.f32 %v5085_v48, %v4982_v5  ;;  %v12403_v53 = vpop.f32.mrf.mxu0 }
 0x471   : > { %6495 = vmatpush.msrb.mxu2 %v8858_v22  ;;  %v5395_v14 = vpop.f32.mrf.mxu2 }
 0x472   : > { %v12401_v44 = vadd.f32 %v5230_v20, %v5127_v6  ;;  %v12405_v42 = vpop.f32.mrf.mxu1  ;;  %v5128_v20 = vadd.f32 %v12378_v3, %v4983_v39 }
 0x473   : > { %7870 = vmatmul.msk.f32.vlgmr.msrb.gmra.mxu0 %vm215_vm1, %v7862_v26 }
 0x474   : > { %7866 = vmatmul.msk.f32.vlgmr.msrb.gmra.mxu3 %vm215_vm1, %v7862_v26  ;;  %6436 = vmatpush.msrb.mxu0 %v9496_v57 }
 0x475   : > { %7874 = vmatmul.msk.f32.vlgmr.msrb.gmra.mxu1 %vm215_vm1, %v7862_v26  ;;  %6368 = vmatpush.msrb.mxu3 %v8852_v47 }
 0x476   : > { %6465 = vmatpush.msrb.mxu1 %v6405_v35  ;;  %7883 = vmatmul.msk.f32.gmra.mxu2 %vm215_vm1, %v12414_v18 }
 0x477   : > { %6369 = vmatpush.msrb.mxu3 %v8853_v46  ;;  %v5250_v30 = vpop.f32.mrf.mxu3  ;;  %6437 = vmatpush.msrb.mxu0 %v13011_v25 }
 0x478   : > { %6466 = vmatpush.msrb.mxu1 %v6404_v9  ;;  %v5264_v47 = vadd.f32 %v5250_v30, %v5119_v37  ;;  %v12435_v57 = vpop.f32.mrf.mxu0 }
 0x479   : > { %v5398_v46 = vpop.f32.mrf.mxu2 }
 0x47a   : > { %v12437_v40 = vpop.f32.mrf.mxu1  ;;  %v12439_v56 = vadd.f32 %v5395_v14, %v5264_v47 }
 0x47b   : > { %7871 = vmatmul.msk.f32.gmra.mxu0 %vm215_vm1, %v7863_v55 }
 0x47c   : > { %7867 = vmatmul.msk.f32.gmra.mxu3 %vm215_vm1, %v7863_v55 }
 0x47d   : > { %7875 = vmatmul.msk.f32.gmra.mxu1 %vm215_vm1, %v7863_v55  ;;  %v5262_v55 = vadd.f32 %v12318_v17, %v12236_v38  ;;  %v12520_v38 = vld [vmem:[%s13002_s1 + $0x568] sm:$0xff] }
 0x47e   : > { %7884 = vmatmul.msk.f32.gmra.mxu2 %vm215_vm1, %v12448_v61  ;;  %v8866_v49 = vpop.permute.xlu2 %8865 }
 0x47f   : > { %v5253_v60 = vpop.f32.mrf.mxu3  ;;  %v8868_v48 = vunpack.i.h.bf16 %v8866_v49  ;;  %v8867_v6 = vunpack.i.l.bf16 %v8866_v49  ;;  %v12498_v26 = vpop.permute.xlu0 %8870 }
 0x480   : > { %v5267_v62 = vadd.f32 %v5253_v60, %v5122_v58  ;;  %v12457_v52 = vpop.f32.mrf.mxu0  ;;  %v8861_v5 = vpop.permute.xlu1 %8860  ;;  %v8873_v25 = vunpack.i.h.bf16 %v12498_v26  ;;  %v8872_v47 = vunpack.i.l.bf16 %v12498_v26  ;;  %v5407_v60 = vadd.f32 %v12403_v53, %v5262_v55 }
 0x481   : > { %v5401_v45 = vpop.f32.mrf.mxu2  ;;  %v8863_v28 = vunpack.i.h.bf16 %v8861_v5  ;;  %v8862_v33 = vunpack.i.l.bf16 %v8861_v5  ;;  %v6539_v21 = vsel %vm6538_vm4, %v8867_v6, %v8868_v48  ;;  %v5271_v6 = vadd.f32 %v12380_v36, %v12314_v59 }
 0x482   : > { %v12459_v43 = vpop.f32.mrf.mxu1  ;;  %v12461_v63 = vadd.f32 %v5398_v46, %v5267_v62 }
 0x483   : > { %7872 = vmatmul.msk.f32.gmra.mxu0 %vm215_vm1, %v7864_v34  ;;  %v6541_v46 = vsel %vm6538_vm4, %v8862_v33, %v8863_v28 }
 0x484   : > { %7868 = vmatmul.msk.f32.gmra.mxu3 %vm215_vm1, %v7864_v34 }
 0x485   : > { %7876 = vmatmul.msk.f32.gmra.mxu1 %vm215_vm1, %v7864_v34 }
 0x486   : > { %7885 = vmatmul.msk.f32.gmra.mxu2 %vm215_vm1, %v12470_v41  ;;  %v8881_v14 = vpop.permute.xlu2 %8880 }
 0x487   : > { %v5256_v1 = vpop.f32.mrf.mxu3  ;;  %v8883_v37 = vunpack.i.h.bf16 %v8881_v14  ;;  %v8882_v9 = vunpack.i.l.bf16 %v8881_v14 }
 0x488   : > { %v5270_v27 = vadd.f32 %v5256_v1, %v5125_v54  ;;  %v12479_v50 = vpop.f32.mrf.mxu0  ;;  %v5410_v54 = vadd.f32 %v12435_v57, %v5265_v16  ;;  %v12545_v1 = vld [vmem:[%s13002_s1 + $0x570] sm:$0xff]  ;;  %v5268_v57 = vadd.f32 %v12361_v7, %v12290_v29 }
 0x489   : > { %v5404_v8 = vpop.f32.mrf.mxu2  ;;  %v6542_v2 = vsel %vm6538_vm4, %v8863_v28, %v8882_v9  ;;  %v6540_v58 = vsel %vm6538_vm4, %v8868_v48, %v8883_v37  ;;  %v8886_v48 = vpop.permute.xlu0 %8885  ;;  %v5416_v14 = vadd.f32 %v12479_v50, %v5271_v6 }
 0x48a   : > { %v12481_v31 = vpop.f32.mrf.mxu1  ;;  %v12483_v11 = vadd.f32 %v5401_v45, %v5270_v27  ;;  %v5413_v39 = vadd.f32 %v12457_v52, %v5268_v57  ;;  %v8888_v36 = vunpack.i.h.bf16 %v8886_v48 }
 0x48b   : > { %7873 = vmatmul.msk.f32.gmra.mxu0 %vm215_vm1, %v7865_v19 }
 0x48c   : > { %7869 = vmatmul.msk.f32.gmra.mxu3 %vm215_vm1, %v7865_v19 }
 0x48d   : > { %7877 = vmatmul.msk.f32.gmra.mxu1 %vm215_vm1, %v7865_v19 }
 0x48e   : > { %7902 = vmatmul.msk.f32.vlgmr.msra.gmra.mxu2 %vm215_vm1, %v12494_v13 }
 0x48f   : > { %v5259_v12 = vpop.f32.mrf.mxu3 }
 0x490   : > { %v5273_v22 = vadd.f32 %v5259_v12, %v5128_v20  ;;  %v12502_v3 = vpop.f32.mrf.mxu0  ;;  %v12567_v20 = vld [vmem:[%s13002_s1 + $0x578] sm:$0xff] }
 0x491   : > { %v5626_v30 = vpop.f32.mrf.mxu2 }
 0x492   : > { %v12500_v51 = vadd.f32 %v5404_v8, %v5273_v22  ;;  %v12504_v35 = vpop.f32.mrf.mxu1 }
 0x493   : > { %7890 = vmatmul.msk.f32.vlgmr.msra.gmra.mxu0 %vm215_vm1, %v12387_v32 }
 0x494   : > { %7886 = vmatmul.msk.f32.vlgmr.msra.gmra.mxu3 %vm215_vm1, %v12387_v32  ;;  %6604 = vmatpush.msra.mxu0 %v6542_v2  ;;  %v6680_v32 = vsel %vm6677_vm5, %v8872_v47, %v8873_v25  ;;  %v5408_v2 = vadd.f32 %v12405_v42, %v12341_v15  ;;  %v7911_v42 = vld [vmem:[%s13002_s1 + $0x588] sm:$0xff] }
 0x495   : > { %7898 = vmatmul.msk.f32.vlgmr.msra.gmra.mxu1 %vm215_vm1, %v12494_v13  ;;  %6575 = vmatpush.msra.mxu3 %v6541_v46 }
 0x496   : > { %6633 = vmatpush.msra.mxu1 %v8882_v9  ;;  %7903 = vmatmul.msk.f32.gmra.mxu2 %vm215_vm1, %v12520_v38  ;;  %v7910_v9 = vld [vmem:[%s13002_s1 + $0x580] sm:$0xff]  ;;  %v5552_v15 = vadd.f32 %v12502_v3, %v5408_v2 }
 0x497   : > { %v5481_v17 = vpop.f32.mrf.mxu3  ;;  %6576 = vmatpush.msra.mxu3 %v6539_v21  ;;  %6605 = vmatpush.msra.mxu0 %v6540_v58  ;;  %v8876_v8 = vpop.permute.xlu1 %8875 }
 0x498   : > { %v5551_v62 = vadd.f32 %v5481_v17, %v5407_v60  ;;  %6714 = vmatpush.msra.mxu2 %v6680_v32  ;;  %6634 = vmatpush.msra.mxu1 %v8883_v37  ;;  %v12527_v53 = vpop.f32.mrf.mxu0  ;;  %v8878_v12 = vunpack.i.h.bf16 %v8876_v8  ;;  %v8877_v5 = vunpack.i.l.bf16 %v8876_v8  ;;  %v8887_v37 = vunpack.i.l.bf16 %v8886_v48 }
 0x499   : > { %v5629_v0 = vpop.f32.mrf.mxu2  ;;  %v5411_v8 = vadd.f32 %v12437_v40, %v12363_v23 }
 0x49a   : > { %v12529_v34 = vpop.f32.mrf.mxu1  ;;  %v12531_v45 = vadd.f32 %v5626_v30, %v5551_v62  ;;  %v6681_v50 = vsel %vm6677_vm5, %v8873_v25, %v8887_v37  ;;  %v6679_v21 = vsel %vm6677_vm5, %v8878_v12, %v8888_v36 }
 0x49b   : > { %7891 = vmatmul.msk.f32.gmra.mxu0 %vm215_vm1, %v12414_v18 }
 0x49c   : > { %7887 = vmatmul.msk.f32.gmra.mxu3 %vm215_vm1, %v12414_v18 }
 0x49d   : > { %7899 = vmatmul.msk.f32.gmra.mxu1 %vm215_vm1, %v12520_v38 }
 0x49e   : > { %7904 = vmatmul.msk.f32.gmra.mxu2 %vm215_vm1, %v12545_v1 }
 0x49f   : > { %v5484_v49 = vpop.f32.mrf.mxu3 }
 0x4a0   : > { %v5554_v4 = vadd.f32 %v5484_v49, %v5410_v54  ;;  %v12549_v10 = vpop.f32.mrf.mxu0 }
 0x4a1   : > { %v5632_v19 = vpop.f32.mrf.mxu2 }
 0x4a2   : > { %v12551_v27 = vpop.f32.mrf.mxu1  ;;  %v12553_v18 = vadd.f32 %v5629_v0, %v5554_v4 }
 0x4a3   : > { %7892 = vmatmul.msk.f32.gmra.mxu0 %vm215_vm1, %v12448_v61 }
 0x4a4   : > { %7888 = vmatmul.msk.f32.gmra.mxu3 %vm215_vm1, %v12448_v61  ;;  %v6678_v61 = vsel %vm6677_vm5, %v8877_v5, %v8878_v12  ;;  %v5555_v12 = vadd.f32 %v12527_v53, %v5411_v8  ;;  %v7912_v5 = vld [vmem:[%s13002_s1 + $0x590] sm:$0xff]  ;;  %v5414_v53 = vadd.f32 %v12459_v43, %v12382_v24 }
 0x4a5   : > { %7900 = vmatmul.msk.f32.gmra.mxu1 %vm215_vm1, %v12545_v1  ;;  %6715 = vmatpush.msra.mxu2 %v6678_v61  ;;  %v8901_v60 = vpop.permute.xlu0 %8900 }
 0x4a6   : > { %7905 = vmatmul.msk.f32.gmra.mxu2 %vm215_vm1, %v12567_v20  ;;  %v8902_v17 = vunpack.i.l.bf16 %v8901_v60  ;;  %v8903_v3 = vunpack.i.h.bf16 %v8901_v60  ;;  %v5558_v6 = vadd.f32 %v12549_v10, %v5414_v53  ;;  %v12674_v10 = vld [vmem:[%s13002_s1 + $0x5c0] sm:$0xff] }
 0x4a7   : > { %v5487_v29 = vpop.f32.mrf.mxu3 }
 0x4a8   : > { %v5557_v7 = vadd.f32 %v5487_v29, %v5413_v39  ;;  %v12572_v22 = vpop.f32.mrf.mxu0 }
 0x4a9   : > { %v5635_v33 = vpop.f32.mrf.mxu2 }
 0x4aa   : > { %v12574_v28 = vpop.f32.mrf.mxu1  ;;  %v12576_v52 = vadd.f32 %v5632_v19, %v5557_v7 }
 0x4ab   : > { %7893 = vmatmul.msk.f32.gmra.mxu0 %vm215_vm1, %v12470_v41 }
 0x4ac   : > { %7889 = vmatmul.msk.f32.gmra.mxu3 %vm215_vm1, %v12470_v41 }
 0x4ad   : > { %7901 = vmatmul.msk.f32.gmra.mxu1 %vm215_vm1, %v12567_v20 }
 0x4ae   : > { %7922 = vmatmul.msk.f32.vlgmr.msrb.gmra.mxu2 %vm215_vm1, %v7910_v9  ;;  %v12606_v58 = vpop.permute.xlu1 %8890 }
 0x4af   : > { %v5490_v30 = vpop.f32.mrf.mxu3  ;;  %v8893_v26 = vunpack.i.h.bf16 %v12606_v58  ;;  %v8892_v25 = vunpack.i.l.bf16 %v12606_v58  ;;  %v7927_v58 = vld [vmem:[%s13002_s1 + $0x5a8] sm:$0xff] }
 0x4b0   : > { %v5560_v59 = vadd.f32 %v5490_v30, %v5416_v14  ;;  %v12593_v55 = vpop.f32.mrf.mxu0  ;;  %v7913_v14 = vld [vmem:[%s13002_s1 + $0x598] sm:$0xff] }
 0x4b1   : > { %v5800_v46 = vpop.f32.mrf.mxu2  ;;  %v6819_v32 = vsel %vm6816_vm6, %v8902_v17, %v8892_v25  ;;  %v6820_v62 = vsel %vm6816_vm6, %v8892_v25, %v8893_v26 }
 0x4b2   : > { %v12591_v47 = vadd.f32 %v5635_v33, %v5560_v59  ;;  %v12595_v41 = vpop.f32.mrf.mxu1  ;;  %6882 = vmatpush.msrb.mxu2 %v6820_v62  ;;  %v5417_v59 = vadd.f32 %v12481_v31, %v12401_v44  ;;  %v7926_v44 = vld [vmem:[%s13002_s1 + $0x5a0] sm:$0xff] }
 0x4b3   : > { %7914 = vmatmul.msk.f32.vlgmr.msrb.gmra.mxu0 %vm215_vm1, %v7910_v9 }
 0x4b4   : > { %7906 = vmatmul.msk.f32.vlgmr.msrb.gmra.mxu3 %vm215_vm1, %v12494_v13  ;;  %6772 = vmatpush.msrb.mxu0 %v8887_v37  ;;  %v12620_v16 = vpop.permute.xlu2 %8895 }
 0x4b5   : > { %7918 = vmatmul.msk.f32.vlgmr.msrb.gmra.mxu1 %vm215_vm1, %v7910_v9  ;;  %6743 = vmatpush.msrb.mxu3 %v6681_v50  ;;  %v8897_v19 = vunpack.i.l.bf16 %v12620_v16  ;;  %v8898_v40 = vunpack.i.h.bf16 %v12620_v16 }
 0x4b6   : > { %7923 = vmatmul.msk.f32.gmra.mxu2 %vm215_vm1, %v7911_v42  ;;  %6773 = vmatpush.msrb.mxu0 %v8888_v36  ;;  %v5561_v36 = vadd.f32 %v12572_v22, %v5417_v59  ;;  %v8906_v31 = vpop.permute.xlu1 %8905  ;;  %v5553_v22 = vadd.f32 %v12504_v35, %v12439_v56 }
 0x4b7   : > { %v5655_v13 = vpop.f32.mrf.mxu3  ;;  %6744 = vmatpush.msrb.mxu3 %v6679_v21  ;;  %6853 = vmatpush.msrb.mxu1 %v6819_v32  ;;  %v6817_v39 = vsel %vm6816_vm6, %v8903_v3, %v8897_v19  ;;  %v6818_v48 = vsel %vm6816_vm6, %v8897_v19, %v8898_v40  ;;  %v8907_v60 = vunpack.i.l.bf16 %v8906_v31  ;;  %v8916_v32 = vpop.permute.xlu0 %8915 }
 0x4b8   : > { %v5697_v0 = vadd.f32 %v5655_v13, %v5552_v15  ;;  %v12622_v54 = vpop.f32.mrf.mxu0  ;;  %6883 = vmatpush.msrb.mxu2 %v6818_v48  ;;  %v12696_v15 = vld [vmem:[%s13002_s1 + $0x5c8] sm:$0xff]  ;;  %v8918_v62 = vunpack.i.h.bf16 %v8916_v32  ;;  %v5698_v56 = vadd.f32 %v12593_v55, %v5553_v22 }
 0x4b9   : > { %v5803_v57 = vpop.f32.mrf.mxu2  ;;  %6854 = vmatpush.msrb.mxu1 %v6817_v39  ;;  %v5556_v39 = vadd.f32 %v12529_v34, %v12461_v63  ;;  %v7928_v34 = vld [vmem:[%s13002_s1 + $0x5b0] sm:$0xff] }
 0x4ba   : > { %v12624_v49 = vpop.f32.mrf.mxu1  ;;  %v12626_v4 = vadd.f32 %v5800_v46, %v5697_v0 }
 0x4bb   : > { %7915 = vmatmul.msk.f32.gmra.mxu0 %vm215_vm1, %v7911_v42 }
 0x4bc   : > { %7907 = vmatmul.msk.f32.gmra.mxu3 %vm215_vm1, %v12520_v38  ;;  %v8911_v17 = vpop.permute.xlu2 %8910 }
 0x4bd   : > { %7919 = vmatmul.msk.f32.gmra.mxu1 %vm215_vm1, %v7911_v42  ;;  %v8908_v42 = vunpack.i.h.bf16 %v8906_v31  ;;  %v8913_v13 = vunpack.i.h.bf16 %v8911_v17  ;;  %v12760_v31 = vld [vmem:[%s13002_s1 + $0x5e0] sm:$0xff] }
 0x4be   : > { %7924 = vmatmul.msk.f32.gmra.mxu2 %vm215_vm1, %v7912_v5 }
 0x4bf   : > { %v5658_v29 = vpop.f32.mrf.mxu3  ;;  %v6959_v35 = vsel %vm6955_vm2, %v8913_v13, %v8907_v60  ;;  %v6957_v16 = vsel %vm6955_vm2, %v8918_v62, %v8908_v42 }
 0x4c0   : > { %v5700_v23 = vadd.f32 %v5658_v29, %v5555_v12  ;;  %v12642_v38 = vpop.f32.mrf.mxu0  ;;  %v12718_v12 = vld [vmem:[%s13002_s1 + $0x5d0] sm:$0xff]  ;;  %v5701_v29 = vadd.f32 %v12622_v54, %v5556_v39  ;;  %v12737_v54 = vld [vmem:[%s13002_s1 + $0x5d8] sm:$0xff] }
 0x4c1   : > { %v5806_v33 = vpop.f32.mrf.mxu2 }
 0x4c2   : > { %v12644_v7 = vpop.f32.mrf.mxu1  ;;  %v12646_v61 = vadd.f32 %v5803_v57, %v5700_v23 }
 0x4c3   : > { %7916 = vmatmul.msk.f32.gmra.mxu0 %vm215_vm1, %v7912_v5 }
 0x4c4   : > { %7908 = vmatmul.msk.f32.gmra.mxu3 %vm215_vm1, %v12545_v1 }
 0x4c5   : > { %7920 = vmatmul.msk.f32.gmra.mxu1 %vm215_vm1, %v7912_v5 }
 0x4c6   : > { %7925 = vmatmul.msk.f32.gmra.mxu2 %vm215_vm1, %v7913_v14 }
 0x4c7   : > { %v5661_v37 = vpop.f32.mrf.mxu3 }
 0x4c8   : > { %v5703_v24 = vadd.f32 %v5661_v37, %v5558_v6  ;;  %v12660_v43 = vpop.f32.mrf.mxu0  ;;  %v5559_v6 = vadd.f32 %v12551_v27, %v12483_v11  ;;  %v7929_v11 = vld [vmem:[%s13002_s1 + $0x5b8] sm:$0xff]  ;;  %v8917_v27 = vunpack.i.l.bf16 %v8916_v32  ;;  %v5841_v32 = vadd.f32 %v12595_v41, %v12531_v45 }
 0x4c9   : > { %v5809_v30 = vpop.f32.mrf.mxu2 }
 0x4ca   : > { %v12662_v1 = vpop.f32.mrf.mxu1  ;;  %v12664_v9 = vadd.f32 %v5806_v33, %v5703_v24 }
 0x4cb   : > { %7917 = vmatmul.msk.f32.gmra.mxu0 %vm215_vm1, %v7913_v14 }
 0x4cc   : > { %7909 = vmatmul.msk.f32.gmra.mxu3 %vm215_vm1, %v12567_v20 }
 0x4cd   : > { %7921 = vmatmul.msk.f32.gmra.mxu1 %vm215_vm1, %v7913_v14  ;;  %v5704_v14 = vadd.f32 %v12642_v38, %v5559_v6  ;;  %v6956_v38 = vsel %vm6955_vm2, %v8917_v27, %v8918_v62 }
 0x4ce   : > { %7946 = vmatmul.msk.f32.vlgmr.msra.gmra.mxu2 %vm215_vm1, %v12674_v10 }
 0x4cf   : > { %v5664_v50 = vpop.f32.mrf.mxu3  ;;  %7050 = vmatpush.msra.mxu2 %v8907_v60 }
 0x4d0   : > { %v5706_v46 = vadd.f32 %v5664_v50, %v5561_v36  ;;  %v12685_v2 = vpop.f32.mrf.mxu0 }
 0x4d1   : > { %v5974_v25 = vpop.f32.mrf.mxu2  ;;  %7051 = vmatpush.msra.mxu2 %v8908_v42 }
 0x4d2   : > { %v12683_v20 = vadd.f32 %v5809_v30, %v5706_v46  ;;  %v12687_v21 = vpop.f32.mrf.mxu1  ;;  %v5562_v46 = vadd.f32 %v12574_v28, %v12500_v51 }
 0x4d3   : > { %7934 = vmatmul.msk.f32.vlgmr.msra.gmra.mxu0 %vm215_vm1, %v7926_v44  ;;  %v5987_v28 = vadd.f32 %v12687_v21, %v12626_v4  ;;  %v5986_v4 = vadd.f32 %v12685_v2, %v5841_v32  ;;  %v12782_v21 = vld [vmem:[%s13002_s1 + $0x5e8] sm:$0xff] }
 0x4d4   : > { %7930 = vmatmul.msk.f32.vlgmr.msra.gmra.mxu3 %vm215_vm1, %v7926_v44 }
 0x4d5   : > { %7938 = vmatmul.msk.f32.vlgmr.msra.gmra.mxu1 %vm215_vm1, %v7926_v44  ;;  %6911 = vmatpush.msra.mxu3 %v8893_v26  ;;  %v8912_v26 = vunpack.i.l.bf16 %v8911_v17  ;;  %v5707_v44 = vadd.f32 %v12660_v43, %v5562_v46 }
 0x4d6   : > { %7947 = vmatmul.msk.f32.gmra.mxu2 %vm215_vm1, %v12696_v15  ;;  %7021 = vmatpush.msra.mxu1 %v6959_v35 }
 0x4d7   : > { %v5829_v0 = vpop.f32.mrf.mxu3  ;;  %6912 = vmatpush.msra.mxu3 %v8898_v40  ;;  %v6958_v5 = vsel %vm6955_vm2, %v8912_v26, %v8913_v13 }
 0x4d8   : > { %v5843_v3 = vadd.f32 %v5829_v0, %v5698_v56  ;;  %v12709_v19 = vpop.f32.mrf.mxu0  ;;  %7022 = vmatpush.msra.mxu1 %v6957_v16  ;;  %6992 = vmatpush.msra.mxu0 %v6958_v5  ;;  %v5844_v16 = vadd.f32 %v12624_v49, %v12553_v18  ;;  %v7077_v49 = vld [vmem:[%s13003_s2] sm:$0xff] }
 0x4d9   : > { %v5977_v8 = vpop.f32.mrf.mxu2 }
 0x4da   : > { %v5948_v55 = vpop.f32.mrf.mxu1  ;;  %v5988_v57 = vadd.f32 %v5974_v25, %v5843_v3  ;;  %6993 = vmatpush.msra.mxu0 %v6956_v38 }
 0x4db   : > { %7935 = vmatmul.msk.f32.gmra.mxu0 %vm215_vm1, %v7927_v58  ;;  %v5990_v41 = vadd.f32 %v5948_v55, %v12646_v61  ;;  %v5989_v61 = vadd.f32 %v12709_v19, %v5844_v16  ;;  %v9045_v55 = vmov 0  }
 0x4dc   : > { %7931 = vmatmul.msk.f32.gmra.mxu3 %vm215_vm1, %v7927_v58  ;;  %8919 = vset.pattern.permute.xlu1 %v9045_v55 }
 0x4dd   : > { %7939 = vmatmul.msk.f32.gmra.mxu1 %vm215_vm1, %v7927_v58  ;;  %v12803_v58 = vld [vmem:[%s13002_s1 + $0x5f0] sm:$0xff]  ;;  %8921 = vset.pattern.permute.xlu0 %v9045_v55 }
 0x4de   : > { %7948 = vmatmul.msk.f32.gmra.mxu2 %vm215_vm1, %v12718_v12  ;;  %7083 = vperm.xlu1 %8919, %v7077_v49  }
 0x4df   : > { %v5832_v23 = vpop.f32.mrf.mxu3  ;;  %8920 = vset.pattern.permute.xlu2 %v9045_v55 }
 0x4e0   : > { %v5846_v63 = vadd.f32 %v5832_v23, %v5701_v29  ;;  %v12728_v40 = vpop.f32.mrf.mxu0  ;;  %v5847_v23 = vadd.f32 %v12644_v7, %v12576_v52 }
 0x4e1   : > { %v5980_v48 = vpop.f32.mrf.mxu2 }
 0x4e2   : > { %v5951_v33 = vpop.f32.mrf.mxu1  ;;  %v5991_v53 = vadd.f32 %v5977_v8, %v5846_v63  ;;  %v12825_v63 = vld [vmem:[%s13002_s1 + $0x5f8] sm:$0xff] }
 0x4e3   : > { %7936 = vmatmul.msk.f32.gmra.mxu0 %vm215_vm1, %v7928_v34 }
 0x4e4   : > { %7932 = vmatmul.msk.f32.gmra.mxu3 %vm215_vm1, %v7928_v34 }
 0x4e5   : > { %7940 = vmatmul.msk.f32.gmra.mxu1 %vm215_vm1, %v7928_v34 }
 0x4e6   : > { %7949 = vmatmul.msk.f32.gmra.mxu2 %vm215_vm1, %v12737_v54 }
 0x4e7   : > { %v5835_v37 = vpop.f32.mrf.mxu3 }
 0x4e8   : > { %v5849_v24 = vadd.f32 %v5835_v37, %v5704_v14  ;;  %v12746_v30 = vpop.f32.mrf.mxu0  ;;  %v5850_v14 = vadd.f32 %v12662_v1, %v12591_v47  ;;  %v7974_v37 = vld [vmem:[%s13002_s1 + $0x600] sm:$0xff]  ;;  %v7079_v47 = vld [vmem:[%s13003_s2 + $0x10] sm:$0xff] }
 0x4e9   : > { %v5983_v50 = vpop.f32.mrf.mxu2  ;;  %7093 = vperm.xlu0 %8921, %v7079_v47  }
 0x4ea   : > { %v12748_v59 = vpop.f32.mrf.mxu1  ;;  %v5994_v36 = vadd.f32 %v5980_v48, %v5849_v24 }
 0x4eb   : > { %7937 = vmatmul.msk.f32.gmra.mxu0 %vm215_vm1, %v7929_v11  ;;  %v5996_v7 = vadd.f32 %v12748_v59, %v12683_v20  ;;  %v5995_v20 = vadd.f32 %v12746_v30, %v5850_v14 }
 0x4ec   : > { %7933 = vmatmul.msk.f32.gmra.mxu3 %vm215_vm1, %v7929_v11 }
 0x4ed   : > { %7941 = vmatmul.msk.f32.gmra.mxu1 %vm215_vm1, %v7929_v11 }
 0x4ee   : > { %7966 = vmatmul.msk.f32.vlgmr.msrb.gmra.mxu2 %vm215_vm1, %v12760_v31 }
 0x4ef   : > { %v5838_v60 = vpop.f32.mrf.mxu3 }
 0x4f0   : > { %v5852_v51 = vadd.f32 %v5838_v60, %v5707_v44  ;;  %v6090_v17 = vpop.f32.mrf.mxu0  ;;  %v7080_v44 = vld [vmem:[%s13003_s2 + $0x18] sm:$0xff] }
 0x4f1   : > { %v12766_v42 = vadd.f32 %v6090_v17, %v5987_v28  ;;  %v6187_v13 = vpop.f32.mrf.mxu2  ;;  %7098 = vperm.xlu1 %8919, %v7080_v44  }
 0x4f2   : > { %v5997_v25 = vadd.f32 %v5983_v50, %v5852_v51  ;;  %v6119_v22 = vpop.f32.mrf.mxu1  ;;  %v7975_v50 = vld [vmem:[%s13002_s1 + $0x608] sm:$0xff] }
 0x4f3   : > { %v12768_v43 = vadd.f32 %v6119_v22, %v5988_v57  ;;  %7954 = vmatmul.msk.f32.vlgmr.msrb.gmra.mxu0 %vm215_vm1, %v12674_v10  ;;  %v7976_v22 = vld [vmem:[%s13002_s1 + $0x610] sm:$0xff] }
 0x4f4   : > { %7950 = vmatmul.msk.f32.vlgmr.msrb.gmra.mxu3 %vm215_vm1, %v12674_v10 }
 0x4f5   : > { %7962 = vmatmul.msk.f32.vlgmr.msrb.gmra.mxu1 %vm215_vm1, %v12760_v31 }
 0x4f6   : > { %7967 = vmatmul.msk.f32.gmra.mxu2 %vm215_vm1, %v12782_v21 }
 0x4f7   : > { %v6061_v62 = vpop.f32.mrf.mxu3 }
 0x4f8   : > { %v6131_v45 = vadd.f32 %v6061_v62, %v5986_v4  ;;  %v6093_v56 = vpop.f32.mrf.mxu0 }
 0x4f9   : > { %v12787_v0 = vadd.f32 %v6093_v56, %v5990_v41  ;;  %v6190_v2 = vpop.f32.mrf.mxu2  ;;  %v7977_v56 = vld [vmem:[%s13002_s1 + $0x618] sm:$0xff] }
 0x4fa   : > { %v6122_v35 = vpop.f32.mrf.mxu1  ;;  %v6257_v10 = vadd.f32 %v6187_v13, %v6131_v45  ;;  %v7078_v13 = vld [vmem:[%s13003_s2 + $0x8] sm:$0xff] }
 0x4fb   : > { %v12789_v3 = vadd.f32 %v6122_v35, %v5991_v53  ;;  %7955 = vmatmul.msk.f32.gmra.mxu0 %vm215_vm1, %v12696_v15  ;;  %7088 = vperm.xlu2 %8920, %v7078_v13  }
 0x4fc   : > { %7951 = vmatmul.msk.f32.gmra.mxu3 %vm215_vm1, %v12696_v15  ;;  %v5993_v15 = vadd.f32 %v5951_v33, %v12664_v9  ;;  %v5992_v9 = vadd.f32 %v12728_v40, %v5847_v23 }
 0x4fd   : > { %7963 = vmatmul.msk.f32.gmra.mxu1 %vm215_vm1, %v12782_v21 }
 0x4fe   : > { %7968 = vmatmul.msk.f32.gmra.mxu2 %vm215_vm1, %v12803_v58 }
 0x4ff   : > { %v6064_v26 = vpop.f32.mrf.mxu3 }
 0x500   : > { %v6134_v18 = vadd.f32 %v6064_v26, %v5989_v61  ;;  %v6096_v19 = vpop.f32.mrf.mxu0 }
 0x501   : > { %v12811_v39 = vadd.f32 %v6096_v19, %v5993_v15  ;;  %v6193_v29 = vpop.f32.mrf.mxu2 }
 0x502   : > { %v6125_v57 = vpop.f32.mrf.mxu1  ;;  %v6260_v8 = vadd.f32 %v6190_v2, %v6134_v18 }
 0x503   : > { %v6139_v5 = vadd.f32 %v6125_v57, %v5994_v36  ;;  %7956 = vmatmul.msk.f32.gmra.mxu0 %vm215_vm1, %v12718_v12 }
 0x504   : > { %7952 = vmatmul.msk.f32.gmra.mxu3 %vm215_vm1, %v12718_v12 }
 0x505   : > { %7964 = vmatmul.msk.f32.gmra.mxu1 %vm215_vm1, %v12803_v58 }
 0x506   : > { %7969 = vmatmul.msk.f32.gmra.mxu2 %vm215_vm1, %v12825_v63 }
 0x507   : > { %v6067_v34 = vpop.f32.mrf.mxu3 }
 0x508   : > { %v6137_v52 = vadd.f32 %v6067_v34, %v5992_v9  ;;  %v6099_v33 = vpop.f32.mrf.mxu0 }
 0x509   : > { %v12831_v48 = vadd.f32 %v6099_v33, %v5996_v7  ;;  %v6196_v40 = vpop.f32.mrf.mxu2 }
 0x50a   : > { %v6128_v12 = vpop.f32.mrf.mxu1  ;;  %v6263_v53 = vadd.f32 %v6193_v29, %v6137_v52 }
 0x50b   : > { %v6142_v6 = vadd.f32 %v6128_v12, %v5997_v25  ;;  %7957 = vmatmul.msk.f32.gmra.mxu0 %vm215_vm1, %v12737_v54 }
 0x50c   : > { %7953 = vmatmul.msk.f32.gmra.mxu3 %vm215_vm1, %v12737_v54 }
 0x50d   : > { %7965 = vmatmul.msk.f32.gmra.mxu1 %vm215_vm1, %v12825_v63 }
 0x50e   : > { %7986 = vmatmul.msk.f32.vlgmr.msra.gmra.mxu2 %vm215_vm1, %v7974_v37 }
 0x50f   : > { %v6070_v24 = vpop.f32.mrf.mxu3 }
 0x510   : > { %v6140_v11 = vadd.f32 %v6070_v24, %v5995_v20  ;;  %v6245_v54 = vpop.f32.mrf.mxu0 }
 0x511   : > { %v6259_v59 = vadd.f32 %v6245_v54, %v12768_v43  ;;  %v6342_v30 = vpop.f32.mrf.mxu2 }
 0x512   : > { %v6266_v1 = vadd.f32 %v6196_v40, %v6140_v11  ;;  %v6313_v27 = vpop.f32.mrf.mxu1 }
 0x513   : > { %v6383_v36 = vadd.f32 %v6313_v27, %v6257_v10  ;;  %7978 = vmatmul.msk.f32.vlgmr.msra.gmra.mxu0 %vm215_vm1, %v7974_v37 }
 0x514   : > { %7970 = vmatmul.msk.f32.vlgmr.msra.gmra.mxu3 %vm215_vm1, %v12760_v31 }
 0x515   : > { %7982 = vmatmul.msk.f32.vlgmr.msra.gmra.mxu1 %vm215_vm1, %v7974_v37 }
 0x516   : > { %7987 = vmatmul.msk.f32.gmra.mxu2 %vm215_vm1, %v7975_v50 }
 0x517   : > { %v6216_v46 = vpop.f32.mrf.mxu3 }
 0x518   : > { %v6258_v38 = vadd.f32 %v6216_v46, %v12766_v42  ;;  %v6248_v60 = vpop.f32.mrf.mxu0 }
 0x519   : > { %v6262_v28 = vadd.f32 %v6248_v60, %v12789_v3  ;;  %v6345_v17 = vpop.f32.mrf.mxu2 }
 0x51a   : > { %v6316_v31 = vpop.f32.mrf.mxu1  ;;  %v6384_v51 = vadd.f32 %v6342_v30, %v6258_v38 }
 0x51b   : > { %v6386_v25 = vadd.f32 %v6316_v31, %v6260_v8  ;;  %7979 = vmatmul.msk.f32.gmra.mxu0 %vm215_vm1, %v7975_v50 }
 0x51c   : > { %7971 = vmatmul.msk.f32.gmra.mxu3 %vm215_vm1, %v12782_v21 }
 0x51d   : > { %7983 = vmatmul.msk.f32.gmra.mxu1 %vm215_vm1, %v7975_v50 }
 0x51e   : > { %7988 = vmatmul.msk.f32.gmra.mxu2 %vm215_vm1, %v7976_v22 }
 0x51f   : > { %v6219_v42 = vpop.f32.mrf.mxu3 }
 0x520   : > { %v6261_v43 = vadd.f32 %v6219_v42, %v12787_v0  ;;  %v6251_v32 = vpop.f32.mrf.mxu0 }
 0x521   : > { %v6265_v62 = vadd.f32 %v6251_v32, %v6139_v5  ;;  %v6348_v41 = vpop.f32.mrf.mxu2 }
 0x522   : > { %v6319_v4 = vpop.f32.mrf.mxu1  ;;  %v6387_v21 = vadd.f32 %v6345_v17, %v6261_v43 }
 0x523   : > { %v6389_v45 = vadd.f32 %v6319_v4, %v6263_v53  ;;  %7980 = vmatmul.msk.f32.gmra.mxu0 %vm215_vm1, %v7976_v22 }
 0x524   : > { %7972 = vmatmul.msk.f32.gmra.mxu3 %vm215_vm1, %v12803_v58 }
 0x525   : > { %7984 = vmatmul.msk.f32.gmra.mxu1 %vm215_vm1, %v7976_v22 }
 0x526   : > { %7989 = vmatmul.msk.f32.gmra.mxu2 %vm215_vm1, %v7977_v56 }
 0x527   : > { %v6222_v35 = vpop.f32.mrf.mxu3 }
 0x528   : > { %v6264_v10 = vadd.f32 %v6222_v35, %v12811_v39  ;;  %v6254_v0 = vpop.f32.mrf.mxu0 }
 0x529   : > { %v6268_v16 = vadd.f32 %v6254_v0, %v6142_v6  ;;  %v6351_v26 = vpop.f32.mrf.mxu2 }
 0x52a   : > { %v6322_v3 = vpop.f32.mrf.mxu1  ;;  %v6390_v2 = vadd.f32 %v6348_v41, %v6264_v10 }
 0x52b   : > { %v6392_v61 = vadd.f32 %v6322_v3, %v6266_v1  ;;  %7981 = vmatmul.msk.f32.gmra.mxu0 %vm215_vm1, %v7977_v56 }
 0x52c   : > { %7973 = vmatmul.msk.f32.gmra.mxu3 %vm215_vm1, %v12825_v63 }
 0x52d   : > { %7985 = vmatmul.msk.f32.gmra.mxu1 %vm215_vm1, %v7977_v56  ;;  %vm7115_vm1 = vcmask 785408  }
 0x52f   : > { %v6225_v58 = vpop.f32.mrf.mxu3 }
 0x530   : > { %v6267_v18 = vadd.f32 %v6225_v58, %v12831_v48  ;;  %v6439_v15 = vpop.f32.mrf.mxu0 }
 0x531   : > { %v12889_v19 = vadd.f32 %v6439_v15, %v6383_v36  ;;  %v6497_v8 = vpop.f32.mrf.mxu2 }
 0x532   : > { %v6393_v49 = vadd.f32 %v6351_v26, %v6267_v18  ;;  %v6468_v55 = vpop.f32.mrf.mxu1 }
 0x533   : > { %v12891_v57 = vadd.f32 %v6468_v55, %v6384_v51 }
 0x537   : > { %v6371_v39 = vpop.f32.mrf.mxu3 }
 0x538   : > { %v6385_v5 = vadd.f32 %v6371_v39, %v6259_v59  ;;  %v6442_v29 = vpop.f32.mrf.mxu0 }
 0x539   : > { %v12893_v63 = vadd.f32 %v6442_v29, %v6386_v25  ;;  %v6500_v52 = vpop.f32.mrf.mxu2 }
 0x53a   : > { %v6471_v23 = vpop.f32.mrf.mxu1  ;;  %v6511_v9 = vadd.f32 %v6497_v8, %v6385_v5 }
 0x53b   : > { %v12895_v34 = vadd.f32 %v6471_v23, %v6387_v21 }
 0x53f   : > { %v6374_v7 = vpop.f32.mrf.mxu3 }
 0x540   : > { %v6388_v33 = vadd.f32 %v6374_v7, %v6262_v28  ;;  %v6445_v12 = vpop.f32.mrf.mxu0 }
 0x541   : > { %v12897_v6 = vadd.f32 %v6445_v12, %v6389_v45  ;;  %v6503_v14 = vpop.f32.mrf.mxu2 }
 0x542   : > { %v6474_v53 = vpop.f32.mrf.mxu1  ;;  %v6514_v48 = vadd.f32 %v6500_v52, %v6388_v33 }
 0x543   : > { %v12899_v40 = vadd.f32 %v6474_v53, %v6390_v2 }
 0x547   : > { %v6377_v20 = vpop.f32.mrf.mxu3 }
 0x548   : > { %v6391_v37 = vadd.f32 %v6377_v20, %v6265_v62  ;;  %v6448_v24 = vpop.f32.mrf.mxu0 }
 0x549   : > { %v12901_v1 = vadd.f32 %v6448_v24, %v6392_v61  ;;  %v6506_v27 = vpop.f32.mrf.mxu2 }
 0x54a   : > { %v6477_v11 = vpop.f32.mrf.mxu1  ;;  %v6517_v47 = vadd.f32 %v6503_v14, %v6391_v37 }
 0x54b   : > { %v12903_v54 = vadd.f32 %v6477_v11, %v6393_v49 }
 0x54f   : > { %v6380_v59 = vpop.f32.mrf.mxu3 }
 0x550   : > { %v6394_v36 = vadd.f32 %v6380_v59, %v6268_v16  ;;  %v6607_v50 = vpop.f32.mrf.mxu0  ;;  %v7084_v33 = vpop.permute.xlu1 %7083 }
 0x551   : > { %v6717_v44 = vpop.f32.mrf.mxu2  ;;  %v6649_v8 = vadd.f32 %v6607_v50, %v12891_v57 }
 0x552   : > { %v6520_v30 = vadd.f32 %v6506_v27, %v6394_v36  ;;  %v6636_v46 = vpop.f32.mrf.mxu1 }
 0x553   : > { %v6650_v38 = vadd.f32 %v6636_v46, %v6511_v9 }
 0x557   : > { %v6578_v60 = vpop.f32.mrf.mxu3 }
 0x558   : > { %v6610_v31 = vpop.f32.mrf.mxu0  ;;  %v6648_v39 = vadd.f32 %v6578_v60, %v12889_v19 }
 0x559   : > { %v6720_v25 = vpop.f32.mrf.mxu2 }
 0x55a   : > { %v6639_v51 = vpop.f32.mrf.mxu1  ;;  %v6787_v23 = vadd.f32 %v6717_v44, %v6648_v39 }
 0x55b   : > { %v12905_v28 = vadd.f32 %v6639_v51, %v6514_v48  ;;  %v6652_v48 = vadd.f32 %v6610_v31, %v12895_v34 }
 0x55f   : > { %v6581_v17 = vpop.f32.mrf.mxu3 }
 0x560   : > { %v6613_v22 = vpop.f32.mrf.mxu0  ;;  %v6651_v14 = vadd.f32 %v6581_v17, %v12893_v63  ;;  %v7089_v63 = vpop.permute.xlu2 %7088 }
 0x561   : > { %v12909_v13 = vpop.f32.mrf.mxu2  ;;  %v6655_v50 = vadd.f32 %v6613_v22, %v12899_v40 }
 0x562   : > { %v6642_v42 = vpop.f32.mrf.mxu1  ;;  %v6790_v27 = vadd.f32 %v6720_v25, %v6651_v14 }
 0x563   : > { %v12907_v43 = vadd.f32 %v6642_v42, %v6517_v47 }
 0x567   : > { %v6584_v32 = vpop.f32.mrf.mxu3 }
 0x568   : > { %v12911_v4 = vpop.f32.mrf.mxu0  ;;  %v6654_v60 = vadd.f32 %v6584_v32, %v12897_v6  ;;  %v7094_v32 = vpop.permute.xlu0 %7093 }
 0x569   : > { %v12915_v45 = vpop.f32.mrf.mxu2 }
 0x56a   : > { %v6645_v21 = vpop.f32.mrf.mxu1  ;;  %v6793_v40 = vadd.f32 %v12909_v13, %v6654_v60 }
 0x56b   : > { %v12913_v62 = vadd.f32 %v6645_v21, %v6520_v30 }
 0x56f   : > { %v12917_v41 = vpop.f32.mrf.mxu3 }
 0x570   : > { %v6775_v56 = vpop.f32.mrf.mxu0 }
 0x571   : > { %v6885_v10 = vpop.f32.mrf.mxu2  ;;  %v6789_v47 = vadd.f32 %v6775_v56, %v6650_v38 }
 0x572   : > { %v6856_v35 = vpop.f32.mrf.mxu1 }
 0x573   : > { %v6926_v52 = vadd.f32 %v6856_v35, %v6787_v23 }
 0x577   : > { %v6746_v0 = vpop.f32.mrf.mxu3 }
 0x578   : > { %v6778_v3 = vpop.f32.mrf.mxu0  ;;  %v6788_v29 = vadd.f32 %v6746_v0, %v6649_v8 }
 0x579   : > { %v6888_v16 = vpop.f32.mrf.mxu2  ;;  %v6792_v35 = vadd.f32 %v6778_v3, %v12905_v28  ;;  %v6658_v28 = vadd.f32 %v12911_v4, %v12903_v54  ;;  %v6657_v3 = vadd.f32 %v12917_v41, %v12901_v1 }
 0x57a   : > { %v6859_v2 = vpop.f32.mrf.mxu1  ;;  %v6927_v7 = vadd.f32 %v6885_v10, %v6788_v29 }
 0x57b   : > { %v6929_v30 = vadd.f32 %v6859_v2, %v6790_v27 }
 0x57f   : > { %v6749_v61 = vpop.f32.mrf.mxu3 }
 0x580   : > { %v12919_v26 = vpop.f32.mrf.mxu0  ;;  %v6791_v37 = vadd.f32 %v6749_v61, %v6652_v48 }
 0x581   : > { %v6891_v18 = vpop.f32.mrf.mxu2  ;;  %v6795_v23 = vadd.f32 %v12919_v26, %v12907_v43 }
 0x582   : > { %v6862_v58 = vpop.f32.mrf.mxu1  ;;  %v6930_v34 = vadd.f32 %v6888_v16, %v6791_v37 }
 0x583   : > { %v6932_v0 = vadd.f32 %v6862_v58, %v6793_v40 }
 0x587   : > { %v6752_v49 = vpop.f32.mrf.mxu3 }
 0x588   : > { %v12921_v15 = vpop.f32.mrf.mxu0  ;;  %v6794_v42 = vadd.f32 %v6752_v49, %v6655_v50 }
 0x589   : > { %v12927_v5 = vpop.f32.mrf.mxu2 }
 0x58a   : > { %v12923_v55 = vpop.f32.mrf.mxu1  ;;  %v6933_v6 = vadd.f32 %v6891_v18, %v6794_v42 }
 0x58f   : > { %v6755_v9 = vpop.f32.mrf.mxu3 }
 0x590   : > { %v6995_v12 = vpop.f32.mrf.mxu0  ;;  %v6797_v39 = vadd.f32 %v6755_v9, %v6658_v28  ;;  %v7099_v9 = vpop.permute.xlu1 %7098 }
 0x591   : > { %v7065_v57 = vadd.f32 %v6995_v12, %v6926_v52  ;;  %v7053_v19 = vpop.f32.mrf.mxu2  ;;  %v6796_v52 = vadd.f32 %v12915_v45, %v6657_v3 }
 0x592   : > { %v7024_v53 = vpop.f32.mrf.mxu1  ;;  %v6936_v41 = vadd.f32 %v12927_v5, %v6797_v39 }
 0x593   : > { %v7066_v20 = vadd.f32 %v7024_v53, %v6927_v7  ;;  %v7101_v24 = vadd.f32 %v7084_v33, %v7065_v57  ;;  %v6935_v4 = vadd.f32 %v12923_v55, %v6796_v52  ;;  %v6798_v55 = vadd.f32 %v12921_v15, %v12913_v62 }
 0x595   : > { %v7102_v11 = vadd.f32 %v7084_v33, %v7066_v20  ;;  %7113 = vst [vmem:[%s12934_s28] sm:$0xff] %v7101_v24 }
 0x597   : > { %v6914_v59 = vpop.f32.mrf.mxu3  ;;  %7114 = vst [vmem:[%s12934_s28 + $0x8] sm:$0xff] %v7102_v11 }
 0x598   : > { %v6928_v36 = vadd.f32 %v6914_v59, %v6789_v47  ;;  %v6998_v46 = vpop.f32.mrf.mxu0 }
 0x599   : > { %v7068_v31 = vadd.f32 %v6998_v46, %v6929_v30  ;;  %v7056_v25 = vpop.f32.mrf.mxu2 }
 0x59a   : > { %v7027_v44 = vpop.f32.mrf.mxu1  ;;  %v7067_v38 = vadd.f32 %v7053_v19, %v6928_v36 }
 0x59b   : > { %v7069_v51 = vadd.f32 %v7027_v44, %v6930_v34  ;;  %v7104_v21 = vadd.f32 %v7089_v63, %v7068_v31 }
 0x59c   : > { %v7103_v17 = vadd.f32 %v7084_v33, %v7067_v38 }
 0x59d   : > { %v7105_v56 = vadd.f32 %v7089_v63, %v7069_v51  ;;  %7117 = vst [vmem:[%s12934_s28 + $0x18] sm:$0xff] %v7104_v21 }
 0x59e   : > { %7116 = vst.msk [vmem:[%s12934_s28 + $0x10] sm:$0xff] %vm7115_vm1, %v7103_v17 }
 0x59f   : > { %v6917_v22 = vpop.f32.mrf.mxu3  ;;  %7118 = vst [vmem:[%s12934_s28 + $0x20] sm:$0xff] %v7105_v56 }
 0x5a0   : > { %v6931_v10 = vadd.f32 %v6917_v22, %v6792_v35  ;;  %v7001_v2 = vpop.f32.mrf.mxu0 }
 0x5a1   : > { %v7071_v13 = vadd.f32 %v7001_v2, %v6932_v0  ;;  %v7059_v18 = vpop.f32.mrf.mxu2 }
 0x5a2   : > { %v7030_v16 = vpop.f32.mrf.mxu1  ;;  %v7070_v61 = vadd.f32 %v7056_v25, %v6931_v10 }
 0x5a3   : > { %v7072_v49 = vadd.f32 %v7030_v16, %v6933_v6  ;;  %v7107_v58 = vadd.f32 %v7094_v32, %v7071_v13 }
 0x5a4   : > { %v7106_v8 = vadd.f32 %v7089_v63, %v7070_v61 }
 0x5a5   : > { %v7108_v29 = vadd.f32 %v7094_v32, %v7072_v49  ;;  %7120 = vst [vmem:[%s12934_s28 + $0x30] sm:$0xff] %v7107_v58 }
 0x5a6   : > { %7119 = vst.msk [vmem:[%s12934_s28 + $0x28] sm:$0xff] %vm7115_vm1, %v7106_v8 }
 0x5a7   : > { %v6920_v54 = vpop.f32.mrf.mxu3  ;;  %7121 = vst [vmem:[%s12934_s28 + $0x38] sm:$0xff] %v7108_v29 }
 0x5a8   : > { %v6934_v1 = vadd.f32 %v6920_v54, %v6795_v23  ;;  %v7004_v7 = vpop.f32.mrf.mxu0 }
 0x5a9   : > { %v7074_v33 = vadd.f32 %v7004_v7, %v6935_v4  ;;  %v7062_v14 = vpop.f32.mrf.mxu2 }
 0x5aa   : > { %v7033_v43 = vpop.f32.mrf.mxu1  ;;  %v7073_v26 = vadd.f32 %v7059_v18, %v6934_v1 }
 0x5ab   : > { %v7075_v12 = vadd.f32 %v7033_v43, %v6936_v41  ;;  %v7110_v53 = vadd.f32 %v7099_v9, %v7074_v33 }
 0x5ac   : > { %v7109_v45 = vadd.f32 %v7094_v32, %v7073_v26 }
 0x5ad   : > { %v7111_v48 = vadd.f32 %v7099_v9, %v7075_v12  ;;  %7123 = vst [vmem:[%s12934_s28 + $0x48] sm:$0xff] %v7110_v53 }
 0x5ae   : > { %7122 = vst.msk [vmem:[%s12934_s28 + $0x40] sm:$0xff] %vm7115_vm1, %v7109_v45 }
 0x5af   : > { %v6923_v5 = vpop.f32.mrf.mxu3  ;;  %7124 = vst [vmem:[%s12934_s28 + $0x50] sm:$0xff] %v7111_v48 }
 0x5b0   : > { %v6937_v57 = vadd.f32 %v6923_v5, %v6798_v55 }
 0x5b2   : > { %v7076_v20 = vadd.f32 %v7062_v14, %v6937_v57 }
 0x5b4   : > { %v7112_v19 = vadd.f32 %v7099_v9, %v7076_v20 }
 0x5b6   : > { %7125 = vst.msk [vmem:[%s12934_s28 + $0x58] sm:$0xff] %vm7115_vm1, %v7112_v19 }
 0x5b7   : > { %8963 = shalt.err (!%p8960_p3)
}
 0x5b8   : > { %s9046_s8 = smov 384   ;;  %s9047_s9 = smov 24  }
 0x5b9   : > { %8002 = dma.vmem_to_hbm [thread:$0]  (%p9106_p5), %s7140_s16, 1536, %s7142_s6, %s7127_s19, %s9046_s8, %s9046_s8, %s9047_s9  }
 0x5ba PF: > { %p8008_p4 = scmp.ge.s32.totalorder %s8998_s15, 2  ;;  %s7156_s10 = sand.u32 1, %s8986_s12  }
 0x5bb   : > { %s7157_s11 = scalar_lea.sflag [#allocation3], %s7156_s10 }
 0x5bc   : > { %p8005_p7 = pnand %p8008_p4, %p9110_p6 }
 0x5be   : > { %p8006_p8 = pneg %p8005_p7 }
 0x5c0   : > { %8981 = dma.done.wait (%p8006_p8), %s7157_s11, 1536  }
 0x5c1   : > { %8983 = vsyncadd (%p8006_p8), %s7157_s11, 4294965760  ;;  %p13_p9 = scmp.ge.s32.totalorder %s9093_s18, 4   ;;  %s13014_s12 = smov %s8990_s13 }
 0x5c2   : > { %s13015_s13 = smov %s8994_s14  ;;  %s13016_s14 = smov %s9104_s21 }
 0x5c3   : > { %s13017_s15 = smov %s9093_s18  ;;  %15 = sbr.rel (!%p13_p9) target bundleno = 3 (0x3), region = 115 }
 0x5c8   :  { %7163 = vsyncpa [#allocation3], 1 }
 0x5c9   :  { %7165 = vsyncpa [#allocation3 + $0x1], 1 }

</bundles_post_ra>
